<compile_context>
chip_gen: v7x
topology: tpu7x:2x2x1
jax: 0.10.0
libtpu: 0.0.40
codegen_flags: <defaults>
</compile_context>

<pallas_src>
import functools

import jax
import jax.numpy as jnp
from jax.experimental import pallas as pl
from jax.experimental.pallas import tpu as pltpu

NEG_SLOPE = 0.1
C_FEAT = 64  # n_feat must be 64 (module hard-codes Linear(64, ...) + groups=b*c algebra)


def _leaky(x, slope=NEG_SLOPE):
    return jnp.where(x > 0, x, slope * x)


# ----------------------------------------------------------------------------
# The single fused Pallas kernel
# ----------------------------------------------------------------------------
def _dag1d_kernel(x_ref, deg_ref, t_ref,
                  d1_kw1, d1_kw2, d1_cw, d1_cb, d1_ca1, d1_ca2,
                  c1_w, c1_b,
                  d2_kw1, d2_kw2, d2_cw, d2_cb, d2_ca1, d2_ca2,
                  c2_w, c2_b,
                  tail_w, tail_b,
                  o_ref, *, k, n_blocks):
    C = C_FEAT
    x0 = x_ref[...]                           # (BL, C)   channels-last activation
    deg = deg_ref[...]                        # (BL, 64)  row-replicated degradation
    shifts = [t_ref[j] for j in range(k)]     # each (BL, BL) 0/1 selection matrix

    def dot(a, b):
        return jnp.dot(a, b, preferred_element_type=jnp.float32)

    def shift(a, j):
        # rows of `a` shifted by (j - k//2) along L inside each batch, zero-padded.
        return dot(shifts[j], a)

    def conv_k(a, w_ref, b_ref, blk):
        # dense Conv1d(C, C, k, padding=k//2, bias=True) in channels-last layout
        acc = dot(shift(a, 0), w_ref[blk, 0])
        for j in range(1, k):
            acc = acc + dot(shift(a, j), w_ref[blk, j])
        return acc + b_ref[blk]               # (BL, C) + (1, C)

    def da_conv(a, kw1, kw2, cw, cb, ca1, ca2, blk):
        # per-sample depthwise kernel predicted from the degradation embedding
        h = _leaky(dot(deg, kw1[blk]))        # (BL, 64)
        mlp = dot(h, kw2[blk])                # (BL, k*C), tap-major columns
        dw = mlp[:, 0:C] * shift(a, 0)
        for j in range(1, k):
            dw = dw + mlp[:, j * C:(j + 1) * C] * shift(a, j)
        dw = _leaky(dw)                       # grouped conv + LeakyReLU
        # 1x1 conv (+bias)
        y = dot(dw, cw[blk]) + cb[blk]
        # channel attention
        hc = _leaky(dot(deg, ca1[blk]))
        att = jax.nn.sigmoid(dot(hc, ca2[blk]))
        return y + a * att

    res = x0
    for blk in range(n_blocks):               # static unroll: all weights stay in VMEM
        out = _leaky(da_conv(res, d1_kw1, d1_kw2, d1_cw, d1_cb, d1_ca1, d1_ca2, blk))
        out = _leaky(conv_k(out, c1_w, c1_b, blk))
        out = _leaky(da_conv(out, d2_kw1, d2_kw2, d2_cw, d2_cb, d2_ca1, d2_ca2, blk))
        res = conv_k(out, c2_w, c2_b, blk) + res
    o_ref[...] = conv_k(res, tail_w, tail_b, 0) + x0


# ----------------------------------------------------------------------------
# Host-side helpers (one-time layout prep; no per-forward transposes)
# ----------------------------------------------------------------------------
def _shift_mats(B, L, k):
    """(k, B*L, B*L) 0/1 matrices: T_j @ a == a shifted by (j - k//2) in L, zero-padded."""
    p = k // 2
    BL = B * L
    rows = jnp.arange(BL)
    lpos = rows % L
    cols = jnp.arange(BL)
    mats = []
    for j in range(k):
        s = j - p
        valid = (lpos + s >= 0) & (lpos + s < L)
        sel = (cols[None, :] == (rows + s)[:, None]) & valid[:, None]
        mats.append(sel.astype(jnp.float32))
    return jnp.stack(mats, 0)


def prepare_params(params, k):
    """Precompute all kernel-friendly weight layouts once (per perf review)."""
    C = C_FEAT
    blocks = params['blocks']

    def prep_da(p):
        # Permute Linear(64, 64*k) rows from (channel, tap) to (tap, channel) order
        # so the MLP output can be lane-sliced per tap inside the kernel.
        w2 = p['k_w2'].reshape(C, k, C).transpose(1, 0, 2).reshape(k * C, C)
        return (p['k_w1'].T,                     # (64, 64)
                w2.T,                            # (64, k*C)  tap-major columns
                p['conv_w'][:, :, 0].T,          # (C, C)     1x1 conv
                p['conv_b'].reshape(1, C),
                p['ca_w1'][:, :, 0].T,           # (64, r)
                p['ca_w2'][:, :, 0].T)           # (r, C)

    def stack_da(which):
        per = [prep_da(b[which]) for b in blocks]
        return tuple(jnp.stack([p[i] for p in per], 0) for i in range(6))

    def prep_conv(w):                            # (Cout, Cin, k) -> (k, Cin, Cout)
        return jnp.transpose(w, (2, 1, 0))

    d1 = stack_da('da1')
    d2 = stack_da('da2')
    c1_w = jnp.stack([prep_conv(b['c1_w']) for b in blocks], 0)
    c1_b = jnp.stack([b['c1_b'].reshape(1, C) for b in blocks], 0)
    c2_w = jnp.stack([prep_conv(b['c2_w']) for b in blocks], 0)
    c2_b = jnp.stack([b['c2_b'].reshape(1, C) for b in blocks], 0)
    tail_w = prep_conv(params['tail_w'])[None]   # (1, k, C, C)
    tail_b = params['tail_b'].reshape(1, 1, C)
    return d1 + (c1_w, c1_b) + d2 + (c2_w, c2_b) + (tail_w, tail_b)


def _full_spec(a):
    nd = a.ndim
    return pl.BlockSpec(a.shape, lambda i, _z=(0,) * nd: _z)


def dag1d_forward(prep, x0, deg, k, n_blocks):
    B, C, L = x0.shape
    assert C == C_FEAT, "n_feat must be 64 (module hard-codes Linear(64, ...))"
    assert k % 2 == 1, "kernel_size must be odd for PyTorch 'same' padding equivalence"
    BL = B * L
    x_flat = jnp.transpose(x0, (0, 2, 1)).reshape(BL, C)   # channels-last, lane-dense
    deg_full = jnp.repeat(deg, L, axis=0)                  # (BL, 64)
    shifts = _shift_mats(B, L, k)                          # constant-folded under jit
    args = (x_flat, deg_full, shifts) + tuple(prep)
    kern = functools.partial(_dag1d_kernel, k=k, n_blocks=n_blocks)
    out_flat = pl.pallas_call(
        kern,
        out_shape=jax.ShapeDtypeStruct((BL, C), jnp.float32),
        grid=(1,),
        in_specs=[_full_spec(a) for a in args],
        out_specs=pl.BlockSpec((BL, C), lambda i: (0, 0)),
        compiler_params=pltpu.CompilerParams(
            dimension_semantics=("arbitrary",)),
    )(*args)
    return jnp.transpose(out_flat.reshape(B, L, C), (0, 2, 1))


# ----------------------------------------------------------------------------
# Deterministic parameter init (synthetic; PyTorch-like shapes)
# ----------------------------------------------------------------------------
def init_da_conv(key, k, reduction, C):
    ks = jax.random.split(key, 6)
    r = C // reduction
    n = jax.random.normal
    return {
        'k_w1':   n(ks[0], (64, 64), jnp.float32) / 8.0,
        'k_w2':   n(ks[1], (64 * k, 64), jnp.float32) / 8.0,
        'conv_w': n(ks[2], (C, C, 1), jnp.float32) / 8.0,
        'conv_b': n(ks[3], (C,), jnp.float32) * 0.1,
        'ca_w1':  n(ks[4], (r, 64, 1), jnp.float32) / 8.0,
        'ca_w2':  n(ks[5], (C, r, 1), jnp.float32) / jnp.sqrt(r),
    }


def init_dab(key, k, reduction, C):
    ks = jax.random.split(key, 6)
    n = jax.random.normal
    s = 1.0 / jnp.sqrt(C * k)
    return {
        'da1': init_da_conv(ks[0], k, reduction, C),
        'da2': init_da_conv(ks[1], k, reduction, C),
        'c1_w': n(ks[2], (C, C, k), jnp.float32) * s,
        'c1_b': n(ks[3], (C,), jnp.float32) * 0.1,
        'c2_w': n(ks[4], (C, C, k), jnp.float32) * s,
        'c2_b': n(ks[5], (C,), jnp.float32) * 0.1,
    }


def init_params(key, k, reduction, n_blocks, C):
    keys = jax.random.split(key, n_blocks + 2)
    n = jax.random.normal
    return {
        'blocks': [init_dab(keys[i], k, reduction, C) for i in range(n_blocks)],
        'tail_w': n(keys[n_blocks], (C, C, k), jnp.float32) / jnp.sqrt(C * k),
        'tail_b': n(keys[n_blocks + 1], (C,), jnp.float32) * 0.1,
    }


# ----------------------------------------------------------------------------
# Pure-JAX reference (mirrors the PyTorch math) for a sanity check
# ----------------------------------------------------------------------------
def ref_conv1d(x, w, b, k):
    B, C, L = x.shape
    p = k // 2
    xp = jnp.pad(x, ((0, 0), (0, 0), (p, p)))
    out = jnp.zeros((B, w.shape[0], L), jnp.float32)
    for j in range(k):
        out = out + jnp.einsum('oi,bil->bol', w[:, :, j], xp[:, :, j:j + L])
    return out + b[None, :, None]


def ref_da_conv(p, feat, deg, k):
    B, C, L = feat.shape
    ker = (_leaky(deg @ p['k_w1'].T) @ p['k_w2'].T).reshape(B, C, k)
    pd = (k - 1) // 2
    xp = jnp.pad(feat, ((0, 0), (0, 0), (pd, pd)))
    dw = jnp.zeros((B, C, L), jnp.float32)
    for j in range(k):
        dw = dw + ker[:, :, j:j + 1] * xp[:, :, j:j + L]
    dw = _leaky(dw)
    out = jnp.einsum('oi,bil->bol', p['conv_w'][:, :, 0], dw) + p['conv_b'][None, :, None]
    att = jax.nn.sigmoid(_leaky(deg @ p['ca_w1'][:, :, 0].T) @ p['ca_w2'][:, :, 0].T)
    return out + feat * att[:, :, None]


def ref_dab(p, x0, deg, k):
    out = _leaky(ref_da_conv(p['da1'], x0, deg, k))
    out = _leaky(ref_conv1d(out, p['c1_w'], p['c1_b'], k))
    out = _leaky(ref_da_conv(p['da2'], out, deg, k))
    return ref_conv1d(out, p['c2_w'], p['c2_b'], k) + x0


def ref_dag1d(params, x0, deg, k):
    res = x0
    for p in params['blocks']:
        res = ref_dab(p, res, deg, k)
    return ref_conv1d(res, params['tail_w'], params['tail_b'], k) + x0


# ----------------------------------------------------------------------------
if __name__ == "__main__":
    key = jax.random.PRNGKey(0)
    kx, kd, kp = jax.random.split(key, 3)

    B, C, L = 2, C_FEAT, 16       # n_feat forced to 64 by the module definition
    K, REDUCTION, N_BLOCKS = 3, 8, 2

    x0 = jax.random.normal(kx, (B, C, L), jnp.float32)     # x[0]
    deg = jax.random.normal(kd, (B, 64), jnp.float32)       # x[1] degradation embedding
    params = init_params(kp, K, REDUCTION, N_BLOCKS, C)
    prep = prepare_params(params, K)                        # one-time weight relayout

    fwd = jax.jit(lambda pr, a, d: dag1d_forward(pr, a, d, K, N_BLOCKS))
    out = jax.block_until_ready(fwd(prep, x0, deg))

    # Reference at full-f32 matmul precision (XLA's default TPU f32 matmul is
    # low precision); tolerance tightened 5x vs the previous 5e-2.
    with jax.default_matmul_precision('float32'):
        ref = ref_dag1d(params, x0, deg, K)
    err = float(jnp.max(jnp.abs(out - ref)))
    assert out.shape == (B, C, L)
    assert err < 1e-2, f"max abs err {err}"
    print("KERNEL_OK")
</pallas_src>

<mosaic_0001>
module attributes {stable_mosaic.version = 11 : i64} {
  func.func @_dag1d_kernel(%arg0: i32, %arg1: memref<32x64xf32, #tpu.memory_space<vmem>>, %arg2: memref<32x64xf32, #tpu.memory_space<vmem>>, %arg3: memref<3x32x32xf32, #tpu.memory_space<vmem>>, %arg4: memref<2x64x64xf32, #tpu.memory_space<vmem>>, %arg5: memref<2x64x192xf32, #tpu.memory_space<vmem>>, %arg6: memref<2x64x64xf32, #tpu.memory_space<vmem>>, %arg7: memref<2x1x64xf32, #tpu.memory_space<vmem>>, %arg8: memref<2x64x8xf32, #tpu.memory_space<vmem>>, %arg9: memref<2x8x64xf32, #tpu.memory_space<vmem>>, %arg10: memref<2x3x64x64xf32, #tpu.memory_space<vmem>>, %arg11: memref<2x1x64xf32, #tpu.memory_space<vmem>>, %arg12: memref<2x64x64xf32, #tpu.memory_space<vmem>>, %arg13: memref<2x64x192xf32, #tpu.memory_space<vmem>>, %arg14: memref<2x64x64xf32, #tpu.memory_space<vmem>>, %arg15: memref<2x1x64xf32, #tpu.memory_space<vmem>>, %arg16: memref<2x64x8xf32, #tpu.memory_space<vmem>>, %arg17: memref<2x8x64xf32, #tpu.memory_space<vmem>>, %arg18: memref<2x3x64x64xf32, #tpu.memory_space<vmem>>, %arg19: memref<2x1x64xf32, #tpu.memory_space<vmem>>, %arg20: memref<1x3x64x64xf32, #tpu.memory_space<vmem>>, %arg21: memref<1x1x64xf32, #tpu.memory_space<vmem>>, %arg22: memref<32x64xf32, #tpu.memory_space<vmem>>) attributes {dimension_semantics = [#tpu.dimension_semantics<arbitrary>], iteration_bounds = array<i64: 1>, scalar_prefetch = 0 : i64, scratch_operands = 0 : i64, tpu.core_type = #tpu.core_type<tc>, window_params = [{pipeline_mode = #tpu.pipeline_mode<synchronous>, transform_indices = @transform_0, window_bounds = array<i64: 32, 64>}, {pipeline_mode = #tpu.pipeline_mode<synchronous>, transform_indices = @transform_1, window_bounds = array<i64: 32, 64>}, {pipeline_mode = #tpu.pipeline_mode<synchronous>, transform_indices = @transform_2, window_bounds = array<i64: 3, 32, 32>}, {pipeline_mode = #tpu.pipeline_mode<synchronous>, transform_indices = @transform_3, window_bounds = array<i64: 2, 64, 64>}, {pipeline_mode = #tpu.pipeline_mode<synchronous>, transform_indices = @transform_4, window_bounds = array<i64: 2, 64, 192>}, {pipeline_mode = #tpu.pipeline_mode<synchronous>, transform_indices = @transform_5, window_bounds = array<i64: 2, 64, 64>}, {pipeline_mode = #tpu.pipeline_mode<synchronous>, transform_indices = @transform_6, window_bounds = array<i64: 2, 1, 64>}, {pipeline_mode = #tpu.pipeline_mode<synchronous>, transform_indices = @transform_7, window_bounds = array<i64: 2, 64, 8>}, {pipeline_mode = #tpu.pipeline_mode<synchronous>, transform_indices = @transform_8, window_bounds = array<i64: 2, 8, 64>}, {pipeline_mode = #tpu.pipeline_mode<synchronous>, transform_indices = @transform_9, window_bounds = array<i64: 2, 3, 64, 64>}, {pipeline_mode = #tpu.pipeline_mode<synchronous>, transform_indices = @transform_10, window_bounds = array<i64: 2, 1, 64>}, {pipeline_mode = #tpu.pipeline_mode<synchronous>, transform_indices = @transform_11, window_bounds = array<i64: 2, 64, 64>}, {pipeline_mode = #tpu.pipeline_mode<synchronous>, transform_indices = @transform_12, window_bounds = array<i64: 2, 64, 192>}, {pipeline_mode = #tpu.pipeline_mode<synchronous>, transform_indices = @transform_13, window_bounds = array<i64: 2, 64, 64>}, {pipeline_mode = #tpu.pipeline_mode<synchronous>, transform_indices = @transform_14, window_bounds = array<i64: 2, 1, 64>}, {pipeline_mode = #tpu.pipeline_mode<synchronous>, transform_indices = @transform_15, window_bounds = array<i64: 2, 64, 8>}, {pipeline_mode = #tpu.pipeline_mode<synchronous>, transform_indices = @transform_16, window_bounds = array<i64: 2, 8, 64>}, {pipeline_mode = #tpu.pipeline_mode<synchronous>, transform_indices = @transform_17, window_bounds = array<i64: 2, 3, 64, 64>}, {pipeline_mode = #tpu.pipeline_mode<synchronous>, transform_indices = @transform_18, window_bounds = array<i64: 2, 1, 64>}, {pipeline_mode = #tpu.pipeline_mode<synchronous>, transform_indices = @transform_19, window_bounds = array<i64: 1, 3, 64, 64>}, {pipeline_mode = #tpu.pipeline_mode<synchronous>, transform_indices = @transform_20, window_bounds = array<i64: 1, 1, 64>}, {pipeline_mode = #tpu.pipeline_mode<synchronous>, transform_indices = @transform_21, window_bounds = array<i64: 32, 64>}]} {
    %c0 = arith.constant 0 : index
    %c0_0 = arith.constant 0 : index
    %0 = vector.load %arg1[%c0, %c0_0] : memref<32x64xf32, #tpu.memory_space<vmem>>, vector<32x64xf32>
    %c0_1 = arith.constant 0 : index
    %c0_2 = arith.constant 0 : index
    %1 = vector.load %arg2[%c0_1, %c0_2] : memref<32x64xf32, #tpu.memory_space<vmem>>, vector<32x64xf32>
    %c0_3 = arith.constant 0 : index
    %c0_4 = arith.constant 0 : index
    %c0_5 = arith.constant 0 : index
    %2 = vector.load %arg3[%c0_3, %c0_4, %c0_5] : memref<3x32x32xf32, #tpu.memory_space<vmem>>, vector<1x32x32xf32>
    %3 = vector.shape_cast %2 : vector<1x32x32xf32> to vector<32x32xf32>
    %c1 = arith.constant 1 : index
    %c0_6 = arith.constant 0 : index
    %c0_7 = arith.constant 0 : index
    %4 = vector.load %arg3[%c1, %c0_6, %c0_7] : memref<3x32x32xf32, #tpu.memory_space<vmem>>, vector<1x32x32xf32>
    %5 = vector.shape_cast %4 : vector<1x32x32xf32> to vector<32x32xf32>
    %c2 = arith.constant 2 : index
    %c0_8 = arith.constant 0 : index
    %c0_9 = arith.constant 0 : index
    %6 = vector.load %arg3[%c2, %c0_8, %c0_9] : memref<3x32x32xf32, #tpu.memory_space<vmem>>, vector<1x32x32xf32>
    %7 = vector.shape_cast %6 : vector<1x32x32xf32> to vector<32x32xf32>
    %c0_10 = arith.constant 0 : index
    %c0_11 = arith.constant 0 : index
    %c0_12 = arith.constant 0 : index
    %8 = vector.load %arg4[%c0_10, %c0_11, %c0_12] : memref<2x64x64xf32, #tpu.memory_space<vmem>>, vector<1x64x64xf32>
    %9 = vector.shape_cast %8 : vector<1x64x64xf32> to vector<64x64xf32>
    %cst = arith.constant dense<0.000000e+00> : vector<32x64xf32>
    %10 = tpu.matmul %1, %9, %cst {dimension_numbers = #tpu.dot_dimension_numbers<[1], [0], [0], [1], [0, 0, 1, 1], [], []>} : vector<32x64xf32>, vector<64x64xf32>, vector<32x64xf32> -> vector<32x64xf32>
    %cst_13 = arith.constant 0.000000e+00 : f32
    %11 = vector.broadcast %cst_13 : f32 to vector<32x64xf32>
    %12 = arith.cmpf ogt, %10, %11 : vector<32x64xf32>
    %cst_14 = arith.constant 1.000000e-01 : f32
    %13 = vector.broadcast %cst_14 : f32 to vector<32x64xf32>
    %14 = arith.mulf %13, %10 : vector<32x64xf32>
    %15 = arith.select %12, %10, %14 : vector<32x64xi1>, vector<32x64xf32>
    %c0_15 = arith.constant 0 : index
    %c0_16 = arith.constant 0 : index
    %c0_17 = arith.constant 0 : index
    %16 = vector.load %arg5[%c0_15, %c0_16, %c0_17] : memref<2x64x192xf32, #tpu.memory_space<vmem>>, vector<1x64x192xf32>
    %17 = vector.shape_cast %16 : vector<1x64x192xf32> to vector<64x192xf32>
    %cst_18 = arith.constant dense<0.000000e+00> : vector<32x192xf32>
    %18 = tpu.matmul %15, %17, %cst_18 {dimension_numbers = #tpu.dot_dimension_numbers<[1], [0], [0], [1], [0, 0, 1, 1], [], []>} : vector<32x64xf32>, vector<64x192xf32>, vector<32x192xf32> -> vector<32x192xf32>
    %19 = vector.extract_strided_slice %18 {offsets = [0, 0], sizes = [32, 64], strides = [1, 1]} : vector<32x192xf32> to vector<32x64xf32>
    %cst_19 = arith.constant dense<0.000000e+00> : vector<32x64xf32>
    %20 = tpu.matmul %3, %0, %cst_19 {dimension_numbers = #tpu.dot_dimension_numbers<[1], [0], [0], [1], [0, 0, 1, 1], [], []>} : vector<32x32xf32>, vector<32x64xf32>, vector<32x64xf32> -> vector<32x64xf32>
    %21 = arith.mulf %19, %20 : vector<32x64xf32>
    %22 = vector.extract_strided_slice %18 {offsets = [0, 64], sizes = [32, 64], strides = [1, 1]} : vector<32x192xf32> to vector<32x64xf32>
    %cst_20 = arith.constant dense<0.000000e+00> : vector<32x64xf32>
    %23 = tpu.matmul %5, %0, %cst_20 {dimension_numbers = #tpu.dot_dimension_numbers<[1], [0], [0], [1], [0, 0, 1, 1], [], []>} : vector<32x32xf32>, vector<32x64xf32>, vector<32x64xf32> -> vector<32x64xf32>
    %24 = arith.mulf %22, %23 : vector<32x64xf32>
    %25 = arith.addf %21, %24 : vector<32x64xf32>
    %26 = vector.extract_strided_slice %18 {offsets = [0, 128], sizes = [32, 64], strides = [1, 1]} : vector<32x192xf32> to vector<32x64xf32>
    %cst_21 = arith.constant dense<0.000000e+00> : vector<32x64xf32>
    %27 = tpu.matmul %7, %0, %cst_21 {dimension_numbers = #tpu.dot_dimension_numbers<[1], [0], [0], [1], [0, 0, 1, 1], [], []>} : vector<32x32xf32>, vector<32x64xf32>, vector<32x64xf32> -> vector<32x64xf32>
    %28 = arith.mulf %26, %27 : vector<32x64xf32>
    %29 = arith.addf %25, %28 : vector<32x64xf32>
    %cst_22 = arith.constant 0.000000e+00 : f32
    %30 = vector.broadcast %cst_22 : f32 to vector<32x64xf32>
    %31 = arith.cmpf ogt, %29, %30 : vector<32x64xf32>
    %cst_23 = arith.constant 1.000000e-01 : f32
    %32 = vector.broadcast %cst_23 : f32 to vector<32x64xf32>
    %33 = arith.mulf %32, %29 : vector<32x64xf32>
    %34 = arith.select %31, %29, %33 : vector<32x64xi1>, vector<32x64xf32>
    %c0_24 = arith.constant 0 : index
    %c0_25 = arith.constant 0 : index
    %c0_26 = arith.constant 0 : index
    %35 = vector.load %arg6[%c0_24, %c0_25, %c0_26] : memref<2x64x64xf32, #tpu.memory_space<vmem>>, vector<1x64x64xf32>
    %36 = vector.shape_cast %35 : vector<1x64x64xf32> to vector<64x64xf32>
    %cst_27 = arith.constant dense<0.000000e+00> : vector<32x64xf32>
    %37 = tpu.matmul %34, %36, %cst_27 {dimension_numbers = #tpu.dot_dimension_numbers<[1], [0], [0], [1], [0, 0, 1, 1], [], []>} : vector<32x64xf32>, vector<64x64xf32>, vector<32x64xf32> -> vector<32x64xf32>
    %c0_28 = arith.constant 0 : index
    %c0_29 = arith.constant 0 : index
    %c0_30 = arith.constant 0 : index
    %38 = vector.load %arg7[%c0_28, %c0_29, %c0_30] : memref<2x1x64xf32, #tpu.memory_space<vmem>>, vector<1x1x64xf32>
    %39 = vector.shape_cast %38 : vector<1x1x64xf32> to vector<1x64xf32>
    %40 = vector.broadcast %39 : vector<1x64xf32> to vector<32x64xf32>
    %41 = arith.addf %37, %40 : vector<32x64xf32>
    %c0_31 = arith.constant 0 : index
    %c0_32 = arith.constant 0 : index
    %c0_33 = arith.constant 0 : index
    %42 = vector.load %arg8[%c0_31, %c0_32, %c0_33] : memref<2x64x8xf32, #tpu.memory_space<vmem>>, vector<1x64x8xf32>
    %43 = vector.shape_cast %42 : vector<1x64x8xf32> to vector<64x8xf32>
    %cst_34 = arith.constant dense<0.000000e+00> : vector<32x8xf32>
    %44 = tpu.matmul %1, %43, %cst_34 {dimension_numbers = #tpu.dot_dimension_numbers<[1], [0], [0], [1], [0, 0, 1, 1], [], []>} : vector<32x64xf32>, vector<64x8xf32>, vector<32x8xf32> -> vector<32x8xf32>
    %cst_35 = arith.constant 0.000000e+00 : f32
    %45 = vector.broadcast %cst_35 : f32 to vector<32x8xf32>
    %46 = arith.cmpf ogt, %44, %45 : vector<32x8xf32>
    %cst_36 = arith.constant 1.000000e-01 : f32
    %47 = vector.broadcast %cst_36 : f32 to vector<32x8xf32>
    %48 = arith.mulf %47, %44 : vector<32x8xf32>
    %49 = arith.select %46, %44, %48 : vector<32x8xi1>, vector<32x8xf32>
    %c0_37 = arith.constant 0 : index
    %c0_38 = arith.constant 0 : index
    %c0_39 = arith.constant 0 : index
    %50 = vector.load %arg9[%c0_37, %c0_38, %c0_39] : memref<2x8x64xf32, #tpu.memory_space<vmem>>, vector<1x8x64xf32>
    %51 = vector.shape_cast %50 : vector<1x8x64xf32> to vector<8x64xf32>
    %cst_40 = arith.constant dense<0.000000e+00> : vector<32x64xf32>
    %52 = tpu.matmul %49, %51, %cst_40 {dimension_numbers = #tpu.dot_dimension_numbers<[1], [0], [0], [1], [0, 0, 1, 1], [], []>} : vector<32x8xf32>, vector<8x64xf32>, vector<32x64xf32> -> vector<32x64xf32>
    %53 = arith.negf %52 : vector<32x64xf32>
    %54 = math.exp %53 : vector<32x64xf32>
    %cst_41 = arith.constant 1.000000e+00 : f32
    %55 = vector.broadcast %cst_41 : f32 to vector<32x64xf32>
    %56 = arith.addf %55, %54 : vector<32x64xf32>
    %57 = arith.divf %55, %56 : vector<32x64xf32>
    %58 = arith.mulf %0, %57 : vector<32x64xf32>
    %59 = arith.addf %41, %58 : vector<32x64xf32>
    %cst_42 = arith.constant 0.000000e+00 : f32
    %60 = vector.broadcast %cst_42 : f32 to vector<32x64xf32>
    %61 = arith.cmpf ogt, %59, %60 : vector<32x64xf32>
    %cst_43 = arith.constant 1.000000e-01 : f32
    %62 = vector.broadcast %cst_43 : f32 to vector<32x64xf32>
    %63 = arith.mulf %62, %59 : vector<32x64xf32>
    %64 = arith.select %61, %59, %63 : vector<32x64xi1>, vector<32x64xf32>
    %cst_44 = arith.constant dense<0.000000e+00> : vector<32x64xf32>
    %65 = tpu.matmul %3, %64, %cst_44 {dimension_numbers = #tpu.dot_dimension_numbers<[1], [0], [0], [1], [0, 0, 1, 1], [], []>} : vector<32x32xf32>, vector<32x64xf32>, vector<32x64xf32> -> vector<32x64xf32>
    %c0_45 = arith.constant 0 : index
    %c0_46 = arith.constant 0 : index
    %c0_47 = arith.constant 0 : index
    %c0_48 = arith.constant 0 : index
    %66 = vector.load %arg10[%c0_45, %c0_46, %c0_47, %c0_48] : memref<2x3x64x64xf32, #tpu.memory_space<vmem>>, vector<1x1x64x64xf32>
    %67 = vector.shape_cast %66 : vector<1x1x64x64xf32> to vector<64x64xf32>
    %cst_49 = arith.constant dense<0.000000e+00> : vector<32x64xf32>
    %68 = tpu.matmul %65, %67, %cst_49 {dimension_numbers = #tpu.dot_dimension_numbers<[1], [0], [0], [1], [0, 0, 1, 1], [], []>} : vector<32x64xf32>, vector<64x64xf32>, vector<32x64xf32> -> vector<32x64xf32>
    %cst_50 = arith.constant dense<0.000000e+00> : vector<32x64xf32>
    %69 = tpu.matmul %5, %64, %cst_50 {dimension_numbers = #tpu.dot_dimension_numbers<[1], [0], [0], [1], [0, 0, 1, 1], [], []>} : vector<32x32xf32>, vector<32x64xf32>, vector<32x64xf32> -> vector<32x64xf32>
    %c0_51 = arith.constant 0 : index
    %c1_52 = arith.constant 1 : index
    %c0_53 = arith.constant 0 : index
    %c0_54 = arith.constant 0 : index
    %70 = vector.load %arg10[%c0_51, %c1_52, %c0_53, %c0_54] : memref<2x3x64x64xf32, #tpu.memory_space<vmem>>, vector<1x1x64x64xf32>
    %71 = vector.shape_cast %70 : vector<1x1x64x64xf32> to vector<64x64xf32>
    %cst_55 = arith.constant dense<0.000000e+00> : vector<32x64xf32>
    %72 = tpu.matmul %69, %71, %cst_55 {dimension_numbers = #tpu.dot_dimension_numbers<[1], [0], [0], [1], [0, 0, 1, 1], [], []>} : vector<32x64xf32>, vector<64x64xf32>, vector<32x64xf32> -> vector<32x64xf32>
    %73 = arith.addf %68, %72 : vector<32x64xf32>
    %cst_56 = arith.constant dense<0.000000e+00> : vector<32x64xf32>
    %74 = tpu.matmul %7, %64, %cst_56 {dimension_numbers = #tpu.dot_dimension_numbers<[1], [0], [0], [1], [0, 0, 1, 1], [], []>} : vector<32x32xf32>, vector<32x64xf32>, vector<32x64xf32> -> vector<32x64xf32>
    %c0_57 = arith.constant 0 : index
    %c2_58 = arith.constant 2 : index
    %c0_59 = arith.constant 0 : index
    %c0_60 = arith.constant 0 : index
    %75 = vector.load %arg10[%c0_57, %c2_58, %c0_59, %c0_60] : memref<2x3x64x64xf32, #tpu.memory_space<vmem>>, vector<1x1x64x64xf32>
    %76 = vector.shape_cast %75 : vector<1x1x64x64xf32> to vector<64x64xf32>
    %cst_61 = arith.constant dense<0.000000e+00> : vector<32x64xf32>
    %77 = tpu.matmul %74, %76, %cst_61 {dimension_numbers = #tpu.dot_dimension_numbers<[1], [0], [0], [1], [0, 0, 1, 1], [], []>} : vector<32x64xf32>, vector<64x64xf32>, vector<32x64xf32> -> vector<32x64xf32>
    %78 = arith.addf %73, %77 : vector<32x64xf32>
    %c0_62 = arith.constant 0 : index
    %c0_63 = arith.constant 0 : index
    %c0_64 = arith.constant 0 : index
    %79 = vector.load %arg11[%c0_62, %c0_63, %c0_64] : memref<2x1x64xf32, #tpu.memory_space<vmem>>, vector<1x1x64xf32>
    %80 = vector.shape_cast %79 : vector<1x1x64xf32> to vector<1x64xf32>
    %81 = vector.broadcast %80 : vector<1x64xf32> to vector<32x64xf32>
    %82 = arith.addf %78, %81 : vector<32x64xf32>
    %cst_65 = arith.constant 0.000000e+00 : f32
    %83 = vector.broadcast %cst_65 : f32 to vector<32x64xf32>
    %84 = arith.cmpf ogt, %82, %83 : vector<32x64xf32>
    %cst_66 = arith.constant 1.000000e-01 : f32
    %85 = vector.broadcast %cst_66 : f32 to vector<32x64xf32>
    %86 = arith.mulf %85, %82 : vector<32x64xf32>
    %87 = arith.select %84, %82, %86 : vector<32x64xi1>, vector<32x64xf32>
    %c0_67 = arith.constant 0 : index
    %c0_68 = arith.constant 0 : index
    %c0_69 = arith.constant 0 : index
    %88 = vector.load %arg12[%c0_67, %c0_68, %c0_69] : memref<2x64x64xf32, #tpu.memory_space<vmem>>, vector<1x64x64xf32>
    %89 = vector.shape_cast %88 : vector<1x64x64xf32> to vector<64x64xf32>
    %cst_70 = arith.constant dense<0.000000e+00> : vector<32x64xf32>
    %90 = tpu.matmul %1, %89, %cst_70 {dimension_numbers = #tpu.dot_dimension_numbers<[1], [0], [0], [1], [0, 0, 1, 1], [], []>} : vector<32x64xf32>, vector<64x64xf32>, vector<32x64xf32> -> vector<32x64xf32>
    %cst_71 = arith.constant 0.000000e+00 : f32
    %91 = vector.broadcast %cst_71 : f32 to vector<32x64xf32>
    %92 = arith.cmpf ogt, %90, %91 : vector<32x64xf32>
    %cst_72 = arith.constant 1.000000e-01 : f32
    %93 = vector.broadcast %cst_72 : f32 to vector<32x64xf32>
    %94 = arith.mulf %93, %90 : vector<32x64xf32>
    %95 = arith.select %92, %90, %94 : vector<32x64xi1>, vector<32x64xf32>
    %c0_73 = arith.constant 0 : index
    %c0_74 = arith.constant 0 : index
    %c0_75 = arith.constant 0 : index
    %96 = vector.load %arg13[%c0_73, %c0_74, %c0_75] : memref<2x64x192xf32, #tpu.memory_space<vmem>>, vector<1x64x192xf32>
    %97 = vector.shape_cast %96 : vector<1x64x192xf32> to vector<64x192xf32>
    %cst_76 = arith.constant dense<0.000000e+00> : vector<32x192xf32>
    %98 = tpu.matmul %95, %97, %cst_76 {dimension_numbers = #tpu.dot_dimension_numbers<[1], [0], [0], [1], [0, 0, 1, 1], [], []>} : vector<32x64xf32>, vector<64x192xf32>, vector<32x192xf32> -> vector<32x192xf32>
    %99 = vector.extract_strided_slice %98 {offsets = [0, 0], sizes = [32, 64], strides = [1, 1]} : vector<32x192xf32> to vector<32x64xf32>
    %cst_77 = arith.constant dense<0.000000e+00> : vector<32x64xf32>
    %100 = tpu.matmul %3, %87, %cst_77 {dimension_numbers = #tpu.dot_dimension_numbers<[1], [0], [0], [1], [0, 0, 1, 1], [], []>} : vector<32x32xf32>, vector<32x64xf32>, vector<32x64xf32> -> vector<32x64xf32>
    %101 = arith.mulf %99, %100 : vector<32x64xf32>
    %102 = vector.extract_strided_slice %98 {offsets = [0, 64], sizes = [32, 64], strides = [1, 1]} : vector<32x192xf32> to vector<32x64xf32>
    %cst_78 = arith.constant dense<0.000000e+00> : vector<32x64xf32>
    %103 = tpu.matmul %5, %87, %cst_78 {dimension_numbers = #tpu.dot_dimension_numbers<[1], [0], [0], [1], [0, 0, 1, 1], [], []>} : vector<32x32xf32>, vector<32x64xf32>, vector<32x64xf32> -> vector<32x64xf32>
    %104 = arith.mulf %102, %103 : vector<32x64xf32>
    %105 = arith.addf %101, %104 : vector<32x64xf32>
    %106 = vector.extract_strided_slice %98 {offsets = [0, 128], sizes = [32, 64], strides = [1, 1]} : vector<32x192xf32> to vector<32x64xf32>
    %cst_79 = arith.constant dense<0.000000e+00> : vector<32x64xf32>
    %107 = tpu.matmul %7, %87, %cst_79 {dimension_numbers = #tpu.dot_dimension_numbers<[1], [0], [0], [1], [0, 0, 1, 1], [], []>} : vector<32x32xf32>, vector<32x64xf32>, vector<32x64xf32> -> vector<32x64xf32>
    %108 = arith.mulf %106, %107 : vector<32x64xf32>
    %109 = arith.addf %105, %108 : vector<32x64xf32>
    %cst_80 = arith.constant 0.000000e+00 : f32
    %110 = vector.broadcast %cst_80 : f32 to vector<32x64xf32>
    %111 = arith.cmpf ogt, %109, %110 : vector<32x64xf32>
    %cst_81 = arith.constant 1.000000e-01 : f32
    %112 = vector.broadcast %cst_81 : f32 to vector<32x64xf32>
    %113 = arith.mulf %112, %109 : vector<32x64xf32>
    %114 = arith.select %111, %109, %113 : vector<32x64xi1>, vector<32x64xf32>
    %c0_82 = arith.constant 0 : index
    %c0_83 = arith.constant 0 : index
    %c0_84 = arith.constant 0 : index
    %115 = vector.load %arg14[%c0_82, %c0_83, %c0_84] : memref<2x64x64xf32, #tpu.memory_space<vmem>>, vector<1x64x64xf32>
    %116 = vector.shape_cast %115 : vector<1x64x64xf32> to vector<64x64xf32>
    %cst_85 = arith.constant dense<0.000000e+00> : vector<32x64xf32>
    %117 = tpu.matmul %114, %116, %cst_85 {dimension_numbers = #tpu.dot_dimension_numbers<[1], [0], [0], [1], [0, 0, 1, 1], [], []>} : vector<32x64xf32>, vector<64x64xf32>, vector<32x64xf32> -> vector<32x64xf32>
    %c0_86 = arith.constant 0 : index
    %c0_87 = arith.constant 0 : index
    %c0_88 = arith.constant 0 : index
    %118 = vector.load %arg15[%c0_86, %c0_87, %c0_88] : memref<2x1x64xf32, #tpu.memory_space<vmem>>, vector<1x1x64xf32>
    %119 = vector.shape_cast %118 : vector<1x1x64xf32> to vector<1x64xf32>
    %120 = vector.broadcast %119 : vector<1x64xf32> to vector<32x64xf32>
    %121 = arith.addf %117, %120 : vector<32x64xf32>
    %c0_89 = arith.constant 0 : index
    %c0_90 = arith.constant 0 : index
    %c0_91 = arith.constant 0 : index
    %122 = vector.load %arg16[%c0_89, %c0_90, %c0_91] : memref<2x64x8xf32, #tpu.memory_space<vmem>>, vector<1x64x8xf32>
    %123 = vector.shape_cast %122 : vector<1x64x8xf32> to vector<64x8xf32>
    %cst_92 = arith.constant dense<0.000000e+00> : vector<32x8xf32>
    %124 = tpu.matmul %1, %123, %cst_92 {dimension_numbers = #tpu.dot_dimension_numbers<[1], [0], [0], [1], [0, 0, 1, 1], [], []>} : vector<32x64xf32>, vector<64x8xf32>, vector<32x8xf32> -> vector<32x8xf32>
    %cst_93 = arith.constant 0.000000e+00 : f32
    %125 = vector.broadcast %cst_93 : f32 to vector<32x8xf32>
    %126 = arith.cmpf ogt, %124, %125 : vector<32x8xf32>
    %cst_94 = arith.constant 1.000000e-01 : f32
    %127 = vector.broadcast %cst_94 : f32 to vector<32x8xf32>
    %128 = arith.mulf %127, %124 : vector<32x8xf32>
    %129 = arith.select %126, %124, %128 : vector<32x8xi1>, vector<32x8xf32>
    %c0_95 = arith.constant 0 : index
    %c0_96 = arith.constant 0 : index
    %c0_97 = arith.constant 0 : index
    %130 = vector.load %arg17[%c0_95, %c0_96, %c0_97] : memref<2x8x64xf32, #tpu.memory_space<vmem>>, vector<1x8x64xf32>
    %131 = vector.shape_cast %130 : vector<1x8x64xf32> to vector<8x64xf32>
    %cst_98 = arith.constant dense<0.000000e+00> : vector<32x64xf32>
    %132 = tpu.matmul %129, %131, %cst_98 {dimension_numbers = #tpu.dot_dimension_numbers<[1], [0], [0], [1], [0, 0, 1, 1], [], []>} : vector<32x8xf32>, vector<8x64xf32>, vector<32x64xf32> -> vector<32x64xf32>
    %133 = arith.negf %132 : vector<32x64xf32>
    %134 = math.exp %133 : vector<32x64xf32>
    %cst_99 = arith.constant 1.000000e+00 : f32
    %135 = vector.broadcast %cst_99 : f32 to vector<32x64xf32>
    %136 = arith.addf %135, %134 : vector<32x64xf32>
    %137 = arith.divf %135, %136 : vector<32x64xf32>
    %138 = arith.mulf %87, %137 : vector<32x64xf32>
    %139 = arith.addf %121, %138 : vector<32x64xf32>
    %cst_100 = arith.constant 0.000000e+00 : f32
    %140 = vector.broadcast %cst_100 : f32 to vector<32x64xf32>
    %141 = arith.cmpf ogt, %139, %140 : vector<32x64xf32>
    %cst_101 = arith.constant 1.000000e-01 : f32
    %142 = vector.broadcast %cst_101 : f32 to vector<32x64xf32>
    %143 = arith.mulf %142, %139 : vector<32x64xf32>
    %144 = arith.select %141, %139, %143 : vector<32x64xi1>, vector<32x64xf32>
    %cst_102 = arith.constant dense<0.000000e+00> : vector<32x64xf32>
    %145 = tpu.matmul %3, %144, %cst_102 {dimension_numbers = #tpu.dot_dimension_numbers<[1], [0], [0], [1], [0, 0, 1, 1], [], []>} : vector<32x32xf32>, vector<32x64xf32>, vector<32x64xf32> -> vector<32x64xf32>
    %c0_103 = arith.constant 0 : index
    %c0_104 = arith.constant 0 : index
    %c0_105 = arith.constant 0 : index
    %c0_106 = arith.constant 0 : index
    %146 = vector.load %arg18[%c0_103, %c0_104, %c0_105, %c0_106] : memref<2x3x64x64xf32, #tpu.memory_space<vmem>>, vector<1x1x64x64xf32>
    %147 = vector.shape_cast %146 : vector<1x1x64x64xf32> to vector<64x64xf32>
    %cst_107 = arith.constant dense<0.000000e+00> : vector<32x64xf32>
    %148 = tpu.matmul %145, %147, %cst_107 {dimension_numbers = #tpu.dot_dimension_numbers<[1], [0], [0], [1], [0, 0, 1, 1], [], []>} : vector<32x64xf32>, vector<64x64xf32>, vector<32x64xf32> -> vector<32x64xf32>
    %cst_108 = arith.constant dense<0.000000e+00> : vector<32x64xf32>
    %149 = tpu.matmul %5, %144, %cst_108 {dimension_numbers = #tpu.dot_dimension_numbers<[1], [0], [0], [1], [0, 0, 1, 1], [], []>} : vector<32x32xf32>, vector<32x64xf32>, vector<32x64xf32> -> vector<32x64xf32>
    %c0_109 = arith.constant 0 : index
    %c1_110 = arith.constant 1 : index
    %c0_111 = arith.constant 0 : index
    %c0_112 = arith.constant 0 : index
    %150 = vector.load %arg18[%c0_109, %c1_110, %c0_111, %c0_112] : memref<2x3x64x64xf32, #tpu.memory_space<vmem>>, vector<1x1x64x64xf32>
    %151 = vector.shape_cast %150 : vector<1x1x64x64xf32> to vector<64x64xf32>
    %cst_113 = arith.constant dense<0.000000e+00> : vector<32x64xf32>
    %152 = tpu.matmul %149, %151, %cst_113 {dimension_numbers = #tpu.dot_dimension_numbers<[1], [0], [0], [1], [0, 0, 1, 1], [], []>} : vector<32x64xf32>, vector<64x64xf32>, vector<32x64xf32> -> vector<32x64xf32>
    %153 = arith.addf %148, %152 : vector<32x64xf32>
    %cst_114 = arith.constant dense<0.000000e+00> : vector<32x64xf32>
    %154 = tpu.matmul %7, %144, %cst_114 {dimension_numbers = #tpu.dot_dimension_numbers<[1], [0], [0], [1], [0, 0, 1, 1], [], []>} : vector<32x32xf32>, vector<32x64xf32>, vector<32x64xf32> -> vector<32x64xf32>
    %c0_115 = arith.constant 0 : index
    %c2_116 = arith.constant 2 : index
    %c0_117 = arith.constant 0 : index
    %c0_118 = arith.constant 0 : index
    %155 = vector.load %arg18[%c0_115, %c2_116, %c0_117, %c0_118] : memref<2x3x64x64xf32, #tpu.memory_space<vmem>>, vector<1x1x64x64xf32>
    %156 = vector.shape_cast %155 : vector<1x1x64x64xf32> to vector<64x64xf32>
    %cst_119 = arith.constant dense<0.000000e+00> : vector<32x64xf32>
    %157 = tpu.matmul %154, %156, %cst_119 {dimension_numbers = #tpu.dot_dimension_numbers<[1], [0], [0], [1], [0, 0, 1, 1], [], []>} : vector<32x64xf32>, vector<64x64xf32>, vector<32x64xf32> -> vector<32x64xf32>
    %158 = arith.addf %153, %157 : vector<32x64xf32>
    %c0_120 = arith.constant 0 : index
    %c0_121 = arith.constant 0 : index
    %c0_122 = arith.constant 0 : index
    %159 = vector.load %arg19[%c0_120, %c0_121, %c0_122] : memref<2x1x64xf32, #tpu.memory_space<vmem>>, vector<1x1x64xf32>
    %160 = vector.shape_cast %159 : vector<1x1x64xf32> to vector<1x64xf32>
    %161 = vector.broadcast %160 : vector<1x64xf32> to vector<32x64xf32>
    %162 = arith.addf %158, %161 : vector<32x64xf32>
    %163 = arith.addf %162, %0 : vector<32x64xf32>
    %c1_123 = arith.constant 1 : index
    %c0_124 = arith.constant 0 : index
    %c0_125 = arith.constant 0 : index
    %164 = vector.load %arg4[%c1_123, %c0_124, %c0_125] : memref<2x64x64xf32, #tpu.memory_space<vmem>>, vector<1x64x64xf32>
    %165 = vector.shape_cast %164 : vector<1x64x64xf32> to vector<64x64xf32>
    %cst_126 = arith.constant dense<0.000000e+00> : vector<32x64xf32>
    %166 = tpu.matmul %1, %165, %cst_126 {dimension_numbers = #tpu.dot_dimension_numbers<[1], [0], [0], [1], [0, 0, 1, 1], [], []>} : vector<32x64xf32>, vector<64x64xf32>, vector<32x64xf32> -> vector<32x64xf32>
    %cst_127 = arith.constant 0.000000e+00 : f32
    %167 = vector.broadcast %cst_127 : f32 to vector<32x64xf32>
    %168 = arith.cmpf ogt, %166, %167 : vector<32x64xf32>
    %cst_128 = arith.constant 1.000000e-01 : f32
    %169 = vector.broadcast %cst_128 : f32 to vector<32x64xf32>
    %170 = arith.mulf %169, %166 : vector<32x64xf32>
    %171 = arith.select %168, %166, %170 : vector<32x64xi1>, vector<32x64xf32>
    %c1_129 = arith.constant 1 : index
    %c0_130 = arith.constant 0 : index
    %c0_131 = arith.constant 0 : index
    %172 = vector.load %arg5[%c1_129, %c0_130, %c0_131] : memref<2x64x192xf32, #tpu.memory_space<vmem>>, vector<1x64x192xf32>
    %173 = vector.shape_cast %172 : vector<1x64x192xf32> to vector<64x192xf32>
    %cst_132 = arith.constant dense<0.000000e+00> : vector<32x192xf32>
    %174 = tpu.matmul %171, %173, %cst_132 {dimension_numbers = #tpu.dot_dimension_numbers<[1], [0], [0], [1], [0, 0, 1, 1], [], []>} : vector<32x64xf32>, vector<64x192xf32>, vector<32x192xf32> -> vector<32x192xf32>
    %175 = vector.extract_strided_slice %174 {offsets = [0, 0], sizes = [32, 64], strides = [1, 1]} : vector<32x192xf32> to vector<32x64xf32>
    %cst_133 = arith.constant dense<0.000000e+00> : vector<32x64xf32>
    %176 = tpu.matmul %3, %163, %cst_133 {dimension_numbers = #tpu.dot_dimension_numbers<[1], [0], [0], [1], [0, 0, 1, 1], [], []>} : vector<32x32xf32>, vector<32x64xf32>, vector<32x64xf32> -> vector<32x64xf32>
    %177 = arith.mulf %175, %176 : vector<32x64xf32>
    %178 = vector.extract_strided_slice %174 {offsets = [0, 64], sizes = [32, 64], strides = [1, 1]} : vector<32x192xf32> to vector<32x64xf32>
    %cst_134 = arith.constant dense<0.000000e+00> : vector<32x64xf32>
    %179 = tpu.matmul %5, %163, %cst_134 {dimension_numbers = #tpu.dot_dimension_numbers<[1], [0], [0], [1], [0, 0, 1, 1], [], []>} : vector<32x32xf32>, vector<32x64xf32>, vector<32x64xf32> -> vector<32x64xf32>
    %180 = arith.mulf %178, %179 : vector<32x64xf32>
    %181 = arith.addf %177, %180 : vector<32x64xf32>
    %182 = vector.extract_strided_slice %174 {offsets = [0, 128], sizes = [32, 64], strides = [1, 1]} : vector<32x192xf32> to vector<32x64xf32>
    %cst_135 = arith.constant dense<0.000000e+00> : vector<32x64xf32>
    %183 = tpu.matmul %7, %163, %cst_135 {dimension_numbers = #tpu.dot_dimension_numbers<[1], [0], [0], [1], [0, 0, 1, 1], [], []>} : vector<32x32xf32>, vector<32x64xf32>, vector<32x64xf32> -> vector<32x64xf32>
    %184 = arith.mulf %182, %183 : vector<32x64xf32>
    %185 = arith.addf %181, %184 : vector<32x64xf32>
    %cst_136 = arith.constant 0.000000e+00 : f32
    %186 = vector.broadcast %cst_136 : f32 to vector<32x64xf32>
    %187 = arith.cmpf ogt, %185, %186 : vector<32x64xf32>
    %cst_137 = arith.constant 1.000000e-01 : f32
    %188 = vector.broadcast %cst_137 : f32 to vector<32x64xf32>
    %189 = arith.mulf %188, %185 : vector<32x64xf32>
    %190 = arith.select %187, %185, %189 : vector<32x64xi1>, vector<32x64xf32>
    %c1_138 = arith.constant 1 : index
    %c0_139 = arith.constant 0 : index
    %c0_140 = arith.constant 0 : index
    %191 = vector.load %arg6[%c1_138, %c0_139, %c0_140] : memref<2x64x64xf32, #tpu.memory_space<vmem>>, vector<1x64x64xf32>
    %192 = vector.shape_cast %191 : vector<1x64x64xf32> to vector<64x64xf32>
    %cst_141 = arith.constant dense<0.000000e+00> : vector<32x64xf32>
    %193 = tpu.matmul %190, %192, %cst_141 {dimension_numbers = #tpu.dot_dimension_numbers<[1], [0], [0], [1], [0, 0, 1, 1], [], []>} : vector<32x64xf32>, vector<64x64xf32>, vector<32x64xf32> -> vector<32x64xf32>
    %c1_142 = arith.constant 1 : index
    %c0_143 = arith.constant 0 : index
    %c0_144 = arith.constant 0 : index
    %194 = vector.load %arg7[%c1_142, %c0_143, %c0_144] : memref<2x1x64xf32, #tpu.memory_space<vmem>>, vector<1x1x64xf32>
    %195 = vector.shape_cast %194 : vector<1x1x64xf32> to vector<1x64xf32>
    %196 = vector.broadcast %195 : vector<1x64xf32> to vector<32x64xf32>
    %197 = arith.addf %193, %196 : vector<32x64xf32>
    %c1_145 = arith.constant 1 : index
    %c0_146 = arith.constant 0 : index
    %c0_147 = arith.constant 0 : index
    %198 = vector.load %arg8[%c1_145, %c0_146, %c0_147] : memref<2x64x8xf32, #tpu.memory_space<vmem>>, vector<1x64x8xf32>
    %199 = vector.shape_cast %198 : vector<1x64x8xf32> to vector<64x8xf32>
    %cst_148 = arith.constant dense<0.000000e+00> : vector<32x8xf32>
    %200 = tpu.matmul %1, %199, %cst_148 {dimension_numbers = #tpu.dot_dimension_numbers<[1], [0], [0], [1], [0, 0, 1, 1], [], []>} : vector<32x64xf32>, vector<64x8xf32>, vector<32x8xf32> -> vector<32x8xf32>
    %cst_149 = arith.constant 0.000000e+00 : f32
    %201 = vector.broadcast %cst_149 : f32 to vector<32x8xf32>
    %202 = arith.cmpf ogt, %200, %201 : vector<32x8xf32>
    %cst_150 = arith.constant 1.000000e-01 : f32
    %203 = vector.broadcast %cst_150 : f32 to vector<32x8xf32>
    %204 = arith.mulf %203, %200 : vector<32x8xf32>
    %205 = arith.select %202, %200, %204 : vector<32x8xi1>, vector<32x8xf32>
    %c1_151 = arith.constant 1 : index
    %c0_152 = arith.constant 0 : index
    %c0_153 = arith.constant 0 : index
    %206 = vector.load %arg9[%c1_151, %c0_152, %c0_153] : memref<2x8x64xf32, #tpu.memory_space<vmem>>, vector<1x8x64xf32>
    %207 = vector.shape_cast %206 : vector<1x8x64xf32> to vector<8x64xf32>
    %cst_154 = arith.constant dense<0.000000e+00> : vector<32x64xf32>
    %208 = tpu.matmul %205, %207, %cst_154 {dimension_numbers = #tpu.dot_dimension_numbers<[1], [0], [0], [1], [0, 0, 1, 1], [], []>} : vector<32x8xf32>, vector<8x64xf32>, vector<32x64xf32> -> vector<32x64xf32>
    %209 = arith.negf %208 : vector<32x64xf32>
    %210 = math.exp %209 : vector<32x64xf32>
    %cst_155 = arith.constant 1.000000e+00 : f32
    %211 = vector.broadcast %cst_155 : f32 to vector<32x64xf32>
    %212 = arith.addf %211, %210 : vector<32x64xf32>
    %213 = arith.divf %211, %212 : vector<32x64xf32>
    %214 = arith.mulf %163, %213 : vector<32x64xf32>
    %215 = arith.addf %197, %214 : vector<32x64xf32>
    %cst_156 = arith.constant 0.000000e+00 : f32
    %216 = vector.broadcast %cst_156 : f32 to vector<32x64xf32>
    %217 = arith.cmpf ogt, %215, %216 : vector<32x64xf32>
    %cst_157 = arith.constant 1.000000e-01 : f32
    %218 = vector.broadcast %cst_157 : f32 to vector<32x64xf32>
    %219 = arith.mulf %218, %215 : vector<32x64xf32>
    %220 = arith.select %217, %215, %219 : vector<32x64xi1>, vector<32x64xf32>
    %cst_158 = arith.constant dense<0.000000e+00> : vector<32x64xf32>
    %221 = tpu.matmul %3, %220, %cst_158 {dimension_numbers = #tpu.dot_dimension_numbers<[1], [0], [0], [1], [0, 0, 1, 1], [], []>} : vector<32x32xf32>, vector<32x64xf32>, vector<32x64xf32> -> vector<32x64xf32>
    %c1_159 = arith.constant 1 : index
    %c0_160 = arith.constant 0 : index
    %c0_161 = arith.constant 0 : index
    %c0_162 = arith.constant 0 : index
    %222 = vector.load %arg10[%c1_159, %c0_160, %c0_161, %c0_162] : memref<2x3x64x64xf32, #tpu.memory_space<vmem>>, vector<1x1x64x64xf32>
    %223 = vector.shape_cast %222 : vector<1x1x64x64xf32> to vector<64x64xf32>
    %cst_163 = arith.constant dense<0.000000e+00> : vector<32x64xf32>
    %224 = tpu.matmul %221, %223, %cst_163 {dimension_numbers = #tpu.dot_dimension_numbers<[1], [0], [0], [1], [0, 0, 1, 1], [], []>} : vector<32x64xf32>, vector<64x64xf32>, vector<32x64xf32> -> vector<32x64xf32>
    %cst_164 = arith.constant dense<0.000000e+00> : vector<32x64xf32>
    %225 = tpu.matmul %5, %220, %cst_164 {dimension_numbers = #tpu.dot_dimension_numbers<[1], [0], [0], [1], [0, 0, 1, 1], [], []>} : vector<32x32xf32>, vector<32x64xf32>, vector<32x64xf32> -> vector<32x64xf32>
    %c1_165 = arith.constant 1 : index
    %c1_166 = arith.constant 1 : index
    %c0_167 = arith.constant 0 : index
    %c0_168 = arith.constant 0 : index
    %226 = vector.load %arg10[%c1_165, %c1_166, %c0_167, %c0_168] : memref<2x3x64x64xf32, #tpu.memory_space<vmem>>, vector<1x1x64x64xf32>
    %227 = vector.shape_cast %226 : vector<1x1x64x64xf32> to vector<64x64xf32>
    %cst_169 = arith.constant dense<0.000000e+00> : vector<32x64xf32>
    %228 = tpu.matmul %225, %227, %cst_169 {dimension_numbers = #tpu.dot_dimension_numbers<[1], [0], [0], [1], [0, 0, 1, 1], [], []>} : vector<32x64xf32>, vector<64x64xf32>, vector<32x64xf32> -> vector<32x64xf32>
    %229 = arith.addf %224, %228 : vector<32x64xf32>
    %cst_170 = arith.constant dense<0.000000e+00> : vector<32x64xf32>
    %230 = tpu.matmul %7, %220, %cst_170 {dimension_numbers = #tpu.dot_dimension_numbers<[1], [0], [0], [1], [0, 0, 1, 1], [], []>} : vector<32x32xf32>, vector<32x64xf32>, vector<32x64xf32> -> vector<32x64xf32>
    %c1_171 = arith.constant 1 : index
    %c2_172 = arith.constant 2 : index
    %c0_173 = arith.constant 0 : index
    %c0_174 = arith.constant 0 : index
    %231 = vector.load %arg10[%c1_171, %c2_172, %c0_173, %c0_174] : memref<2x3x64x64xf32, #tpu.memory_space<vmem>>, vector<1x1x64x64xf32>
    %232 = vector.shape_cast %231 : vector<1x1x64x64xf32> to vector<64x64xf32>
    %cst_175 = arith.constant dense<0.000000e+00> : vector<32x64xf32>
    %233 = tpu.matmul %230, %232, %cst_175 {dimension_numbers = #tpu.dot_dimension_numbers<[1], [0], [0], [1], [0, 0, 1, 1], [], []>} : vector<32x64xf32>, vector<64x64xf32>, vector<32x64xf32> -> vector<32x64xf32>
    %234 = arith.addf %229, %233 : vector<32x64xf32>
    %c1_176 = arith.constant 1 : index
    %c0_177 = arith.constant 0 : index
    %c0_178 = arith.constant 0 : index
    %235 = vector.load %arg11[%c1_176, %c0_177, %c0_178] : memref<2x1x64xf32, #tpu.memory_space<vmem>>, vector<1x1x64xf32>
    %236 = vector.shape_cast %235 : vector<1x1x64xf32> to vector<1x64xf32>
    %237 = vector.broadcast %236 : vector<1x64xf32> to vector<32x64xf32>
    %238 = arith.addf %234, %237 : vector<32x64xf32>
    %cst_179 = arith.constant 0.000000e+00 : f32
    %239 = vector.broadcast %cst_179 : f32 to vector<32x64xf32>
    %240 = arith.cmpf ogt, %238, %239 : vector<32x64xf32>
    %cst_180 = arith.constant 1.000000e-01 : f32
    %241 = vector.broadcast %cst_180 : f32 to vector<32x64xf32>
    %242 = arith.mulf %241, %238 : vector<32x64xf32>
    %243 = arith.select %240, %238, %242 : vector<32x64xi1>, vector<32x64xf32>
    %c1_181 = arith.constant 1 : index
    %c0_182 = arith.constant 0 : index
    %c0_183 = arith.constant 0 : index
    %244 = vector.load %arg12[%c1_181, %c0_182, %c0_183] : memref<2x64x64xf32, #tpu.memory_space<vmem>>, vector<1x64x64xf32>
    %245 = vector.shape_cast %244 : vector<1x64x64xf32> to vector<64x64xf32>
    %cst_184 = arith.constant dense<0.000000e+00> : vector<32x64xf32>
    %246 = tpu.matmul %1, %245, %cst_184 {dimension_numbers = #tpu.dot_dimension_numbers<[1], [0], [0], [1], [0, 0, 1, 1], [], []>} : vector<32x64xf32>, vector<64x64xf32>, vector<32x64xf32> -> vector<32x64xf32>
    %cst_185 = arith.constant 0.000000e+00 : f32
    %247 = vector.broadcast %cst_185 : f32 to vector<32x64xf32>
    %248 = arith.cmpf ogt, %246, %247 : vector<32x64xf32>
    %cst_186 = arith.constant 1.000000e-01 : f32
    %249 = vector.broadcast %cst_186 : f32 to vector<32x64xf32>
    %250 = arith.mulf %249, %246 : vector<32x64xf32>
    %251 = arith.select %248, %246, %250 : vector<32x64xi1>, vector<32x64xf32>
    %c1_187 = arith.constant 1 : index
    %c0_188 = arith.constant 0 : index
    %c0_189 = arith.constant 0 : index
    %252 = vector.load %arg13[%c1_187, %c0_188, %c0_189] : memref<2x64x192xf32, #tpu.memory_space<vmem>>, vector<1x64x192xf32>
    %253 = vector.shape_cast %252 : vector<1x64x192xf32> to vector<64x192xf32>
    %cst_190 = arith.constant dense<0.000000e+00> : vector<32x192xf32>
    %254 = tpu.matmul %251, %253, %cst_190 {dimension_numbers = #tpu.dot_dimension_numbers<[1], [0], [0], [1], [0, 0, 1, 1], [], []>} : vector<32x64xf32>, vector<64x192xf32>, vector<32x192xf32> -> vector<32x192xf32>
    %255 = vector.extract_strided_slice %254 {offsets = [0, 0], sizes = [32, 64], strides = [1, 1]} : vector<32x192xf32> to vector<32x64xf32>
    %cst_191 = arith.constant dense<0.000000e+00> : vector<32x64xf32>
    %256 = tpu.matmul %3, %243, %cst_191 {dimension_numbers = #tpu.dot_dimension_numbers<[1], [0], [0], [1], [0, 0, 1, 1], [], []>} : vector<32x32xf32>, vector<32x64xf32>, vector<32x64xf32> -> vector<32x64xf32>
    %257 = arith.mulf %255, %256 : vector<32x64xf32>
    %258 = vector.extract_strided_slice %254 {offsets = [0, 64], sizes = [32, 64], strides = [1, 1]} : vector<32x192xf32> to vector<32x64xf32>
    %cst_192 = arith.constant dense<0.000000e+00> : vector<32x64xf32>
    %259 = tpu.matmul %5, %243, %cst_192 {dimension_numbers = #tpu.dot_dimension_numbers<[1], [0], [0], [1], [0, 0, 1, 1], [], []>} : vector<32x32xf32>, vector<32x64xf32>, vector<32x64xf32> -> vector<32x64xf32>
    %260 = arith.mulf %258, %259 : vector<32x64xf32>
    %261 = arith.addf %257, %260 : vector<32x64xf32>
    %262 = vector.extract_strided_slice %254 {offsets = [0, 128], sizes = [32, 64], strides = [1, 1]} : vector<32x192xf32> to vector<32x64xf32>
    %cst_193 = arith.constant dense<0.000000e+00> : vector<32x64xf32>
    %263 = tpu.matmul %7, %243, %cst_193 {dimension_numbers = #tpu.dot_dimension_numbers<[1], [0], [0], [1], [0, 0, 1, 1], [], []>} : vector<32x32xf32>, vector<32x64xf32>, vector<32x64xf32> -> vector<32x64xf32>
    %264 = arith.mulf %262, %263 : vector<32x64xf32>
    %265 = arith.addf %261, %264 : vector<32x64xf32>
    %cst_194 = arith.constant 0.000000e+00 : f32
    %266 = vector.broadcast %cst_194 : f32 to vector<32x64xf32>
    %267 = arith.cmpf ogt, %265, %266 : vector<32x64xf32>
    %cst_195 = arith.constant 1.000000e-01 : f32
    %268 = vector.broadcast %cst_195 : f32 to vector<32x64xf32>
    %269 = arith.mulf %268, %265 : vector<32x64xf32>
    %270 = arith.select %267, %265, %269 : vector<32x64xi1>, vector<32x64xf32>
    %c1_196 = arith.constant 1 : index
    %c0_197 = arith.constant 0 : index
    %c0_198 = arith.constant 0 : index
    %271 = vector.load %arg14[%c1_196, %c0_197, %c0_198] : memref<2x64x64xf32, #tpu.memory_space<vmem>>, vector<1x64x64xf32>
    %272 = vector.shape_cast %271 : vector<1x64x64xf32> to vector<64x64xf32>
    %cst_199 = arith.constant dense<0.000000e+00> : vector<32x64xf32>
    %273 = tpu.matmul %270, %272, %cst_199 {dimension_numbers = #tpu.dot_dimension_numbers<[1], [0], [0], [1], [0, 0, 1, 1], [], []>} : vector<32x64xf32>, vector<64x64xf32>, vector<32x64xf32> -> vector<32x64xf32>
    %c1_200 = arith.constant 1 : index
    %c0_201 = arith.constant 0 : index
    %c0_202 = arith.constant 0 : index
    %274 = vector.load %arg15[%c1_200, %c0_201, %c0_202] : memref<2x1x64xf32, #tpu.memory_space<vmem>>, vector<1x1x64xf32>
    %275 = vector.shape_cast %274 : vector<1x1x64xf32> to vector<1x64xf32>
    %276 = vector.broadcast %275 : vector<1x64xf32> to vector<32x64xf32>
    %277 = arith.addf %273, %276 : vector<32x64xf32>
    %c1_203 = arith.constant 1 : index
    %c0_204 = arith.constant 0 : index
    %c0_205 = arith.constant 0 : index
    %278 = vector.load %arg16[%c1_203, %c0_204, %c0_205] : memref<2x64x8xf32, #tpu.memory_space<vmem>>, vector<1x64x8xf32>
    %279 = vector.shape_cast %278 : vector<1x64x8xf32> to vector<64x8xf32>
    %cst_206 = arith.constant dense<0.000000e+00> : vector<32x8xf32>
    %280 = tpu.matmul %1, %279, %cst_206 {dimension_numbers = #tpu.dot_dimension_numbers<[1], [0], [0], [1], [0, 0, 1, 1], [], []>} : vector<32x64xf32>, vector<64x8xf32>, vector<32x8xf32> -> vector<32x8xf32>
    %cst_207 = arith.constant 0.000000e+00 : f32
    %281 = vector.broadcast %cst_207 : f32 to vector<32x8xf32>
    %282 = arith.cmpf ogt, %280, %281 : vector<32x8xf32>
    %cst_208 = arith.constant 1.000000e-01 : f32
    %283 = vector.broadcast %cst_208 : f32 to vector<32x8xf32>
    %284 = arith.mulf %283, %280 : vector<32x8xf32>
    %285 = arith.select %282, %280, %284 : vector<32x8xi1>, vector<32x8xf32>
    %c1_209 = arith.constant 1 : index
    %c0_210 = arith.constant 0 : index
    %c0_211 = arith.constant 0 : index
    %286 = vector.load %arg17[%c1_209, %c0_210, %c0_211] : memref<2x8x64xf32, #tpu.memory_space<vmem>>, vector<1x8x64xf32>
    %287 = vector.shape_cast %286 : vector<1x8x64xf32> to vector<8x64xf32>
    %cst_212 = arith.constant dense<0.000000e+00> : vector<32x64xf32>
    %288 = tpu.matmul %285, %287, %cst_212 {dimension_numbers = #tpu.dot_dimension_numbers<[1], [0], [0], [1], [0, 0, 1, 1], [], []>} : vector<32x8xf32>, vector<8x64xf32>, vector<32x64xf32> -> vector<32x64xf32>
    %289 = arith.negf %288 : vector<32x64xf32>
    %290 = math.exp %289 : vector<32x64xf32>
    %cst_213 = arith.constant 1.000000e+00 : f32
    %291 = vector.broadcast %cst_213 : f32 to vector<32x64xf32>
    %292 = arith.addf %291, %290 : vector<32x64xf32>
    %293 = arith.divf %291, %292 : vector<32x64xf32>
    %294 = arith.mulf %243, %293 : vector<32x64xf32>
    %295 = arith.addf %277, %294 : vector<32x64xf32>
    %cst_214 = arith.constant 0.000000e+00 : f32
    %296 = vector.broadcast %cst_214 : f32 to vector<32x64xf32>
    %297 = arith.cmpf ogt, %295, %296 : vector<32x64xf32>
    %cst_215 = arith.constant 1.000000e-01 : f32
    %298 = vector.broadcast %cst_215 : f32 to vector<32x64xf32>
    %299 = arith.mulf %298, %295 : vector<32x64xf32>
    %300 = arith.select %297, %295, %299 : vector<32x64xi1>, vector<32x64xf32>
    %cst_216 = arith.constant dense<0.000000e+00> : vector<32x64xf32>
    %301 = tpu.matmul %3, %300, %cst_216 {dimension_numbers = #tpu.dot_dimension_numbers<[1], [0], [0], [1], [0, 0, 1, 1], [], []>} : vector<32x32xf32>, vector<32x64xf32>, vector<32x64xf32> -> vector<32x64xf32>
    %c1_217 = arith.constant 1 : index
    %c0_218 = arith.constant 0 : index
    %c0_219 = arith.constant 0 : index
    %c0_220 = arith.constant 0 : index
    %302 = vector.load %arg18[%c1_217, %c0_218, %c0_219, %c0_220] : memref<2x3x64x64xf32, #tpu.memory_space<vmem>>, vector<1x1x64x64xf32>
    %303 = vector.shape_cast %302 : vector<1x1x64x64xf32> to vector<64x64xf32>
    %cst_221 = arith.constant dense<0.000000e+00> : vector<32x64xf32>
    %304 = tpu.matmul %301, %303, %cst_221 {dimension_numbers = #tpu.dot_dimension_numbers<[1], [0], [0], [1], [0, 0, 1, 1], [], []>} : vector<32x64xf32>, vector<64x64xf32>, vector<32x64xf32> -> vector<32x64xf32>
    %cst_222 = arith.constant dense<0.000000e+00> : vector<32x64xf32>
    %305 = tpu.matmul %5, %300, %cst_222 {dimension_numbers = #tpu.dot_dimension_numbers<[1], [0], [0], [1], [0, 0, 1, 1], [], []>} : vector<32x32xf32>, vector<32x64xf32>, vector<32x64xf32> -> vector<32x64xf32>
    %c1_223 = arith.constant 1 : index
    %c1_224 = arith.constant 1 : index
    %c0_225 = arith.constant 0 : index
    %c0_226 = arith.constant 0 : index
    %306 = vector.load %arg18[%c1_223, %c1_224, %c0_225, %c0_226] : memref<2x3x64x64xf32, #tpu.memory_space<vmem>>, vector<1x1x64x64xf32>
    %307 = vector.shape_cast %306 : vector<1x1x64x64xf32> to vector<64x64xf32>
    %cst_227 = arith.constant dense<0.000000e+00> : vector<32x64xf32>
    %308 = tpu.matmul %305, %307, %cst_227 {dimension_numbers = #tpu.dot_dimension_numbers<[1], [0], [0], [1], [0, 0, 1, 1], [], []>} : vector<32x64xf32>, vector<64x64xf32>, vector<32x64xf32> -> vector<32x64xf32>
    %309 = arith.addf %304, %308 : vector<32x64xf32>
    %cst_228 = arith.constant dense<0.000000e+00> : vector<32x64xf32>
    %310 = tpu.matmul %7, %300, %cst_228 {dimension_numbers = #tpu.dot_dimension_numbers<[1], [0], [0], [1], [0, 0, 1, 1], [], []>} : vector<32x32xf32>, vector<32x64xf32>, vector<32x64xf32> -> vector<32x64xf32>
    %c1_229 = arith.constant 1 : index
    %c2_230 = arith.constant 2 : index
    %c0_231 = arith.constant 0 : index
    %c0_232 = arith.constant 0 : index
    %311 = vector.load %arg18[%c1_229, %c2_230, %c0_231, %c0_232] : memref<2x3x64x64xf32, #tpu.memory_space<vmem>>, vector<1x1x64x64xf32>
    %312 = vector.shape_cast %311 : vector<1x1x64x64xf32> to vector<64x64xf32>
    %cst_233 = arith.constant dense<0.000000e+00> : vector<32x64xf32>
    %313 = tpu.matmul %310, %312, %cst_233 {dimension_numbers = #tpu.dot_dimension_numbers<[1], [0], [0], [1], [0, 0, 1, 1], [], []>} : vector<32x64xf32>, vector<64x64xf32>, vector<32x64xf32> -> vector<32x64xf32>
    %314 = arith.addf %309, %313 : vector<32x64xf32>
    %c1_234 = arith.constant 1 : index
    %c0_235 = arith.constant 0 : index
    %c0_236 = arith.constant 0 : index
    %315 = vector.load %arg19[%c1_234, %c0_235, %c0_236] : memref<2x1x64xf32, #tpu.memory_space<vmem>>, vector<1x1x64xf32>
    %316 = vector.shape_cast %315 : vector<1x1x64xf32> to vector<1x64xf32>
    %317 = vector.broadcast %316 : vector<1x64xf32> to vector<32x64xf32>
    %318 = arith.addf %314, %317 : vector<32x64xf32>
    %319 = arith.addf %318, %163 : vector<32x64xf32>
    %cst_237 = arith.constant dense<0.000000e+00> : vector<32x64xf32>
    %320 = tpu.matmul %3, %319, %cst_237 {dimension_numbers = #tpu.dot_dimension_numbers<[1], [0], [0], [1], [0, 0, 1, 1], [], []>} : vector<32x32xf32>, vector<32x64xf32>, vector<32x64xf32> -> vector<32x64xf32>
    %c0_238 = arith.constant 0 : index
    %c0_239 = arith.constant 0 : index
    %c0_240 = arith.constant 0 : index
    %c0_241 = arith.constant 0 : index
    %321 = vector.load %arg20[%c0_238, %c0_239, %c0_240, %c0_241] : memref<1x3x64x64xf32, #tpu.memory_space<vmem>>, vector<1x1x64x64xf32>
    %322 = vector.shape_cast %321 : vector<1x1x64x64xf32> to vector<64x64xf32>
    %cst_242 = arith.constant dense<0.000000e+00> : vector<32x64xf32>
    %323 = tpu.matmul %320, %322, %cst_242 {dimension_numbers = #tpu.dot_dimension_numbers<[1], [0], [0], [1], [0, 0, 1, 1], [], []>} : vector<32x64xf32>, vector<64x64xf32>, vector<32x64xf32> -> vector<32x64xf32>
    %cst_243 = arith.constant dense<0.000000e+00> : vector<32x64xf32>
    %324 = tpu.matmul %5, %319, %cst_243 {dimension_numbers = #tpu.dot_dimension_numbers<[1], [0], [0], [1], [0, 0, 1, 1], [], []>} : vector<32x32xf32>, vector<32x64xf32>, vector<32x64xf32> -> vector<32x64xf32>
    %c0_244 = arith.constant 0 : index
    %c1_245 = arith.constant 1 : index
    %c0_246 = arith.constant 0 : index
    %c0_247 = arith.constant 0 : index
    %325 = vector.load %arg20[%c0_244, %c1_245, %c0_246, %c0_247] : memref<1x3x64x64xf32, #tpu.memory_space<vmem>>, vector<1x1x64x64xf32>
    %326 = vector.shape_cast %325 : vector<1x1x64x64xf32> to vector<64x64xf32>
    %cst_248 = arith.constant dense<0.000000e+00> : vector<32x64xf32>
    %327 = tpu.matmul %324, %326, %cst_248 {dimension_numbers = #tpu.dot_dimension_numbers<[1], [0], [0], [1], [0, 0, 1, 1], [], []>} : vector<32x64xf32>, vector<64x64xf32>, vector<32x64xf32> -> vector<32x64xf32>
    %328 = arith.addf %323, %327 : vector<32x64xf32>
    %cst_249 = arith.constant dense<0.000000e+00> : vector<32x64xf32>
    %329 = tpu.matmul %7, %319, %cst_249 {dimension_numbers = #tpu.dot_dimension_numbers<[1], [0], [0], [1], [0, 0, 1, 1], [], []>} : vector<32x32xf32>, vector<32x64xf32>, vector<32x64xf32> -> vector<32x64xf32>
    %c0_250 = arith.constant 0 : index
    %c2_251 = arith.constant 2 : index
    %c0_252 = arith.constant 0 : index
    %c0_253 = arith.constant 0 : index
    %330 = vector.load %arg20[%c0_250, %c2_251, %c0_252, %c0_253] : memref<1x3x64x64xf32, #tpu.memory_space<vmem>>, vector<1x1x64x64xf32>
    %331 = vector.shape_cast %330 : vector<1x1x64x64xf32> to vector<64x64xf32>
    %cst_254 = arith.constant dense<0.000000e+00> : vector<32x64xf32>
    %332 = tpu.matmul %329, %331, %cst_254 {dimension_numbers = #tpu.dot_dimension_numbers<[1], [0], [0], [1], [0, 0, 1, 1], [], []>} : vector<32x64xf32>, vector<64x64xf32>, vector<32x64xf32> -> vector<32x64xf32>
    %333 = arith.addf %328, %332 : vector<32x64xf32>
    %c0_255 = arith.constant 0 : index
    %c0_256 = arith.constant 0 : index
    %c0_257 = arith.constant 0 : index
    %334 = vector.load %arg21[%c0_255, %c0_256, %c0_257] : memref<1x1x64xf32, #tpu.memory_space<vmem>>, vector<1x1x64xf32>
    %335 = vector.shape_cast %334 : vector<1x1x64xf32> to vector<1x64xf32>
    %336 = vector.broadcast %335 : vector<1x64xf32> to vector<32x64xf32>
    %337 = arith.addf %333, %336 : vector<32x64xf32>
    %338 = arith.addf %337, %0 : vector<32x64xf32>
    %c0_258 = arith.constant 0 : index
    %c0_259 = arith.constant 0 : index
    %339 = vector.load %arg22[%c0_258, %c0_259] : memref<32x64xf32, #tpu.memory_space<vmem>>, vector<32x64xf32>
    tpu.vector_store %arg22[%c0_258, %c0_259], %338 {strides = array<i32>} : memref<32x64xf32, #tpu.memory_space<vmem>>, vector<32x64xf32>,
    return
  }
  func.func @transform_0(%arg0: i32) -> (i32, i32) {
    %c0_i32 = arith.constant 0 : i32
    %c0_i32_0 = arith.constant 0 : i32
    %c0_i32_1 = arith.constant 0 : i32
    return %c0_i32, %c0_i32_0 : i32, i32
  }
  func.func @transform_1(%arg0: i32) -> (i32, i32) {
    %c0_i32 = arith.constant 0 : i32
    %c0_i32_0 = arith.constant 0 : i32
    %c0_i32_1 = arith.constant 0 : i32
    return %c0_i32, %c0_i32_0 : i32, i32
  }
  func.func @transform_2(%arg0: i32) -> (i32, i32, i32) {
    %c0_i32 = arith.constant 0 : i32
    %c0_i32_0 = arith.constant 0 : i32
    %c0_i32_1 = arith.constant 0 : i32
    %c0_i32_2 = arith.constant 0 : i32
    return %c0_i32, %c0_i32_0, %c0_i32_1 : i32, i32, i32
  }
  func.func @transform_3(%arg0: i32) -> (i32, i32, i32) {
    %c0_i32 = arith.constant 0 : i32
    %c0_i32_0 = arith.constant 0 : i32
    %c0_i32_1 = arith.constant 0 : i32
    %c0_i32_2 = arith.constant 0 : i32
    return %c0_i32, %c0_i32_0, %c0_i32_1 : i32, i32, i32
  }
  func.func @transform_4(%arg0: i32) -> (i32, i32, i32) {
    %c0_i32 = arith.constant 0 : i32
    %c0_i32_0 = arith.constant 0 : i32
    %c0_i32_1 = arith.constant 0 : i32
    %c0_i32_2 = arith.constant 0 : i32
    return %c0_i32, %c0_i32_0, %c0_i32_1 : i32, i32, i32
  }
  func.func @transform_5(%arg0: i32) -> (i32, i32, i32) {
    %c0_i32 = arith.constant 0 : i32
    %c0_i32_0 = arith.constant 0 : i32
    %c0_i32_1 = arith.constant 0 : i32
    %c0_i32_2 = arith.constant 0 : i32
    return %c0_i32, %c0_i32_0, %c0_i32_1 : i32, i32, i32
  }
  func.func @transform_6(%arg0: i32) -> (i32, i32, i32) {
    %c0_i32 = arith.constant 0 : i32
    %c0_i32_0 = arith.constant 0 : i32
    %c0_i32_1 = arith.constant 0 : i32
    %c0_i32_2 = arith.constant 0 : i32
    return %c0_i32, %c0_i32_0, %c0_i32_1 : i32, i32, i32
  }
  func.func @transform_7(%arg0: i32) -> (i32, i32, i32) {
    %c0_i32 = arith.constant 0 : i32
    %c0_i32_0 = arith.constant 0 : i32
    %c0_i32_1 = arith.constant 0 : i32
    %c0_i32_2 = arith.constant 0 : i32
    return %c0_i32, %c0_i32_0, %c0_i32_1 : i32, i32, i32
  }
  func.func @transform_8(%arg0: i32) -> (i32, i32, i32) {
    %c0_i32 = arith.constant 0 : i32
    %c0_i32_0 = arith.constant 0 : i32
    %c0_i32_1 = arith.constant 0 : i32
    %c0_i32_2 = arith.constant 0 : i32
    return %c0_i32, %c0_i32_0, %c0_i32_1 : i32, i32, i32
  }
  func.func @transform_9(%arg0: i32) -> (i32, i32, i32, i32) {
    %c0_i32 = arith.constant 0 : i32
    %c0_i32_0 = arith.constant 0 : i32
    %c0_i32_1 = arith.constant 0 : i32
    %c0_i32_2 = arith.constant 0 : i32
    %c0_i32_3 = arith.constant 0 : i32
    return %c0_i32, %c0_i32_0, %c0_i32_1, %c0_i32_2 : i32, i32, i32, i32
  }
  func.func @transform_10(%arg0: i32) -> (i32, i32, i32) {
    %c0_i32 = arith.constant 0 : i32
    %c0_i32_0 = arith.constant 0 : i32
    %c0_i32_1 = arith.constant 0 : i32
    %c0_i32_2 = arith.constant 0 : i32
    return %c0_i32, %c0_i32_0, %c0_i32_1 : i32, i32, i32
  }
  func.func @transform_11(%arg0: i32) -> (i32, i32, i32) {
    %c0_i32 = arith.constant 0 : i32
    %c0_i32_0 = arith.constant 0 : i32
    %c0_i32_1 = arith.constant 0 : i32
    %c0_i32_2 = arith.constant 0 : i32
    return %c0_i32, %c0_i32_0, %c0_i32_1 : i32, i32, i32
  }
  func.func @transform_12(%arg0: i32) -> (i32, i32, i32) {
    %c0_i32 = arith.constant 0 : i32
    %c0_i32_0 = arith.constant 0 : i32
    %c0_i32_1 = arith.constant 0 : i32
    %c0_i32_2 = arith.constant 0 : i32
    return %c0_i32, %c0_i32_0, %c0_i32_1 : i32, i32, i32
  }
  func.func @transform_13(%arg0: i32) -> (i32, i32, i32) {
    %c0_i32 = arith.constant 0 : i32
    %c0_i32_0 = arith.constant 0 : i32
    %c0_i32_1 = arith.constant 0 : i32
    %c0_i32_2 = arith.constant 0 : i32
    return %c0_i32, %c0_i32_0, %c0_i32_1 : i32, i32, i32
  }
  func.func @transform_14(%arg0: i32) -> (i32, i32, i32) {
    %c0_i32 = arith.constant 0 : i32
    %c0_i32_0 = arith.constant 0 : i32
    %c0_i32_1 = arith.constant 0 : i32
    %c0_i32_2 = arith.constant 0 : i32
    return %c0_i32, %c0_i32_0, %c0_i32_1 : i32, i32, i32
  }
  func.func @transform_15(%arg0: i32) -> (i32, i32, i32) {
    %c0_i32 = arith.constant 0 : i32
    %c0_i32_0 = arith.constant 0 : i32
    %c0_i32_1 = arith.constant 0 : i32
    %c0_i32_2 = arith.constant 0 : i32
    return %c0_i32, %c0_i32_0, %c0_i32_1 : i32, i32, i32
  }
  func.func @transform_16(%arg0: i32) -> (i32, i32, i32) {
    %c0_i32 = arith.constant 0 : i32
    %c0_i32_0 = arith.constant 0 : i32
    %c0_i32_1 = arith.constant 0 : i32
    %c0_i32_2 = arith.constant 0 : i32
    return %c0_i32, %c0_i32_0, %c0_i32_1 : i32, i32, i32
  }
  func.func @transform_17(%arg0: i32) -> (i32, i32, i32, i32) {
    %c0_i32 = arith.constant 0 : i32
    %c0_i32_0 = arith.constant 0 : i32
    %c0_i32_1 = arith.constant 0 : i32
    %c0_i32_2 = arith.constant 0 : i32
    %c0_i32_3 = arith.constant 0 : i32
    return %c0_i32, %c0_i32_0, %c0_i32_1, %c0_i32_2 : i32, i32, i32, i32
  }
  func.func @transform_18(%arg0: i32) -> (i32, i32, i32) {
    %c0_i32 = arith.constant 0 : i32
    %c0_i32_0 = arith.constant 0 : i32
    %c0_i32_1 = arith.constant 0 : i32
    %c0_i32_2 = arith.constant 0 : i32
    return %c0_i32, %c0_i32_0, %c0_i32_1 : i32, i32, i32
  }
  func.func @transform_19(%arg0: i32) -> (i32, i32, i32, i32) {
    %c0_i32 = arith.constant 0 : i32
    %c0_i32_0 = arith.constant 0 : i32
    %c0_i32_1 = arith.constant 0 : i32
    %c0_i32_2 = arith.constant 0 : i32
    %c0_i32_3 = arith.constant 0 : i32
    return %c0_i32, %c0_i32_0, %c0_i32_1, %c0_i32_2 : i32, i32, i32, i32
  }
  func.func @transform_20(%arg0: i32) -> (i32, i32, i32) {
    %c0_i32 = arith.constant 0 : i32
    %c0_i32_0 = arith.constant 0 : i32
    %c0_i32_1 = arith.constant 0 : i32
    %c0_i32_2 = arith.constant 0 : i32
    return %c0_i32, %c0_i32_0, %c0_i32_1 : i32, i32, i32
  }
  func.func @transform_21(%arg0: i32) -> (i32, i32) {
    %c0_i32 = arith.constant 0 : i32
    %c0_i32_0 = arith.constant 0 : i32
    %c0_i32_1 = arith.constant 0 : i32
    return %c0_i32, %c0_i32_0 : i32, i32
  }
}

</mosaic_0001>

<bundles_post_ra>
// kernel: _lambda_.1
= control target key start
LH: loop header
LB: loop body
LE: loop exit
PB: predicated region body
PF: predicated region fallthrough
CT: control target
= control target key end

     0   :  { %s11358_s0 = inlined_call_operand.vmem [shape: f32[32,64], index: 0, kind: input, shape index: {}]   ;;  %s11359_s1 = inlined_call_operand.vmem [shape: f32[32,64], index: 1, kind: input, shape index: {}]   ;;  %s11360_s2 = inlined_call_operand.vmem [shape: f32[3,32,32], index: 2, kind: input, shape index: {}]   ;;  %s11361_s3 = inlined_call_operand.vmem [shape: f32[2,64,64], index: 3, kind: input, shape index: {}]   ;;  %s11362_s4 = inlined_call_operand.hbm [shape: f32[2,64,192], index: 4, kind: input, shape index: {}]   ;;  %s11363_s5 = inlined_call_operand.hbm [shape: f32[2,64,64], index: 5, kind: input, shape index: {}]   ;;  %s11364_s6 = inlined_call_operand.vmem [shape: f32[2,1,64], index: 6, kind: input, shape index: {}]   ;;  %s11365_s7 = inlined_call_operand.vmem [shape: f32[2,64,8], index: 7, kind: input, shape index: {}]   ;;  %s11366_s8 = inlined_call_operand.hbm [shape: f32[2,8,64], index: 8, kind: input, shape index: {}]   ;;  %s11367_s9 = inlined_call_operand.vmem [shape: f32[2,3,64,64], index: 9, kind: input, shape index: {}]   ;;  %s11368_s10 = inlined_call_operand.vmem [shape: f32[2,1,64], index: 10, kind: input, shape index: {}]   ;;  %s11369_s11 = inlined_call_operand.hbm [shape: f32[2,64,64], index: 11, kind: input, shape index: {}]   ;;  %s11370_s12 = inlined_call_operand.hbm [shape: f32[2,64,192], index: 12, kind: input, shape index: {}]   ;;  %s11371_s13 = inlined_call_operand.hbm [shape: f32[2,64,64], index: 13, kind: input, shape index: {}]   ;;  %s11372_s14 = inlined_call_operand.vmem [shape: f32[2,1,64], index: 14, kind: input, shape index: {}]   ;;  %s11373_s15 = inlined_call_operand.vmem [shape: f32[2,64,8], index: 15, kind: input, shape index: {}]   ;;  %s11374_s16 = inlined_call_operand.hbm [shape: f32[2,8,64], index: 16, kind: input, shape index: {}]   ;;  %s11375_s17 = inlined_call_operand.hbm [shape: f32[2,3,64,64], index: 17, kind: input, shape index: {}]   ;;  %s11376_s18 = inlined_call_operand.vmem [shape: f32[2,1,64], index: 18, kind: input, shape index: {}]   ;;  %s11377_s19 = inlined_call_operand.hbm [shape: f32[1,3,64,64], index: 19, kind: input, shape index: {}]   ;;  %s11378_s20 = inlined_call_operand.vmem [shape: f32[1,1,64], index: 20, kind: input, shape index: {}]   ;;  %s11379_s21 = inlined_call_operand.hbm [shape: f32[32,64], index: 21, kind: output, shape index: {}]  }
   0x1   :  { %11387 = sst [smem:[#allocation24_spill]] %s11358_s0 }
   0x2   :  { %11388 = sst [smem:[#allocation25_spill]] %s11359_s1 }
   0x3   :  { %11389 = sst [smem:[#allocation26_spill]] %s11360_s2 }
   0x4   :  { %11390 = sst [smem:[#allocation27_spill]] %s11361_s3 }
   0x5   :  { %11391 = sst [smem:[#allocation28_spill]] %s11362_s4 }
   0x6   :  { %11392 = sst [smem:[#allocation29_spill]] %s11363_s5 }
   0x7   :  { %11393 = sst [smem:[#allocation30_spill]] %s11378_s20 }
   0x8   :  { %11394 = sst [smem:[#allocation31_spill]] %s11379_s21 }
   0x9   :  { %26 = vsyncpa [#allocation3], 0 }
   0xa   :  { %27 = vsyncpa [#allocation6], 0 }
   0xb   :  { %28 = vsyncpa [#allocation9], 0 }
   0xc   :  { %29 = vsyncpa [#allocation12], 0 }
   0xd   :  { %30 = vsyncpa [#allocation15], 0 }
   0xe   :  { %31 = vsyncpa [#allocation4], 0  ;;  %s9893_s2 = smov [#allocation5]   ;;  %s11395_s3 = sld [smem:[#allocation29_spill]] }
   0xf   :  { %s57_s25 = sshll.u32 %s9893_s2, 4  ;;  %s58_s25 = int_to_ptr.vmem [resolvable:$true] %s57_s25 }
  0x14   :  { %s9661_s28 = scalar_lea.hbm %s11395_s3, 2048 }
  0x15   :  { %p9662_p0 = scmp.ne.s32.totalorder %s11395_s3, %s9661_s28  ;;  %p9665_p1 = scmp.lt.u32.totalorder %s9661_s28, %s11395_s3 }
  0x17   :  { %p9667_p2 = pnand %p9665_p1, %p9662_p0 }
  0x19   :  { %9670 = shalt.err (!%p9667_p2)
}
  0x1a   :  { %s9671_s5 = scalar_lea.vmem %s58_s25, 2048  ;;  %p9676_p4 = scmp.lt.s32.totalorder %s58_s25, %s58_s25 }
  0x1b   :  { %p9672_p3 = scmp.ne.s32.totalorder %s58_s25, %s9671_s5  ;;  %p9677_p5 = scmp.lt.s32.totalorder %s9671_s5, %s9671_s5 }
  0x1d   :  { %p9678_p6 = por %p9677_p5, %p9676_p4 }
  0x1f   :  { %p9679_p7 = pnand %p9678_p6, %p9672_p3 }
  0x21   :  { %9682 = shalt.err (!%p9679_p7)
}
  0x22   :  { %s9894_s22 = smov 128   ;;  %s9895_s23 = smov 8  }
  0x23   :  { %63 = dma.hbm_to_vmem [thread:$0]  %s11395_s3, 2048, %s58_s25, [#allocation6], %s9894_s22, %s9894_s22, %s9895_s23  }
  0x24   :  { %s9896_s2 = smov [#allocation8]   ;;  %s9897_s27 = smov [#allocation11]  }
  0x25   :  { %s89_s26 = sshll.u32 %s9896_s2, 4  ;;  %s113_s28 = sshll.u32 %s9897_s27, 4  ;;  %s90_s26 = int_to_ptr.vmem [resolvable:$true] %s89_s26  ;;  %s114_s28 = int_to_ptr.vmem [resolvable:$true] %s113_s28 }
  0x26   :  { %s9683_s4 = scalar_lea.hbm %s11369_s11, 2048 }
  0x27   :  { %p9684_p8 = scmp.ne.s32.totalorder %s11369_s11, %s9683_s4  ;;  %p9687_p9 = scmp.lt.u32.totalorder %s9683_s4, %s11369_s11 }
  0x29   :  { %p9689_p10 = pnand %p9687_p9, %p9684_p8 }
  0x2b   :  { %9692 = shalt.err (!%p9689_p10)
}
  0x2c   :  { %s9693_s25 = scalar_lea.vmem %s90_s26, 2048  ;;  %p9698_p12 = scmp.lt.s32.totalorder %s90_s26, %s90_s26 }
  0x2d   :  { %p9694_p11 = scmp.ne.s32.totalorder %s90_s26, %s9693_s25  ;;  %p9699_p13 = scmp.lt.s32.totalorder %s9693_s25, %s9693_s25 }
  0x2f   :  { %p9700_p0 = por %p9699_p13, %p9698_p12 }
  0x31   :  { %p9701_p1 = pnand %p9700_p0, %p9694_p11 }
  0x33   :  { %9704 = shalt.err (!%p9701_p1)
}
  0x34   :  { %95 = dma.hbm_to_vmem [thread:$0]  %s11369_s11, 2048, %s90_s26, [#allocation9], %s9894_s22, %s9894_s22, %s9895_s23  }
  0x35   :  { %s9705_s21 = scalar_lea.hbm %s11371_s13, 2048 }
  0x36   :  { %p9706_p2 = scmp.ne.s32.totalorder %s11371_s13, %s9705_s21  ;;  %p9709_p3 = scmp.lt.u32.totalorder %s9705_s21, %s11371_s13 }
  0x38   :  { %p9711_p4 = pnand %p9709_p3, %p9706_p2 }
  0x3a   :  { %9714 = shalt.err (!%p9711_p4)
}
  0x3b   :  { %s9715_s4 = scalar_lea.vmem %s114_s28, 2048  ;;  %p9720_p6 = scmp.lt.s32.totalorder %s114_s28, %s114_s28 }
  0x3c   :  { %p9716_p5 = scmp.ne.s32.totalorder %s114_s28, %s9715_s4  ;;  %p9721_p7 = scmp.lt.s32.totalorder %s9715_s4, %s9715_s4 }
  0x3e   :  { %p9722_p8 = por %p9721_p7, %p9720_p6 }
  0x40   :  { %p9723_p9 = pnand %p9722_p8, %p9716_p5 }
  0x42   :  { %9726 = shalt.err (!%p9723_p9)
}
  0x43   :  { %119 = dma.hbm_to_vmem [thread:$0]  %s11371_s13, 2048, %s114_s28, [#allocation12], %s9894_s22, %s9894_s22, %s9895_s23  }
  0x44   :  { %s9898_s30 = smov [#allocation14]   ;;  %s9899_s25 = smov [#allocation2]  }
  0x45   :  { %s141_s5 = sshll.u32 %s9898_s30, 4  ;;  %s45_s3 = sshll.u32 %s9899_s25, 4  ;;  %s142_s5 = int_to_ptr.vmem [resolvable:$true] %s141_s5  ;;  %s46_s3 = int_to_ptr.vmem [resolvable:$true] %s45_s3 }
  0x46   :  { %s9727_s20 = scalar_lea.hbm %s11375_s17, 6144 }
  0x47   :  { %p9728_p10 = scmp.ne.s32.totalorder %s11375_s17, %s9727_s20  ;;  %p9731_p11 = scmp.lt.u32.totalorder %s9727_s20, %s11375_s17 }
  0x49   :  { %p9733_p12 = pnand %p9731_p11, %p9728_p10 }
  0x4b   :  { %9736 = shalt.err (!%p9733_p12)
}
  0x4c   :  { %s9737_s13 = scalar_lea.vmem %s142_s5, 6144  ;;  %p9742_p0 = scmp.lt.s32.totalorder %s142_s5, %s142_s5 }
  0x4d   :  { %p9738_p13 = scmp.ne.s32.totalorder %s142_s5, %s9737_s13  ;;  %p9743_p1 = scmp.lt.s32.totalorder %s9737_s13, %s9737_s13 }
  0x4f   :  { %p9744_p2 = por %p9743_p1, %p9742_p0 }
  0x51   :  { %p9745_p3 = pnand %p9744_p2, %p9738_p13 }
  0x53   :  { %9748 = shalt.err (!%p9745_p3)
}
  0x54   :  { %147 = dma.hbm_to_vmem [thread:$0]  %s11375_s17, 6144, %s142_s5, [#allocation15], %s9894_s22, %s9894_s22, %s9895_s23  }
  0x55   :  { %s11396_s26 = sld [smem:[#allocation28_spill]] }
  0x5b   :  { %s9749_s30 = scalar_lea.hbm %s11396_s26, 4096 }
  0x5c   :  { %p9750_p4 = scmp.ne.s32.totalorder %s11396_s26, %s9749_s30  ;;  %p9753_p5 = scmp.lt.u32.totalorder %s9749_s30, %s11396_s26 }
  0x5e   :  { %p9755_p6 = pnand %p9753_p5, %p9750_p4 }
  0x60   :  { %9758 = shalt.err (!%p9755_p6)
}
  0x61   :  { %s9759_s21 = scalar_lea.vmem %s46_s3, 4096  ;;  %p9764_p8 = scmp.lt.s32.totalorder %s46_s3, %s46_s3 }
  0x62   :  { %p9760_p7 = scmp.ne.s32.totalorder %s46_s3, %s9759_s21  ;;  %p9765_p9 = scmp.lt.s32.totalorder %s9759_s21, %s9759_s21 }
  0x64   :  { %p9766_p10 = por %p9765_p9, %p9764_p8 }
  0x66   :  { %p9767_p11 = pnand %p9766_p10, %p9760_p7 }
  0x68   :  { %9770 = shalt.err (!%p9767_p11)
}
  0x69   :  { %s9900_s17 = smov 256   ;;  %s9901_s5 = smov 16  }
  0x6a   :  { %51 = dma.hbm_to_vmem [thread:$0]  %s11396_s26, 4096, %s46_s3, [#allocation3], %s9900_s17, %s9900_s17, %s9901_s5  }
  0x6b   :  { %s9902_s29 = smov [#allocation7]   ;;  %s9903_s28 = smov [#allocation10]  }
  0x6c   :  { %s73_s13 = sshll.u32 %s9902_s29, 4  ;;  %s101_s0 = sshll.u32 %s9903_s28, 4  ;;  %s74_s13 = int_to_ptr.vmem [resolvable:$true] %s73_s13  ;;  %s102_s0 = int_to_ptr.vmem [resolvable:$true] %s101_s0 }
  0x6d   :  { %s9771_s30 = scalar_lea.hbm %s11366_s8, 256 }
  0x6e   :  { %p9772_p12 = scmp.ne.s32.totalorder %s11366_s8, %s9771_s30  ;;  %p9775_p13 = scmp.lt.u32.totalorder %s9771_s30, %s11366_s8 }
  0x70   :  { %p9777_p0 = pnand %p9775_p13, %p9772_p12 }
  0x72   :  { %9780 = shalt.err (!%p9777_p0)
}
  0x73   :  { %s9781_s3 = scalar_lea.vmem %s74_s13, 256  ;;  %p9786_p2 = scmp.lt.s32.totalorder %s74_s13, %s74_s13 }
  0x74   :  { %p9782_p1 = scmp.ne.s32.totalorder %s74_s13, %s9781_s3  ;;  %p9787_p3 = scmp.lt.s32.totalorder %s9781_s3, %s9781_s3 }
  0x76   :  { %p9788_p4 = por %p9787_p3, %p9786_p2 }
  0x78   :  { %p9789_p5 = pnand %p9788_p4, %p9782_p1 }
  0x7a   :  { %9792 = shalt.err (!%p9789_p5)
}
  0x7b   :  { %79 = dma.hbm_to_vmem [thread:$0]  %s11366_s8, 256, %s74_s13, [#allocation6], %s9894_s22, %s9894_s22, %s9895_s23  }
  0x7c   :  { %s9793_s29 = scalar_lea.hbm %s11370_s12, 4096 }
  0x7d   :  { %p9794_p6 = scmp.ne.s32.totalorder %s11370_s12, %s9793_s29  ;;  %p9797_p7 = scmp.lt.u32.totalorder %s9793_s29, %s11370_s12 }
  0x7f   :  { %p9799_p8 = pnand %p9797_p7, %p9794_p6 }
  0x81   :  { %9802 = shalt.err (!%p9799_p8)
}
  0x82   :  { %s9803_s25 = scalar_lea.vmem %s102_s0, 4096  ;;  %p9808_p10 = scmp.lt.s32.totalorder %s102_s0, %s102_s0 }
  0x83   :  { %p9804_p9 = scmp.ne.s32.totalorder %s102_s0, %s9803_s25  ;;  %p9809_p11 = scmp.lt.s32.totalorder %s9803_s25, %s9803_s25 }
  0x85   :  { %p9810_p12 = por %p9809_p11, %p9808_p10 }
  0x87   :  { %p9811_p13 = pnand %p9810_p12, %p9804_p9 }
  0x89   :  { %9814 = shalt.err (!%p9811_p13)
}
  0x8a   :  { %107 = dma.hbm_to_vmem [thread:$0]  %s11370_s12, 4096, %s102_s0, [#allocation9], %s9900_s17, %s9900_s17, %s9901_s5  }
  0x8b   :  { %s9904_s1 = smov [#allocation13]   ;;  %s9905_s20 = smov [#allocation16]  }
  0x8c   :  { %s129_s24 = sshll.u32 %s9904_s1, 4  ;;  %s155_s3 = sshll.u32 %s9905_s20, 4  ;;  %s130_s24 = int_to_ptr.vmem [resolvable:$true] %s129_s24  ;;  %s156_s3 = int_to_ptr.vmem [resolvable:$true] %s155_s3 }
  0x8d   :  { %s9815_s2 = scalar_lea.hbm %s11374_s16, 256 }
  0x8e   :  { %p9816_p0 = scmp.ne.s32.totalorder %s11374_s16, %s9815_s2  ;;  %p9819_p1 = scmp.lt.u32.totalorder %s9815_s2, %s11374_s16 }
  0x90   :  { %p9821_p2 = pnand %p9819_p1, %p9816_p0 }
  0x92   :  { %9824 = shalt.err (!%p9821_p2)
}
  0x93   :  { %s9825_s12 = scalar_lea.vmem %s130_s24, 256  ;;  %p9830_p4 = scmp.lt.s32.totalorder %s130_s24, %s130_s24 }
  0x94   :  { %p9826_p3 = scmp.ne.s32.totalorder %s130_s24, %s9825_s12  ;;  %p9831_p5 = scmp.lt.s32.totalorder %s9825_s12, %s9825_s12 }
  0x96   :  { %p9832_p6 = por %p9831_p5, %p9830_p4 }
  0x98   :  { %p9833_p7 = pnand %p9832_p6, %p9826_p3 }
  0x9a   :  { %9836 = shalt.err (!%p9833_p7)
}
  0x9b   :  { %135 = dma.hbm_to_vmem [thread:$0]  %s11374_s16, 256, %s130_s24, [#allocation12], %s9894_s22, %s9894_s22, %s9895_s23  }
  0x9c   :  { %s9837_s30 = scalar_lea.hbm %s11377_s19, 3072 }
  0x9d   :  { %p9838_p8 = scmp.ne.s32.totalorder %s11377_s19, %s9837_s30  ;;  %p9841_p9 = scmp.lt.u32.totalorder %s9837_s30, %s11377_s19 }
  0x9f   :  { %p9843_p10 = pnand %p9841_p9, %p9838_p8 }
  0xa1   :  { %9846 = shalt.err (!%p9843_p10)
}
  0xa2   :  { %s9847_s20 = scalar_lea.vmem %s156_s3, 3072  ;;  %p9852_p12 = scmp.lt.s32.totalorder %s156_s3, %s156_s3 }
  0xa3   :  { %p9848_p11 = scmp.ne.s32.totalorder %s156_s3, %s9847_s20  ;;  %p9853_p13 = scmp.lt.s32.totalorder %s9847_s20, %s9847_s20 }
  0xa5   :  { %p9854_p0 = por %p9853_p13, %p9852_p12 }
  0xa7   :  { %p9855_p1 = pnand %p9854_p0, %p9848_p11 }
  0xa9   :  { %9858 = shalt.err (!%p9855_p1)
}
  0xaa   :  { %161 = dma.hbm_to_vmem [thread:$0]  %s11377_s19, 3072, %s156_s3, [#allocation15], %s9894_s22, %s9894_s22, %s9895_s23  }
  0xab   :  { %9881 = dma.done.wait [#allocation3], 4096  }
  0xac   :  { %9882 = vsyncadd [#allocation3], 4294963200 }
  0xad   :  { %9883 = dma.done.wait [#allocation6], 2304  }
  0xae   :  { %9884 = vsyncadd [#allocation6], 4294964992 }
  0xaf   :  { %9885 = dma.done.wait [#allocation9], 6144  }
  0xb0   :  { %9886 = vsyncadd [#allocation9], 4294961152 }
  0xb1   :  { %9887 = dma.done.wait [#allocation12], 2304  }
  0xb2   :  { %9888 = vsyncadd [#allocation12], 4294964992 }
  0xb3   :  { %9889 = dma.done.wait [#allocation15], 9216  }
  0xb4   :  { %9890 = vsyncadd [#allocation15], 4294958080  ;;  %s11397_s2 = sld [smem:[#allocation27_spill]]  ;;  %vm221_vm0 = vcmask 523264   ;;  %s11398_s25 = sld [smem:[#allocation25_spill]]  ;;  %v332_v14 = vld [vmem:[#allocation2 + $0x8] sm:$0xff] }
  0xb5   :  { %s11399_s26 = sld [smem:[#allocation24_spill]]  ;;  %v334_v15 = vld [vmem:[#allocation2 + $0x18] sm:$0xff]  ;;  %v331_v16 = vld [vmem:[#allocation2] sm:$0xff]  ;;  %v333_v19 = vld [vmem:[#allocation2 + $0x10] sm:$0xff]  ;;  %s11400_s13 = sld [smem:[#allocation26_spill]]  ;;  %vm448_vm1 = vcmask 261120  }
  0xb6   :  { %v8805_v18 = vpack.c.bf16 %v334_v15, %v332_v14  ;;  %v336_v20 = vld [vmem:[#allocation2 + $0x28] sm:$0xff]  ;;  %v338_v21 = vld [vmem:[#allocation2 + $0x38] sm:$0xff]  ;;  %v8807_v22 = vpack.c.bf16 %v333_v19, %v331_v16  ;;  %v335_v24 = vld [vmem:[#allocation2 + $0x20] sm:$0xff]  ;;  %v9906_v54 = vmov 0.0   ;;  %s9907_s19 = smov 64   ;;  %vm1022_vm11 = vcmask 64512  }
  0xb7   :  { %v8809_v23 = vpack.c.bf16 %v338_v21, %v336_v20  ;;  %v337_v25 = vld [vmem:[#allocation2 + $0x30] sm:$0xff]  ;;  %v340_v26 = vld [vmem:[#allocation2 + $0x48] sm:$0xff]  ;;  %v342_v27 = vld [vmem:[#allocation2 + $0x58] sm:$0xff]  ;;  %423 = vmatprep.mubr.f32.mxu1 %v9906_v54  ;;  %s11401_s16 = sld [smem:[#allocation30_spill]] }
  0xb8   :  { %8806 = vmatprep.subr.bf16.mxu1 %v8805_v18  ;;  %v8811_v28 = vpack.c.bf16 %v337_v25, %v335_v24  ;;  %v8813_v31 = vpack.c.bf16 %v342_v27, %v340_v26  ;;  %v339_v33 = vld [vmem:[#allocation2 + $0x40] sm:$0xff]  ;;  %v341_v34 = vld [vmem:[#allocation2 + $0x50] sm:$0xff]  ;;  %v344_v48 = vld [vmem:[#allocation2 + $0x68] sm:$0xff] }
  0xb9   :  { %8808 = vmatpush1.bf16.msra.mxu1 %v8807_v22  ;;  %v8815_v38 = vpack.c.bf16 %v341_v34, %v339_v33  ;;  %v346_v49 = vld [vmem:[#allocation2 + $0x78] sm:$0xff]  ;;  %v343_v51 = vld [vmem:[#allocation2 + $0x60] sm:$0xff]  ;;  %v345_v52 = vld [vmem:[#allocation2 + $0x70] sm:$0xff] }
  0xba   :  { %v213_v0 = vld [vmem:[%s11397_s2] sm:$0xff]  ;;  %v214_v1 = vld [vmem:[%s11397_s2 + $0x8] sm:$0xff]  ;;  %v215_v2 = vld [vmem:[%s11397_s2 + $0x10] sm:$0xff]  ;;  %8810 = vmatprep.subr.bf16.mxu1 %v8809_v23  ;;  %v8817_v50 = vpack.c.bf16 %v346_v49, %v344_v48  ;;  %v8819_v53 = vpack.c.bf16 %v345_v52, %v343_v51 }
  0xbb   :  { %v8789_v3 = vpack.c.bf16 %v214_v1, %v213_v0  ;;  %v216_v4 = vld [vmem:[%s11397_s2 + $0x18] sm:$0xff]  ;;  %v217_v6 = vld [vmem:[%s11397_s2 + $0x20] sm:$0xff]  ;;  %v218_v7 = vld [vmem:[%s11397_s2 + $0x28] sm:$0xff] }
  0xbc   :  { %v8793_v5 = vpack.c.bf16 %v216_v4, %v215_v2  ;;  %v10175_v8 = vld [vmem:[%s11398_s25] sm:$0xff]  ;;  %v8797_v9 = vpack.c.bf16 %v218_v7, %v217_v6  ;;  %v219_v10 = vld [vmem:[%s11397_s2 + $0x30] sm:$0xff]  ;;  %v220_v11 = vld [vmem:[%s11397_s2 + $0x38] sm:$0xff] }
  0xbd   :  { %8790 = vmatprep.subr.bf16.mxu0 %v8789_v3  ;;  %7801 = vmatprep.mubr.msk.f32.mxu0 %vm221_vm0, %v10175_v8  ;;  %v10188_v12 = vld [vmem:[%s11399_s26] sm:$0xff]  ;;  %v10193_v13 = vld [vmem:[%s11399_s26 + $0x8] sm:$0xff]  ;;  %v8801_v17 = vpack.c.bf16 %v220_v11, %v219_v10  ;;  %v10202_v30 = vld [vmem:[%s11399_s26 + $0x10] sm:$0xff] }
  0xbe   :  { %8792 = vmatpush3.bf16.msra.mxu0 %v8789_v3  ;;  %v10197_v29 = vpack.c.bf16 %v10193_v13, %v10188_v12  ;;  %v10207_v32 = vld [vmem:[%s11399_s26 + $0x18] sm:$0xff]  ;;  %v10212_v35 = vld [vmem:[%s11398_s25 + $0x8] sm:$0xff]  ;;  %8812 = vmatpush1.bf16.msra.mxu1 %v8811_v28  ;;  %v10217_v36 = vld [vmem:[%s11398_s25 + $0x10] sm:$0xff] }
  0xbf   :  { %8794 = vmatprep.subr.bf16.mxu0 %v8793_v5  ;;  %v10222_v37 = vpack.c.bf16 %v10207_v32, %v10202_v30  ;;  %8814 = vmatprep.subr.bf16.mxu1 %v8813_v31  ;;  %v10231_v39 = vld [vmem:[%s11398_s25 + $0x18] sm:$0xff]  ;;  %v10238_v40 = vld [vmem:[%s11400_s13] sm:$0xff]  ;;  %v10248_v41 = vld [vmem:[%s11400_s13 + $0x8] sm:$0xff] }
  0xc0   :  { %v10254_v42 = vld [vmem:[%s11400_s13 + $0x10] sm:$0xff]  ;;  %v10264_v43 = vld [vmem:[%s11400_s13 + $0x18] sm:$0xff]  ;;  %v10270_v44 = vld [vmem:[%s11400_s13 + $0x20] sm:$0xff] }
  0xc1   :  { %v10280_v45 = vld [vmem:[%s11400_s13 + $0x28] sm:$0xff]  ;;  %v10285_v46 = vld [vmem:[%s11400_s13 + $0x30] sm:$0xff]  ;;  %v10294_v47 = vld [vmem:[%s11400_s13 + $0x38] sm:$0xff] }
  0xc2   :  { %8796 = vmatpush3.bf16.msra.mxu0 %v8793_v5  ;;  %8816 = vmatpush1.bf16.msra.mxu1 %v8815_v38  ;;  %v916_v61 = vld [vmem:[%s11365_s7] sm:$0xff]  ;;  %v917_v62 = vld [vmem:[%s11365_s7 + $0x8] sm:$0xff]  ;;  %v918_v16 = vld [vmem:[%s11365_s7 + $0x10] sm:$0xff] }
  0xc3   :  { %8798 = vmatprep.subr.bf16.mxu0 %v8797_v9  ;;  %8818 = vmatprep.subr.bf16.mxu1 %v8817_v50  ;;  %v8861_v0 = vpack.c.bf16 %v917_v62, %v916_v61  ;;  %v10326_v10 = vld [vmem:[%s11400_s13 + $0x40] sm:$0xff]  ;;  %v10340_v18 = vld [vmem:[%s11400_s13 + $0x48] sm:$0xff]  ;;  %v10346_v19 = vld [vmem:[%s11400_s13 + $0x50] sm:$0xff] }
  0xc4   :  { %v920_v23 = vld [vmem:[%s11365_s7 + $0x20] sm:$0xff]  ;;  %v921_v24 = vld [vmem:[%s11365_s7 + $0x28] sm:$0xff]  ;;  %v10361_v25 = vld [vmem:[%s11400_s13 + $0x58] sm:$0xff] }
  0xc5   :  { %v8869_v26 = vpack.c.bf16 %v921_v24, %v920_v23  ;;  %v922_v27 = vld [vmem:[%s11365_s7 + $0x30] sm:$0xff]  ;;  %v923_v28 = vld [vmem:[%s11365_s7 + $0x38] sm:$0xff]  ;;  %v804_v31 = vld [vmem:[#allocation5] sm:$0xff] }
  0xc6   :  { %8800 = vmatpush3.bf16.msra.mxu0 %v8797_v9  ;;  %8820 = vmatpush1.bf16.msra.mxu1 %v8819_v53  ;;  %v805_v33 = vld [vmem:[#allocation5 + $0x8] sm:$0xff]  ;;  %v806_v34 = vld [vmem:[#allocation5 + $0x10] sm:$0xff]  ;;  %v807_v38 = vld [vmem:[#allocation5 + $0x18] sm:$0xff] }
  0xc7   :  { %8802 = vmatprep.subr.bf16.mxu0 %v8801_v17  ;;  %8838 = vmatprep.subr.bf16.mxu1 %v10197_v29  ;;  %v8849_v48 = vpack.c.bf16 %v807_v38, %v806_v34  ;;  %v808_v49 = vld [vmem:[#allocation5 + $0x20] sm:$0xff]  ;;  %v809_v50 = vld [vmem:[#allocation5 + $0x28] sm:$0xff]  ;;  %v810_v52 = vld [vmem:[#allocation5 + $0x30] sm:$0xff] }
  0xc8   :  { %v8853_v51 = vpack.c.bf16 %v809_v50, %v808_v49  ;;  %v811_v53 = vld [vmem:[#allocation5 + $0x38] sm:$0xff] }
  0xca   :  { %8804 = vmatpush3.bf16.msra.mxu0 %v8801_v17  ;;  %v919_v17 = vld [vmem:[%s11365_s7 + $0x18] sm:$0xff] }
  0xcb   :  { %8822 = vmatprep.subr.bf16.mxu0 %v10197_v29  ;;  %v8865_v21 = vpack.c.bf16 %v919_v17, %v918_v16 }
  0xcd   :  { %7802 = vmatmul.mubr.msk.f32.vlgmr.msra.gmra.mrb[0].mxu0 %vm221_vm0, %v10212_v35 }
  0xce   :  { %7804 = vmatprep.mubr.msk.f32.mxu0 %vm221_vm0, %v10217_v36  ;;  %8824 = vmatpush3.bf16.msra.mxu0 %v10197_v29 }
  0xcf   :  { %8826 = vmatprep.subr.bf16.mxu0 %v10222_v37 }
  0xd1   :  { %7805 = vmatmul.mubr.msk.f32.gmra.mrb[2].mxu0 %vm221_vm0, %v10231_v39 }
  0xd2   :  { %8828 = vmatpush3.bf16.msra.mxu0 %v10222_v37  ;;  %7815 = vmatprep.mubr.msk.f32.mxu0 %vm448_vm1, %v10238_v40 }
  0xd3   :  { %8830 = vmatprep.subr.bf16.mxu0 %v10197_v29 }
  0xd5   :  { %7816 = vmatmul.mubr.msk.f32.vlgmr.msra.gmra.mrb[4].mxu0 %vm448_vm1, %v10248_v41 }
  0xd6   :  { %8832 = vmatpush3.bf16.msra.mxu0 %v10197_v29  ;;  %7818 = vmatprep.mubr.msk.f32.mxu0 %vm448_vm1, %v10254_v42 }
  0xd7   :  { %8834 = vmatprep.subr.bf16.mxu0 %v10222_v37 }
  0xd9   :  { %7819 = vmatmul.mubr.msk.f32.gmra.mrb[6].mxu0 %vm448_vm1, %v10264_v43 }
  0xda   :  { %8836 = vmatpush3.bf16.msra.mxu0 %v10222_v37  ;;  %7829 = vmatprep.mubr.msk.f32.mxu0 %vm448_vm1, %v10270_v44 }
  0xdd   :  { %7830 = vmatmul.mubr.msk.f32.vlgmr.msra.gmra.mrb[8].mxu0 %vm448_vm1, %v10280_v45 }
  0xde   :  { %7832 = vmatprep.mubr.msk.f32.mxu0 %vm448_vm1, %v10285_v46 }
  0xe1   :  { %7833 = vmatmul.mubr.msk.f32.gmra.mrb[10].mxu0 %vm448_vm1, %v10294_v47 }
 0x1a0   :  { %v7803_v55 = vpop.f32.mrb[0].mxu0 }
 0x1a1   :  { %v300_v56 = vpop.f32.mrb[1].mxu0  ;;  %v324_v58 = vmul.f32 0.1, %v7803_v55  ;;  %vm320_vm3 = vcmp.gt.f32.partialorder %v7803_v55, 0.0 }
 0x1a2   :  { %vm319_vm2 = vcmp.gt.f32.partialorder %v300_v56, 0.0  ;;  %v323_v57 = vmul.f32 0.1, %v300_v56 }
 0x1a3   :  { %v328_v2 = vsel %vm320_vm3, %v7803_v55, %v324_v58  ;;  %v8857_v55 = vpack.c.bf16 %v811_v53, %v810_v52 }
 0x1a4   :  { %v7806_v59 = vpop.f32.mrb[2].mxu0  ;;  %v327_v60 = vsel %vm319_vm2, %v300_v56, %v323_v57 }
 0x1a5   :  { %6888 = vmatmul.mubr.msk.f32.vlgmr.msra.gmra.mrb[0].mxu1 %vm221_vm0, %v327_v60  ;;  %v310_v63 = vpop.f32.mrb[3].mxu0  ;;  %v326_v5 = vmul.f32 0.1, %v7806_v59  ;;  %vm322_vm5 = vcmp.gt.f32.partialorder %v7806_v59, 0.0 }
 0x1a6   :  { %429 = vmatprep.mubr.f32.mxu1 %v9906_v54  ;;  %8840 = vmatpush3.bf16.msra.mxu1 %v10197_v29  ;;  %v325_v1 = vmul.f32 0.1, %v310_v63  ;;  %vm321_vm4 = vcmp.gt.f32.partialorder %v310_v63, 0.0  ;;  %v8873_v29 = vpack.c.bf16 %v923_v28, %v922_v27 }
 0x1a7   :  { %8842 = vmatprep.subr.bf16.mxu1 %v10222_v37  ;;  %v330_v11 = vsel %vm322_vm5, %v7806_v59, %v326_v5 }
 0x1a8   :  { %v10310_v3 = vpop.f32.mrb[4].mxu0  ;;  %v329_v6 = vsel %vm321_vm4, %v310_v63, %v325_v1 }
 0x1a9   :  { %6889 = vmatmul.mubr.msk.f32.gmra.mrb[2].mxu1 %vm221_vm0, %v328_v2  ;;  %v10313_v4 = vpop.f32.mrb[5].mxu0 }
 0x1aa   :  { %435 = vmatprep.mubr.f32.mxu1 %v9906_v54  ;;  %8844 = vmatpush3.bf16.msra.mxu1 %v10222_v37  ;;  %v8845_v37 = vpack.c.bf16 %v805_v33, %v804_v31 }
 0x1ab   :  { %8862 = vmatprep.subr.bf16.mxu1 %v8861_v0 }
 0x1ac   :  { %v10317_v7 = vpop.f32.mrb[6].mxu0  ;;  %8846 = vmatprep.subr.bf16.mxu0 %v8845_v37 }
 0x1ad   :  { %6890 = vmatmul.mubr.msk.f32.gmra.mrb[4].mxu1 %vm221_vm0, %v329_v6  ;;  %v10320_v9 = vpop.f32.mrb[7].mxu0  ;;  %8848 = vmatpush3.bf16.msra.mxu0 %v8845_v37 }
 0x1ae   :  { %441 = vmatprep.mubr.f32.mxu1 %v9906_v54  ;;  %8850 = vmatprep.subr.bf16.mxu0 %v8849_v48 }
 0x1b0   :  { %v7831_v14 = vpop.f32.mrb[8].mxu0 }
 0x1b1   :  { %6891 = vmatmul.mubr.msk.f32.gmra.mrb[6].mxu1 %vm221_vm0, %v330_v11  ;;  %v628_v15 = vpop.f32.mrb[9].mxu0  ;;  %8852 = vmatpush3.bf16.msra.mxu0 %v8849_v48 }
 0x1b2   :  { %7843 = vmatprep.mubr.msk.f32.mxu1 %vm448_vm1, %v10326_v10  ;;  %651 = vrot.lane.b32.xlu0 %v628_v15, %s9907_s19  ;;  %v1021_v15 = vld [vmem:[#allocation7] sm:$0xff] }
 0x1b3   :  { %8854 = vmatprep.subr.bf16.mxu0 %v8853_v51 }
 0x1b4   :  { %v7834_v20 = vpop.f32.mrb[10].mxu0 }
 0x1b5   :  { %7844 = vmatmul.mubr.msk.f32.vlgmr.msra.gmra.mrb[8].mxu1 %vm448_vm1, %v10340_v18  ;;  %v638_v22 = vpop.f32.mrb[11].mxu0  ;;  %8856 = vmatpush3.bf16.msra.mxu0 %v8853_v51 }
 0x1b6   :  { %7846 = vmatprep.mubr.msk.f32.mxu1 %vm448_vm1, %v10346_v19  ;;  %653 = vrot.lane.b32.xlu0 %v7831_v14, %s9907_s19 }
 0x1b7   :  { %655 = vrot.lane.b32.xlu1 %v638_v22, %s9907_s19  ;;  %8864 = vmatpush3.bf16.msra.mxu1 %v8861_v0 }
 0x1b8   :  { %8866 = vmatprep.subr.bf16.mxu1 %v8865_v21  ;;  %8858 = vmatprep.subr.bf16.mxu0 %v8857_v55 }
 0x1b9   :  { %7847 = vmatmul.mubr.msk.f32.gmra.mrb[10].mxu1 %vm448_vm1, %v10361_v25  ;;  %8860 = vmatpush3.bf16.msra.mxu0 %v8857_v55 }
 0x1ba   :  { %7887 = vmatprep.mubr.msk.f32.mxu1 %vm221_vm0, %v10175_v8  ;;  %7893 = vmatprep.subr.mxu0 %v1021_v15 }
 0x1bb   :  { %657 = vrot.lane.b32.xlu1 %v7834_v20, %s9907_s19  ;;  %8868 = vmatpush3.bf16.msra.mxu1 %v8865_v21 }
 0x1bc   :  { %8870 = vmatprep.subr.bf16.mxu1 %v8869_v26 }
 0x1bf   :  { %8872 = vmatpush3.bf16.msra.mxu1 %v8869_v26 }
 0x1c0   :  { %8874 = vmatprep.subr.bf16.mxu1 %v8873_v29 }
 0x1c3   :  { %8876 = vmatpush3.bf16.msra.mxu1 %v8873_v29 }
 0x1c6   :  { %7888 = vmatmul.mubr.msk.f32.vlgmr.msra.gmra.mrb[12].mxu1 %vm221_vm0, %v10212_v35 }
 0x1c7   :  { %7890 = vmatprep.mubr.msk.f32.mxu1 %vm221_vm0, %v10217_v36 }
 0x1ca   :  { %7891 = vmatmul.mubr.msk.f32.gmra.mrb[14].mxu1 %vm221_vm0, %v10231_v39 }
 0x1cb   :  { %7909 = vmatprep.mubr.msk.f32.mxu1 %vm448_vm1, %v10238_v40 }
 0x224   :  { %v652_v56 = vpop.permute.xlu0 %651 }
 0x228   :  { %v654_v61 = vpop.permute.xlu0 %653 }
 0x229   :  { %v656_v2 = vpop.permute.xlu1 %655 }
 0x278   :  { %v425_v57 = vpop.f32.mrb[0].mxu1 }
 0x279   :  { %v546_v58 = vmul.f32 %v10313_v4, %v425_v57  ;;  %v663_v59 = vmul.f32 %v652_v56, %v425_v57  ;;  %v427_v60 = vpop.f32.mrb[1].mxu1  ;;  %v658_v4 = vpop.permute.xlu1 %657 }
 0x27b   :  { %671 = vrot.lane.b32.xlu0 %v663_v59, %s9907_s19 }
 0x27c   :  { %v431_v62 = vpop.f32.mrb[2].mxu1 }
 0x27d   :  { %v547_v63 = vmul.f32 %v10310_v3, %v431_v62  ;;  %v664_v0 = vmul.f32 %v654_v61, %v431_v62  ;;  %v433_v1 = vpop.f32.mrb[3].mxu1 }
 0x27f   :  { %673 = vrot.lane.b32.xlu1 %v664_v0, %s9907_s19 }
 0x280   :  { %v437_v5 = vpop.f32.mrb[4].mxu1 }
 0x281   :  { %v548_v6 = vmul.f32 %v10320_v9, %v437_v5  ;;  %v665_v11 = vmul.f32 %v656_v2, %v437_v5  ;;  %v439_v14 = vpop.f32.mrb[5].mxu1 }
 0x283   :  { %675 = vrot.lane.b32.xlu0 %v665_v11, %s9907_s19 }
 0x284   :  { %v443_v16 = vpop.f32.mrb[6].mxu1 }
 0x285   :  { %v549_v17 = vmul.f32 %v10317_v7, %v443_v16  ;;  %v666_v20 = vmul.f32 %v658_v4, %v443_v16  ;;  %v445_v3 = vpop.f32.mrb[7].mxu1 }
 0x287   :  { %677 = vrot.lane.b32.xlu1 %v666_v20, %s9907_s19 }
 0x288   :  { %v7845_v21 = vpop.f32.mrb[8].mxu1 }
 0x289   :  { %v785_v22 = vmul.f32 %v7845_v21, %v433_v1  ;;  %v765_v23 = vpop.f32.mrb[9].mxu1 }
 0x28a   :  { %v784_v24 = vmul.f32 %v765_v23, %v427_v60 }
 0x28c   :  { %v7848_v26 = vpop.f32.mrb[10].mxu1 }
 0x28d   :  { %v787_v9 = vmul.f32 %v7848_v26, %v445_v3  ;;  %v775_v27 = vpop.f32.mrb[11].mxu1 }
 0x28e   :  { %v786_v28 = vmul.f32 %v775_v27, %v439_v14 }
 0x299   :  { %v7889_v29 = vpop.f32.mrb[12].mxu1 }
 0x29a   :  { %v990_v31 = vpop.f32.mrb[13].mxu1  ;;  %vm1010_vm13 = vcmp.gt.f32.partialorder %v7889_v29, 0.0 }
 0x29b   :  { %v1013_v62 = vmul.f32 0.1, %v990_v31  ;;  %vm1009_vm9 = vcmp.gt.f32.partialorder %v990_v31, 0.0 }
 0x29d   :  { %v7892_v33 = vpop.f32.mrb[14].mxu1  ;;  %v1017_v5 = vsel %vm1009_vm9, %v990_v31, %v1013_v62 }
 0x29e   :  { %v1000_v34 = vpop.f32.mrb[15].mxu1  ;;  %v1016_v4 = vmul.f32 0.1, %v7892_v33  ;;  %vm1012_vm14 = vcmp.gt.f32.partialorder %v7892_v33, 0.0 }
 0x29f   :  { %v1015_v2 = vmul.f32 0.1, %v1000_v34  ;;  %vm1011_vm12 = vcmp.gt.f32.partialorder %v1000_v34, 0.0 }
 0x2a0   :  { %v1020_v16 = vsel %vm1012_vm14, %v7892_v33, %v1016_v4 }
 0x2a1   :  { %v1019_v14 = vsel %vm1011_vm12, %v1000_v34, %v1015_v2 }
 0x2ed   :  { %v672_v37 = vpop.permute.xlu0 %671 }
 0x2ee   :  { %v683_v38 = vadd.f32 %v672_v37, %v546_v58 }
 0x2f0   :  { %v788_v48 = vadd.f32 %v784_v24, %v683_v38 }
 0x2f1   :  { %v674_v7 = vpop.permute.xlu1 %673 }
 0x2f2   :  { %v796_v49 = vmul.f32 0.1, %v788_v48  ;;  %v684_v50 = vadd.f32 %v674_v7, %v547_v63  ;;  %vm792_vm6 = vcmp.gt.f32.partialorder %v788_v48, 0.0 }
 0x2f4   :  { %v789_v51 = vadd.f32 %v785_v22, %v684_v50  ;;  %v800_v52 = vsel %vm792_vm6, %v788_v48, %v796_v49  ;;  %v6904_v50 = vld [vmem:[%s11364_s6] ss:$0 sm:$0xff] }
 0x2f5   :  { %7865 = vmatprep.mubr.msk.f32.mxu0 %vm221_vm0, %v800_v52  ;;  %v676_v53 = vpop.permute.xlu0 %675 }
 0x2f6   :  { %vm793_vm7 = vcmp.gt.f32.partialorder %v789_v51, 0.0  ;;  %v797_v55 = vmul.f32 0.1, %v789_v51  ;;  %v685_v56 = vadd.f32 %v676_v53, %v548_v6  ;;  %v1014_v6 = vmul.f32 0.1, %v7889_v29 }
 0x2f8   :  { %v801_v57 = vsel %vm793_vm7, %v789_v51, %v797_v55  ;;  %v790_v59 = vadd.f32 %v786_v28, %v685_v56 }
 0x2f9   :  { %7866 = vmatmul.mubr.msk.f32.vlgmr.msra.gmra.mrb[12].mxu0 %vm221_vm0, %v801_v57  ;;  %v678_v60 = vpop.permute.xlu1 %677 }
 0x2fa   :  { %v798_v61 = vmul.f32 0.1, %v790_v59  ;;  %v686_v58 = vadd.f32 %v678_v60, %v549_v17  ;;  %vm794_vm8 = vcmp.gt.f32.partialorder %v790_v59, 0.0  ;;  %7894 = vmatpush3.msra.mxu0 %v1021_v15  ;;  %v1018_v15 = vsel %vm1010_vm13, %v7889_v29, %v1014_v6 }
 0x2fc   :  { %v791_v63 = vadd.f32 %v787_v9, %v686_v58  ;;  %v802_v0 = vsel %vm794_vm8, %v790_v59, %v798_v61 }
 0x2fd   :  { %7868 = vmatprep.mubr.msk.f32.mxu0 %vm221_vm0, %v802_v0 }
 0x2fe   :  { %v799_v1 = vmul.f32 0.1, %v791_v63  ;;  %vm795_vm10 = vcmp.gt.f32.partialorder %v791_v63, 0.0 }
 0x300   :  { %v803_v11 = vsel %vm795_vm10, %v791_v63, %v799_v1 }
 0x301   :  { %7869 = vmatmul.mubr.msk.f32.gmra.mrb[14].mxu0 %vm221_vm0, %v803_v11 }
 0x302   :  { %7895 = vmatprep.mubr.msk.f32.mxu0 %vm1022_vm11, %v1017_v5 }
 0x305   :  { %7896 = vmatmul.mubr.msk.f32.vlgmr.msra.gmra.mrb[16].mxu0 %vm1022_vm11, %v1018_v15 }
 0x306   :  { %7898 = vmatprep.mubr.msk.f32.mxu0 %vm1022_vm11, %v1019_v14 }
 0x309   :  { %7899 = vmatmul.mubr.msk.f32.gmra.mrb[18].mxu0 %vm1022_vm11, %v1020_v16  ;;  %v6929_v16 = vld [vmem:[%s11367_s9 + $0x40] sm:$0xff] }
 0x30a   :  { %7923 = vmatprep.mubr.msk.f32.mxu0 %vm448_vm1, %v10270_v44 }
 0x3cc   :  { %v7867_v17 = vpop.f32.mrb[12].mxu0 }
 0x3cd   :  { %v897_v20 = vpop.f32.mrb[13].mxu0  ;;  %v903_v53 = vadd.f32 %v7867_v17, %v6904_v50 }
 0x3ce   :  { %v898_v56 = vadd.f32 %v6904_v50, %v897_v20 }
 0x3d4   :  { %v7870_v3 = vpop.f32.mrb[14].mxu0 }
 0x3d5   :  { %v907_v21 = vpop.f32.mrb[15].mxu0  ;;  %v913_v62 = vadd.f32 %v7870_v3, %v6904_v50 }
 0x3d6   :  { %v908_v1 = vadd.f32 %v6904_v50, %v907_v21  ;;  %v6931_v21 = vld [vmem:[%s11367_s9 + $0x50] sm:$0xff] }
 0x3d8   :  { %v7897_v22 = vpop.f32.mrb[16].mxu0 }
 0x3d9   :  { %v6918_v23 = vmul.f32 -1.442695, %v7897_v22  ;;  %v1101_v24 = vpop.f32.mrb[17].mxu0  ;;  %v6932_v22 = vld [vmem:[%s11367_s9 + $0x58] sm:$0xff] }
 0x3da   :  { %v6917_v26 = vmul.f32 -1.442695, %v1101_v24  ;;  %v6934_v24 = vld [vmem:[%s11367_s9 + $0x68] sm:$0xff] }
 0x3db   :  { %9557 = vpow2.f32 %v6918_v23  ;;  %v6933_v23 = vld [vmem:[%s11367_s9 + $0x60] sm:$0xff] }
 0x3dc   :  { %9559 = vpow2.f32 %v6917_v26  ;;  %v7900_v9 = vpop.f32.mrb[18].mxu0  ;;  %v8897_v26 = vpack.c.bf16 %v6932_v22, %v6931_v21  ;;  %v1256_v21 = vld [vmem:[%s11367_s9 + $0x38] sm:$0xff] }
 0x3dd   :  { %v6920_v27 = vmul.f32 -1.442695, %v7900_v9  ;;  %v1111_v28 = vpop.f32.mrb[19].mxu0  ;;  %v8901_v9 = vpack.c.bf16 %v6934_v24, %v6933_v23 }
 0x3de   :  { %v6919_v29 = vmul.f32 -1.442695, %v1111_v28  ;;  %v6936_v28 = vld [vmem:[%s11367_s9 + $0x78] sm:$0xff] }
 0x3df   :  { %9561 = vpow2.f32 %v6920_v27  ;;  %v6935_v27 = vld [vmem:[%s11367_s9 + $0x70] sm:$0xff] }
 0x3e0   :  { %9563 = vpow2.f32 %v6919_v29  ;;  %v8905_v29 = vpack.c.bf16 %v6936_v28, %v6935_v27 }
 0x3e5   :  { %v9558_v31 = vpop.eup %9557 }
 0x3e6   :  { %v9560_v33 = vpop.eup %9559  ;;  %v1133_v34 = vadd.f32 1.0, %v9558_v31  ;;  %v1249_v31 = vld [vmem:[%s11367_s9] sm:$0xff] }
 0x3e7   :  { %v1132_v37 = vadd.f32 1.0, %v9560_v33  ;;  %v1250_v33 = vld [vmem:[%s11367_s9 + $0x8] sm:$0xff] }
 0x3e8   :  { %9565 = vrcp.f32 %v1133_v34  ;;  %v8909_v34 = vpack.c.bf16 %v1250_v33, %v1249_v31  ;;  %v6951_v31 = vld [vmem:[%s11367_s9 + $0x90] sm:$0xff]  ;;  %v6952_v33 = vld [vmem:[%s11367_s9 + $0x98] sm:$0xff] }
 0x3e9   :  { %v9562_v38 = vpop.eup %9561  ;;  %9567 = vrcp.f32 %v1132_v37  ;;  %v1763_v37 = vld [vmem:[#allocation8] sm:$0xff] }
 0x3ea   :  { %v9564_v48 = vpop.eup %9563  ;;  %v1135_v7 = vadd.f32 1.0, %v9562_v38  ;;  %v1764_v38 = vld [vmem:[#allocation8 + $0x8] sm:$0xff] }
 0x3eb   :  { %v1134_v49 = vadd.f32 1.0, %v9564_v48  ;;  %v8949_v48 = vpack.c.bf16 %v1764_v38, %v1763_v37  ;;  %v6953_v37 = vld [vmem:[%s11367_s9 + $0xa0] sm:$0xff]  ;;  %v6954_v38 = vld [vmem:[%s11367_s9 + $0xa8] sm:$0xff] }
 0x3ec   :  { %9569 = vrcp.f32 %v1135_v7  ;;  %v1765_v7 = vld [vmem:[#allocation8 + $0x10] sm:$0xff] }
 0x3ed   :  { %9571 = vrcp.f32 %v1134_v49  ;;  %v1766_v49 = vld [vmem:[#allocation8 + $0x18] sm:$0xff] }
 0x3ee   :  { %v8953_v50 = vpack.c.bf16 %v1766_v49, %v1765_v7  ;;  %v6955_v7 = vld [vmem:[%s11367_s9 + $0xb0] sm:$0xff]  ;;  %v6956_v49 = vld [vmem:[%s11367_s9 + $0xb8] sm:$0xff] }
 0x3f2   :  { %v9566_v51 = vpop.eup %9565 }
 0x3f3   :  { %v9568_v52 = vpop.eup %9567  ;;  %v1145_v55 = vmul.f32 %v9566_v51, %v10193_v13  ;;  %v1768_v51 = vld [vmem:[#allocation8 + $0x28] sm:$0xff] }
 0x3f4   :  { %v1144_v57 = vmul.f32 %v9568_v52, %v10188_v12 }
 0x3f5   :  { %v1149_v59 = vadd.f32 %v1145_v55, %v903_v53  ;;  %v1769_v53 = vld [vmem:[#allocation8 + $0x30] sm:$0xff]  ;;  %v1770_v55 = vld [vmem:[#allocation8 + $0x38] sm:$0xff] }
 0x3f6   :  { %v9570_v60 = vpop.eup %9569  ;;  %v1148_v61 = vadd.f32 %v1144_v57, %v898_v56  ;;  %v8961_v56 = vpack.c.bf16 %v1770_v55, %v1769_v53  ;;  %v1869_v57 = vld [vmem:[#allocation10 + $0x8] sm:$0xff]  ;;  %v1876_v53 = vld [vmem:[#allocation10 + $0x40] sm:$0xff]  ;;  %v1878_v55 = vld [vmem:[#allocation10 + $0x50] sm:$0xff] }
 0x3f7   :  { %v9572_v58 = vpop.eup %9571  ;;  %v1157_v63 = vmul.f32 0.1, %v1149_v59  ;;  %v1147_v0 = vmul.f32 %v9570_v60, %v10207_v32  ;;  %vm1153_vm15 = vcmp.gt.f32.partialorder %v1149_v59, 0.0  ;;  %v6930_v32 = vld [vmem:[%s11367_s9 + $0x48] sm:$0xff]  ;;  %v1868_v60 = vld [vmem:[#allocation10] sm:$0xff] }
 0x3f8   :  { %v1156_v2 = vmul.f32 0.1, %v1148_v61  ;;  %v1146_v5 = vmul.f32 %v9572_v58, %v10202_v30  ;;  %vm1152_vm2 = vcmp.gt.f32.partialorder %v1148_v61, 0.0  ;;  %v8893_v3 = vpack.c.bf16 %v6930_v32, %v6929_v16  ;;  %v1870_v58 = vld [vmem:[#allocation10 + $0x10] sm:$0xff] }
 0x3f9   :  { %v1151_v6 = vadd.f32 %v1147_v0, %v913_v62  ;;  %v1161_v11 = vsel %vm1153_vm15, %v1149_v59, %v1157_v63  ;;  %v1871_v59 = vld [vmem:[#allocation10 + $0x18] sm:$0xff]  ;;  %v1873_v62 = vld [vmem:[#allocation10 + $0x28] sm:$0xff]  ;;  %v8967_v0 = vpack.c.bf16 %v1870_v58, %v1868_v60  ;;  %v1882_v58 = vld [vmem:[#allocation10 + $0x70] sm:$0xff] }
 0x3fa   :  { %v1150_v13 = vadd.f32 %v1146_v5, %v908_v1  ;;  %v1160_v14 = vsel %vm1152_vm2, %v1148_v61, %v1156_v2  ;;  %v8965_v61 = vpack.c.bf16 %v1871_v59, %v1869_v57  ;;  %v1875_v63 = vld [vmem:[#allocation10 + $0x38] sm:$0xff]  ;;  %v1872_v2 = vld [vmem:[#allocation10 + $0x20] sm:$0xff]  ;;  %v1874_v5 = vld [vmem:[#allocation10 + $0x30] sm:$0xff] }
 0x3fb   :  { %v1159_v15 = vmul.f32 0.1, %v1151_v6  ;;  %v8877_v12 = vpack.c.bf16 %v1161_v11, %v1160_v14  ;;  %vm1155_vm3 = vcmp.gt.f32.partialorder %v1151_v6, 0.0  ;;  %v8969_v1 = vpack.c.bf16 %v1875_v63, %v1873_v62  ;;  %v1881_v57 = vld [vmem:[#allocation10 + $0x68] sm:$0xff]  ;;  %v1883_v59 = vld [vmem:[#allocation10 + $0x78] sm:$0xff] }
 0x3fc   :  { %v1158_v4 = vmul.f32 0.1, %v1150_v13  ;;  %vm1154_vm4 = vcmp.gt.f32.partialorder %v1150_v13, 0.0  ;;  %v8977_v60 = vpack.c.bf16 %v1883_v59, %v1881_v57 }
 0x3fd   :  { %8878 = vmatprep.subr.bf16.mxu1 %v8877_v12  ;;  %8886 = vmatprep.subr.bf16.mxu0 %v8877_v12  ;;  %v1163_v30 = vsel %vm1155_vm3, %v1151_v6, %v1159_v15  ;;  %v8971_v6 = vpack.c.bf16 %v1874_v5, %v1872_v2 }
 0x3fe   :  { %8880 = vmatpush3.bf16.msra.mxu1 %v8877_v12  ;;  %8888 = vmatpush3.bf16.msra.mxu0 %v8877_v12  ;;  %v1162_v17 = vsel %vm1154_vm4, %v1150_v13, %v1158_v4  ;;  %v1254_v4 = vld [vmem:[%s11367_s9 + $0x28] sm:$0xff] }
 0x3ff   :  { %v8881_v20 = vpack.c.bf16 %v1163_v30, %v1162_v17 }
 0x401   :  { %8882 = vmatprep.subr.bf16.mxu1 %v8881_v20  ;;  %8890 = vmatprep.subr.bf16.mxu0 %v8881_v20 }
 0x402   :  { %8884 = vmatpush3.bf16.msra.mxu1 %v8881_v20  ;;  %8892 = vmatpush3.bf16.msra.mxu0 %v8881_v20 }
 0x403   :  { %8926 = vmatprep.subr.bf16.mxu0 %v8877_v12  ;;  %8894 = vmatprep.subr.bf16.mxu1 %v8893_v3 }
 0x405   :  { %7924 = vmatmul.mubr.msk.f32.vlgmr.msra.gmra.mrb[20].mxu0 %vm448_vm1, %v10280_v45  ;;  %7910 = vmatmul.mubr.msk.f32.vlgmr.msra.gmra.mrb[16].mxu1 %vm448_vm1, %v10248_v41 }
 0x406   :  { %8928 = vmatpush3.bf16.msra.mxu0 %v8877_v12  ;;  %7926 = vmatprep.mubr.msk.f32.mxu0 %vm448_vm1, %v10285_v46 }
 0x407   :  { %8930 = vmatprep.subr.bf16.mxu0 %v8881_v20  ;;  %7912 = vmatprep.mubr.msk.f32.mxu1 %vm448_vm1, %v10254_v42 }
 0x408   :  { %8896 = vmatpush3.bf16.msra.mxu1 %v8893_v3  ;;  %v1255_v3 = vld [vmem:[%s11367_s9 + $0x30] sm:$0xff] }
 0x409   :  { %7927 = vmatmul.mubr.msk.f32.gmra.mrb[22].mxu0 %vm448_vm1, %v10294_v47  ;;  %7913 = vmatmul.mubr.msk.f32.gmra.mrb[18].mxu1 %vm448_vm1, %v10264_v43  ;;  %v8921_v23 = vpack.c.bf16 %v1256_v21, %v1255_v3 }
 0x40a   :  { %8932 = vmatpush3.bf16.msra.mxu0 %v8881_v20  ;;  %7981 = vmatprep.mubr.msk.f32.mxu0 %vm448_vm1, %v10326_v10 }
 0x40b   :  { %8898 = vmatprep.subr.bf16.mxu1 %v8897_v26  ;;  %8950 = vmatprep.subr.bf16.mxu0 %v8949_v48 }
 0x40c   :  { %8900 = vmatpush3.bf16.msra.mxu1 %v8897_v26  ;;  %v6949_v26 = vld [vmem:[%s11367_s9 + $0x80] sm:$0xff] }
 0x40d   :  { %7982 = vmatmul.mubr.msk.f32.vlgmr.msra.gmra.mrb[24].mxu0 %vm448_vm1, %v10340_v18  ;;  %8902 = vmatprep.subr.bf16.mxu1 %v8901_v9 }
 0x40e   :  { %7984 = vmatprep.mubr.msk.f32.mxu0 %vm448_vm1, %v10346_v19  ;;  %8952 = vmatpush3.bf16.msra.mxu0 %v8949_v48  ;;  %v8941_v48 = vpack.c.bf16 %v6954_v38, %v6953_v37  ;;  %v2420_v37 = vld [vmem:[%s11373_s15 + $0x20] sm:$0xff]  ;;  %v2421_v38 = vld [vmem:[%s11373_s15 + $0x28] sm:$0xff] }
 0x40f   :  { %8954 = vmatprep.subr.bf16.mxu0 %v8953_v50 }
 0x410   :  { %8904 = vmatpush3.bf16.msra.mxu1 %v8901_v9  ;;  %v6950_v9 = vld [vmem:[%s11367_s9 + $0x88] sm:$0xff] }
 0x411   :  { %7985 = vmatmul.mubr.msk.f32.gmra.mrb[26].mxu0 %vm448_vm1, %v10361_v25  ;;  %8906 = vmatprep.subr.bf16.mxu1 %v8905_v29  ;;  %v8933_v28 = vpack.c.bf16 %v6950_v9, %v6949_v26 }
 0x412   :  { %8025 = vmatprep.mubr.msk.f32.mxu0 %vm221_vm0, %v10175_v8  ;;  %v1767_v8 = vld [vmem:[#allocation8 + $0x20] sm:$0xff]  ;;  %8956 = vmatpush3.bf16.msra.mxu0 %v8953_v50  ;;  %v8945_v50 = vpack.c.bf16 %v6956_v49, %v6955_v7  ;;  %v2423_v49 = vld [vmem:[%s11373_s15 + $0x38] sm:$0xff] }
 0x413   :  { %v8957_v52 = vpack.c.bf16 %v1768_v51, %v1767_v8  ;;  %v1877_v8 = vld [vmem:[#allocation10 + $0x48] sm:$0xff]  ;;  %v1879_v51 = vld [vmem:[#allocation10 + $0x58] sm:$0xff]  ;;  %v2422_v7 = vld [vmem:[%s11373_s15 + $0x30] sm:$0xff] }
 0x414   :  { %8908 = vmatpush3.bf16.msra.mxu1 %v8905_v29 }
 0x415   :  { %8910 = vmatprep.subr.bf16.mxu1 %v8909_v34  ;;  %8958 = vmatprep.subr.bf16.mxu0 %v8957_v52 }
 0x416   :  { %8960 = vmatpush3.bf16.msra.mxu0 %v8957_v52  ;;  %v8973_v52 = vpack.c.bf16 %v1879_v51, %v1877_v8  ;;  %v9033_v8 = vpack.c.bf16 %v2423_v49, %v2422_v7  ;;  %v10614_v51 = vld [vmem:[%s11398_s25 + $0x8] sm:$0xff] }
 0x417   :  { %8962 = vmatprep.subr.bf16.mxu0 %v8961_v56 }
 0x41a   :  { %8964 = vmatpush3.bf16.msra.mxu0 %v8961_v56  ;;  %v8975_v56 = vpack.c.bf16 %v1878_v55, %v1876_v53  ;;  %v10628_v53 = vld [vmem:[%s11398_s25 + $0x18] sm:$0xff]  ;;  %v10635_v55 = vld [vmem:[%s11400_s13] sm:$0xff] }
 0x41b   :  { %8966 = vmatprep.subr.bf16.mxu0 %v8965_v61  ;;  %v1880_v61 = vld [vmem:[#allocation10 + $0x60] sm:$0xff] }
 0x41c   :  { %v8979_v62 = vpack.c.bf16 %v1882_v58, %v1880_v61  ;;  %v2304_v61 = vld [vmem:[#allocation11] sm:$0xff]  ;;  %v2305_v58 = vld [vmem:[#allocation11 + $0x8] sm:$0xff] }
 0x41d   :  { %8026 = vmatmul.mubr.msk.f32.vlgmr.msra.gmra.mrb[28].mxu0 %vm221_vm0, %v10212_v35  ;;  %v1251_v35 = vld [vmem:[%s11367_s9 + $0x10] sm:$0xff] }
 0x41e   :  { %8028 = vmatprep.mubr.msk.f32.mxu0 %vm221_vm0, %v10217_v36  ;;  %8968 = vmatpush1.bf16.msra.mxu0 %v8967_v0  ;;  %v1252_v36 = vld [vmem:[%s11367_s9 + $0x18] sm:$0xff] }
 0x41f   :  { %8970 = vmatprep.subr.bf16.mxu0 %v8969_v1  ;;  %v8913_v15 = vpack.c.bf16 %v1252_v36, %v1251_v35 }
 0x421   :  { %8029 = vmatmul.mubr.msk.f32.gmra.mrb[30].mxu0 %vm221_vm0, %v10231_v39  ;;  %v1253_v39 = vld [vmem:[%s11367_s9 + $0x20] sm:$0xff] }
 0x422   :  { %1960 = vmatprep.mubr.f32.mxu0 %v9906_v54  ;;  %8972 = vmatpush1.bf16.msra.mxu0 %v8971_v6  ;;  %v8917_v30 = vpack.c.bf16 %v1254_v4, %v1253_v39 }
 0x423   :  { %8974 = vmatprep.subr.bf16.mxu0 %v8973_v52  ;;  %v10621_v52 = vld [vmem:[%s11398_s25 + $0x10] sm:$0xff] }
 0x426   :  { %8976 = vmatpush1.bf16.msra.mxu0 %v8975_v56 }
 0x427   :  { %8978 = vmatprep.subr.bf16.mxu0 %v8977_v60 }
 0x42a   :  { %8980 = vmatpush1.bf16.msra.mxu0 %v8979_v62  ;;  %v2306_v62 = vld [vmem:[#allocation11 + $0x10] sm:$0xff] }
 0x4d8   :  { %v7925_v11 = vpop.f32.mrb[20].mxu0  ;;  %v7911_v13 = vpop.f32.mrb[16].mxu1 }
 0x4d9   :  { %v1323_v14 = vpop.f32.mrb[21].mxu0  ;;  %v1230_v12 = vpop.f32.mrb[17].mxu1 }
 0x4da   :  { %7945 = vmatprep.mubr.msk.f32.mxu1 %vm221_vm0, %v1323_v14 }
 0x4db   :  { %7946 = vmatmul.mubr.msk.f32.vlgmr.msra.gmra.mrb[20].mxu1 %vm221_vm0, %v7925_v11 }
 0x4dc   :  { %8912 = vmatpush3.bf16.msra.mxu1 %v8909_v34  ;;  %v7928_v16 = vpop.f32.mrb[22].mxu0  ;;  %v7914_v32 = vpop.f32.mrb[18].mxu1  ;;  %v8937_v34 = vpack.c.bf16 %v6952_v33, %v6951_v31  ;;  %v2419_v33 = vld [vmem:[%s11373_s15 + $0x18] sm:$0xff] }
 0x4dd   :  { %8914 = vmatprep.subr.bf16.mxu1 %v8913_v15  ;;  %v1333_v17 = vpop.f32.mrb[23].mxu0  ;;  %v1240_v20 = vpop.f32.mrb[19].mxu1 }
 0x4de   :  { %7948 = vmatprep.mubr.msk.f32.mxu1 %vm221_vm0, %v1333_v17 }
 0x4df   :  { %7949 = vmatmul.mubr.msk.f32.gmra.mrb[22].mxu1 %vm221_vm0, %v7928_v16 }
 0x4e0   :  { %8916 = vmatpush3.bf16.msra.mxu1 %v8913_v15  ;;  %7967 = vmatprep.mubr.msk.f32.mxu1 %vm221_vm0, %v1230_v12  ;;  %v7983_v22 = vpop.f32.mrb[24].mxu0  ;;  %v6961_v15 = vld [vmem:[%s11368_s10] ss:$0 sm:$0xff] }
 0x4e1   :  { %8918 = vmatprep.subr.bf16.mxu1 %v8917_v30  ;;  %v1611_v24 = vpop.f32.mrb[25].mxu0 }
 0x4e4   :  { %8920 = vmatpush3.bf16.msra.mxu1 %v8917_v30  ;;  %v7986_v27 = vpop.f32.mrb[26].mxu0 }
 0x4e5   :  { %8922 = vmatprep.subr.bf16.mxu1 %v8921_v23  ;;  %v1621_v29 = vpop.f32.mrb[27].mxu0 }
 0x4e8   :  { %8924 = vmatpush3.bf16.msra.mxu1 %v8921_v23 }
 0x4e9   :  { %8934 = vmatprep.subr.bf16.mxu1 %v8933_v28 }
 0x4eb   :  { %7968 = vmatmul.mubr.msk.f32.vlgmr.msra.gmra.mrb[20].mxu1 %vm221_vm0, %v7911_v13 }
 0x4ec   :  { %8936 = vmatpush3.bf16.msra.mxu1 %v8933_v28  ;;  %7970 = vmatprep.mubr.msk.f32.mxu1 %vm221_vm0, %v1240_v20 }
 0x4ed   :  { %8938 = vmatprep.subr.bf16.mxu1 %v8937_v34 }
 0x4ef   :  { %7971 = vmatmul.mubr.msk.f32.gmra.mrb[22].mxu1 %vm221_vm0, %v7914_v32 }
 0x4f0   :  { %8940 = vmatpush3.bf16.msra.mxu1 %v8937_v34  ;;  %8003 = vmatprep.mubr.msk.f32.mxu1 %vm221_vm0, %v1611_v24  ;;  %v8027_v63 = vpop.f32.mrb[28].mxu0 }
 0x4f1   :  { %8942 = vmatprep.subr.bf16.mxu1 %v8941_v48  ;;  %v1837_v0 = vpop.f32.mrb[29].mxu0  ;;  %vm1857_vm6 = vcmp.gt.f32.partialorder %v8027_v63, 0.0  ;;  %v1861_v1 = vmul.f32 0.1, %v8027_v63 }
 0x4f2   :  { %vm1856_vm5 = vcmp.gt.f32.partialorder %v1837_v0, 0.0 }
 0x4f3   :  { %v1865_v6 = vsel %vm1857_vm6, %v8027_v63, %v1861_v1 }
 0x4f4   :  { %8944 = vmatpush3.bf16.msra.mxu1 %v8941_v48  ;;  %v8030_v5 = vpop.f32.mrb[30].mxu0  ;;  %v9029_v48 = vpack.c.bf16 %v2421_v38, %v2420_v37 }
 0x4f5   :  { %8946 = vmatprep.subr.bf16.mxu1 %v8945_v50  ;;  %v1847_v35 = vpop.f32.mrb[31].mxu0  ;;  %v1863_v11 = vmul.f32 0.1, %v8030_v5  ;;  %vm1859_vm8 = vcmp.gt.f32.partialorder %v8030_v5, 0.0 }
 0x4f6   :  { %vm1858_vm7 = vcmp.gt.f32.partialorder %v1847_v35, 0.0  ;;  %v1862_v36 = vmul.f32 0.1, %v1847_v35 }
 0x4f7   :  { %v1867_v14 = vsel %vm1859_vm8, %v8030_v5, %v1863_v11 }
 0x4f8   :  { %8948 = vmatpush3.bf16.msra.mxu1 %v8945_v50  ;;  %v1866_v13 = vsel %vm1858_vm7, %v1847_v35, %v1862_v36 }
 0x4fb   :  { %8004 = vmatmul.mubr.msk.f32.vlgmr.msra.gmra.mrb[20].mxu1 %vm221_vm0, %v7983_v22 }
 0x4fc   :  { %8006 = vmatprep.mubr.msk.f32.mxu1 %vm221_vm0, %v1621_v29 }
 0x4ff   :  { %8007 = vmatmul.mubr.msk.f32.gmra.mrb[22].mxu1 %vm221_vm0, %v7986_v27 }
 0x500   :  { %8039 = vmatprep.mubr.msk.f32.mxu1 %vm448_vm1, %v10238_v40  ;;  %v1860_v40 = vmul.f32 0.1, %v1837_v0 }
 0x502   :  { %v1864_v2 = vsel %vm1856_vm5, %v1837_v0, %v1860_v40  ;;  %v9005_v0 = vpack.c.bf16 %v2305_v58, %v2304_v61  ;;  %v2307_v40 = vld [vmem:[#allocation11 + $0x18] sm:$0xff] }
 0x503   :  { %6966 = vmatmul.mubr.msk.f32.vlgmr.msra.gmra.mrb[32].mxu0 %vm221_vm0, %v1864_v2  ;;  %v9009_v5 = vpack.c.bf16 %v2307_v40, %v2306_v62 }
 0x504   :  { %1966 = vmatprep.mubr.f32.mxu0 %v9906_v54  ;;  %9006 = vmatprep.subr.bf16.mxu0 %v9005_v0 }
 0x505   :  { %9008 = vmatpush3.bf16.msra.mxu0 %v9005_v0 }
 0x506   :  { %9010 = vmatprep.subr.bf16.mxu0 %v9009_v5 }
 0x507   :  { %6967 = vmatmul.mubr.msk.f32.gmra.mrb[34].mxu0 %vm221_vm0, %v1865_v6 }
 0x508   :  { %1972 = vmatprep.mubr.f32.mxu0 %v9906_v54 }
 0x509   :  { %9012 = vmatpush3.bf16.msra.mxu0 %v9009_v5 }
 0x50b   :  { %6968 = vmatmul.mubr.msk.f32.gmra.mrb[36].mxu0 %vm221_vm0, %v1866_v13 }
 0x50c   :  { %1978 = vmatprep.mubr.f32.mxu0 %v9906_v54 }
 0x50f   :  { %6969 = vmatmul.mubr.msk.f32.gmra.mrb[38].mxu0 %vm221_vm0, %v1867_v14 }
 0x5ce   :  { %v8005_v12 = vpop.f32.mrb[20].mxu1 }
 0x5cf   :  { %v1748_v39 = vadd.f32 %v8005_v12, %v6961_v15  ;;  %v1717_v4 = vpop.f32.mrb[21].mxu1 }
 0x5d0   :  { %v1747_v16 = vadd.f32 %v6961_v15, %v1717_v4 }
 0x5d1   :  { %vm1752_vm9 = vcmp.gt.f32.partialorder %v1748_v39, 0.0  ;;  %v1756_v32 = vmul.f32 0.1, %v1748_v39 }
 0x5d2   :  { %vm1751_vm10 = vcmp.gt.f32.partialorder %v1747_v16, 0.0  ;;  %v1755_v30 = vmul.f32 0.1, %v1747_v16  ;;  %v8008_v17 = vpop.f32.mrb[22].mxu1 }
 0x5d3   :  { %v10534_v20 = vsel %vm1752_vm9, %v1748_v39, %v1756_v32  ;;  %v1750_v3 = vadd.f32 %v8008_v17, %v6961_v15  ;;  %v1727_v21 = vpop.f32.mrb[23].mxu1  ;;  %v2308_v17 = vld [vmem:[#allocation11 + $0x20] sm:$0xff] }
 0x5d4   :  { %v10536_v22 = vsel %vm1751_vm10, %v1747_v16, %v1755_v30  ;;  %v1749_v23 = vadd.f32 %v6961_v15, %v1727_v21 }
 0x5d5   :  { %v8981_v24 = vpack.c.bf16 %v10534_v20, %v10536_v22  ;;  %vm1754_vm12 = vcmp.gt.f32.partialorder %v1750_v3, 0.0  ;;  %v1758_v26 = vmul.f32 0.1, %v1750_v3 }
 0x5d6   :  { %vm1753_vm13 = vcmp.gt.f32.partialorder %v1749_v23, 0.0  ;;  %v1757_v9 = vmul.f32 0.1, %v1749_v23 }
 0x5d7   :  { %v10540_v27 = vsel %vm1754_vm12, %v1750_v3, %v1758_v26  ;;  %8982 = vmatprep.subr.bf16.mxu1 %v8981_v24  ;;  %v2309_v3 = vld [vmem:[#allocation11 + $0x28] sm:$0xff] }
 0x5d8   :  { %v10542_v28 = vsel %vm1753_vm13, %v1749_v23, %v1757_v9  ;;  %8984 = vmatpush3.bf16.msra.mxu1 %v8981_v24  ;;  %v9013_v21 = vpack.c.bf16 %v2309_v3, %v2308_v17  ;;  %v2310_v23 = vld [vmem:[#allocation11 + $0x30] sm:$0xff] }
 0x5d9   :  { %v8985_v29 = vpack.c.bf16 %v10540_v27, %v10542_v28 }
 0x5da   :  { %9014 = vmatprep.subr.bf16.mxu0 %v9013_v21 }
 0x5db   :  { %8986 = vmatprep.subr.bf16.mxu1 %v8985_v29  ;;  %9016 = vmatpush3.bf16.msra.mxu0 %v9013_v21 }
 0x5dc   :  { %8988 = vmatpush3.bf16.msra.mxu1 %v8985_v29 }
 0x5dd   :  { %8990 = vmatprep.subr.bf16.mxu1 %v8981_v24 }
 0x5df   :  { %8040 = vmatmul.mubr.msk.f32.vlgmr.msra.gmra.mrb[24].mxu1 %vm448_vm1, %v10248_v41  ;;  %v10571_v41 = vld [vmem:[%s11398_s25] sm:$0xff] }
 0x5e0   :  { %8992 = vmatpush3.bf16.msra.mxu1 %v8981_v24  ;;  %8042 = vmatprep.mubr.msk.f32.mxu1 %vm448_vm1, %v10254_v42  ;;  %v10575_v42 = vpop.f32.mrb[32].mxu0 }
 0x5e1   :  { %8994 = vmatprep.subr.bf16.mxu1 %v8985_v29 }
 0x5e3   :  { %8043 = vmatmul.mubr.msk.f32.gmra.mrb[26].mxu1 %vm448_vm1, %v10264_v43  ;;  %v10577_v43 = vpop.f32.mrb[33].mxu0 }
 0x5e4   :  { %8996 = vmatpush3.bf16.msra.mxu1 %v8985_v29  ;;  %8053 = vmatprep.mubr.msk.f32.mxu1 %vm448_vm1, %v10270_v44  ;;  %v10579_v44 = vpop.f32.mrb[34].mxu0 }
 0x5e5   :  { %8998 = vmatprep.subr.bf16.mxu1 %v8981_v24 }
 0x5e7   :  { %8054 = vmatmul.mubr.msk.f32.vlgmr.msra.gmra.mrb[28].mxu1 %vm448_vm1, %v10280_v45  ;;  %v1970_v45 = vpop.f32.mrb[35].mxu0 }
 0x5e8   :  { %9000 = vmatpush3.bf16.msra.mxu1 %v8981_v24  ;;  %8056 = vmatprep.mubr.msk.f32.mxu1 %vm448_vm1, %v10285_v46  ;;  %v10581_v46 = vpop.f32.mrb[36].mxu0  ;;  %v2311_v24 = vld [vmem:[#allocation11 + $0x38] sm:$0xff] }
 0x5e9   :  { %9002 = vmatprep.subr.bf16.mxu1 %v8985_v29  ;;  %v9017_v26 = vpack.c.bf16 %v2311_v24, %v2310_v23 }
 0x5eb   :  { %8057 = vmatmul.mubr.msk.f32.gmra.mrb[30].mxu1 %vm448_vm1, %v10294_v47  ;;  %v10583_v47 = vpop.f32.mrb[37].mxu0  ;;  %9018 = vmatprep.subr.bf16.mxu0 %v9017_v26 }
 0x5ec   :  { %9004 = vmatpush3.bf16.msra.mxu1 %v8985_v29  ;;  %8067 = vmatprep.mubr.msk.f32.mxu1 %vm448_vm1, %v10326_v10  ;;  %v10585_v10 = vpop.f32.mrb[38].mxu0 }
 0x5ed   :  { %v1982_v50 = vpop.f32.mrb[39].mxu0  ;;  %9020 = vmatpush3.bf16.msra.mxu0 %v9017_v26 }
 0x5ef   :  { %8068 = vmatmul.mubr.msk.f32.vlgmr.msra.gmra.mrb[32].mxu1 %vm448_vm1, %v10340_v18  ;;  %v2416_v18 = vld [vmem:[%s11373_s15] sm:$0xff] }
 0x5f0   :  { %8070 = vmatprep.mubr.msk.f32.mxu1 %vm448_vm1, %v10346_v19  ;;  %v2417_v19 = vld [vmem:[%s11373_s15 + $0x8] sm:$0xff] }
 0x5f1   :  { %v9021_v31 = vpack.c.bf16 %v2417_v19, %v2416_v18 }
 0x5f3   :  { %8071 = vmatmul.mubr.msk.f32.gmra.mrb[34].mxu1 %vm448_vm1, %v10361_v25  ;;  %v2418_v25 = vld [vmem:[%s11373_s15 + $0x10] sm:$0xff]  ;;  %9022 = vmatprep.subr.bf16.mxu1 %v9021_v31 }
 0x5f4   :  { %8111 = vmatprep.mubr.msk.f32.mxu1 %vm221_vm0, %v10571_v41  ;;  %v9025_v34 = vpack.c.bf16 %v2419_v33, %v2418_v25  ;;  %9024 = vmatpush3.bf16.msra.mxu1 %v9021_v31  ;;  %v2521_v33 = vld [vmem:[#allocation13] sm:$0xff] }
 0x5f5   :  { %8117 = vmatprep.subr.mxu0 %v2521_v33 }
 0x5f6   :  { %9026 = vmatprep.subr.bf16.mxu1 %v9025_v34 }
 0x5f8   :  { %9028 = vmatpush3.bf16.msra.mxu1 %v9025_v34 }
 0x5f9   :  { %9030 = vmatprep.subr.bf16.mxu1 %v9029_v48 }
 0x5fc   :  { %9032 = vmatpush3.bf16.msra.mxu1 %v9029_v48 }
 0x5fd   :  { %9034 = vmatprep.subr.bf16.mxu1 %v9033_v8 }
 0x600   :  { %9036 = vmatpush3.bf16.msra.mxu1 %v9033_v8 }
 0x603   :  { %8112 = vmatmul.mubr.msk.f32.vlgmr.msra.gmra.mrb[36].mxu1 %vm221_vm0, %v10614_v51 }
 0x604   :  { %8114 = vmatprep.mubr.msk.f32.mxu1 %vm221_vm0, %v10621_v52 }
 0x607   :  { %8115 = vmatmul.mubr.msk.f32.gmra.mrb[38].mxu1 %vm221_vm0, %v10628_v53 }
 0x608   :  { %8133 = vmatprep.mubr.msk.f32.mxu1 %vm448_vm1, %v10635_v55 }
 0x6b2   :  { %v8041_v56 = vpop.f32.mrb[24].mxu1 }
 0x6b3   :  { %v2071_v57 = vmul.f32 %v8041_v56, %v10579_v44  ;;  %v2051_v59 = vpop.f32.mrb[25].mxu1 }
 0x6b4   :  { %v2070_v60 = vmul.f32 %v2051_v59, %v10575_v42 }
 0x6b6   :  { %v8044_v63 = vpop.f32.mrb[26].mxu1 }
 0x6b7   :  { %v2073_v1 = vmul.f32 %v8044_v63, %v10585_v10  ;;  %v2061_v2 = vpop.f32.mrb[27].mxu1 }
 0x6b8   :  { %v2072_v6 = vmul.f32 %v2061_v2, %v10581_v46 }
 0x6ba   :  { %v8055_v35 = vpop.f32.mrb[28].mxu1 }
 0x6bb   :  { %2165 = vrot.lane.b32.xlu1 %v8055_v35, %s9907_s19  ;;  %v2140_v36 = vpop.f32.mrb[29].mxu1 }
 0x6bc   :  { %2163 = vrot.lane.b32.xlu0 %v2140_v36, %s9907_s19 }
 0x6be   :  { %v8058_v11 = vpop.f32.mrb[30].mxu1 }
 0x6bf   :  { %2169 = vrot.lane.b32.xlu1 %v8058_v11, %s9907_s19  ;;  %v2150_v13 = vpop.f32.mrb[31].mxu1 }
 0x6c0   :  { %2167 = vrot.lane.b32.xlu0 %v2150_v13, %s9907_s19 }
 0x6c2   :  { %v8069_v14 = vpop.f32.mrb[32].mxu1 }
 0x6c3   :  { %v2285_v15 = vmul.f32 %v8069_v14, %v1970_v45  ;;  %v2265_v12 = vpop.f32.mrb[33].mxu1 }
 0x6c4   :  { %v2284_v39 = vmul.f32 %v2265_v12, %v10577_v43 }
 0x6c6   :  { %v8072_v4 = vpop.f32.mrb[34].mxu1 }
 0x6c7   :  { %v2287_v16 = vmul.f32 %v8072_v4, %v1982_v50  ;;  %v2275_v32 = vpop.f32.mrb[35].mxu1 }
 0x6c8   :  { %v2286_v30 = vmul.f32 %v2275_v32, %v10583_v47 }
 0x6d6   :  { %v8113_v9 = vpop.f32.mrb[36].mxu1 }
 0x6d7   :  { %v2490_v29 = vpop.f32.mrb[37].mxu1  ;;  %vm2510_vm6 = vcmp.gt.f32.partialorder %v8113_v9, 0.0 }
 0x6d8   :  { %v2513_v0 = vmul.f32 0.1, %v2490_v29  ;;  %vm2509_vm2 = vcmp.gt.f32.partialorder %v2490_v29, 0.0 }
 0x6da   :  { %v8116_v25 = vpop.f32.mrb[38].mxu1  ;;  %v2517_v5 = vsel %vm2509_vm2, %v2490_v29, %v2513_v0 }
 0x6db   :  { %v2500_v47 = vpop.f32.mrb[39].mxu1  ;;  %v2516_v13 = vmul.f32 0.1, %v8116_v25  ;;  %vm2512_vm7 = vcmp.gt.f32.partialorder %v8116_v25, 0.0 }
 0x6dc   :  { %vm2511_vm5 = vcmp.gt.f32.partialorder %v2500_v47, 0.0 }
 0x6dd   :  { %v2520_v14 = vsel %vm2512_vm7, %v8116_v25, %v2516_v13  ;;  %v2846_v13 = vld [vmem:[#allocation14 + $0x60] sm:$0xff] }
 0x72d   :  { %v2166_v45 = vpop.permute.xlu1 %2165 }
 0x72e   :  { %v2176_v43 = vmul.f32 %v2166_v45, %v10579_v44  ;;  %v2164_v18 = vpop.permute.xlu0 %2163 }
 0x72f   :  { %v2175_v19 = vmul.f32 %v2164_v18, %v10575_v42 }
 0x730   :  { %2185 = vrot.lane.b32.xlu1 %v2176_v43, %s9907_s19 }
 0x731   :  { %v2170_v31 = vpop.permute.xlu1 %2169  ;;  %2183 = vrot.lane.b32.xlu0 %v2175_v19, %s9907_s19 }
 0x732   :  { %v2178_v34 = vmul.f32 %v2170_v31, %v10585_v10  ;;  %v2168_v37 = vpop.permute.xlu0 %2167  ;;  %v6982_v31 = vld [vmem:[%s11372_s14] ss:$0 sm:$0xff] }
 0x733   :  { %v2177_v38 = vmul.f32 %v2168_v37, %v10581_v46 }
 0x734   :  { %2189 = vrot.lane.b32.xlu1 %v2178_v34, %s9907_s19 }
 0x735   :  { %2187 = vrot.lane.b32.xlu0 %v2177_v38, %s9907_s19 }
 0x7a2   :  { %v2186_v44 = vpop.permute.xlu1 %2185 }
 0x7a3   :  { %v2196_v42 = vadd.f32 %v2186_v44, %v2071_v57  ;;  %v2184_v48 = vpop.permute.xlu0 %2183 }
 0x7a4   :  { %v2195_v7 = vadd.f32 %v2184_v48, %v2070_v60 }
 0x7a5   :  { %v2289_v49 = vadd.f32 %v2285_v15, %v2196_v42  ;;  %v10668_v15 = vld [vmem:[%s11400_s13 + $0x20] sm:$0xff] }
 0x7a6   :  { %v2288_v50 = vadd.f32 %v2284_v39, %v2195_v7  ;;  %v2190_v8 = vpop.permute.xlu1 %2189 }
 0x7a7   :  { %v2297_v56 = vmul.f32 0.1, %v2289_v49  ;;  %v2198_v59 = vadd.f32 %v2190_v8, %v2073_v1  ;;  %v2188_v61 = vpop.permute.xlu0 %2187  ;;  %vm2293_vm14 = vcmp.gt.f32.partialorder %v2289_v49, 0.0  ;;  %v2515_v1 = vmul.f32 0.1, %v2500_v47 }
 0x7a8   :  { %v2296_v10 = vmul.f32 0.1, %v2288_v50  ;;  %v2197_v58 = vadd.f32 %v2188_v61, %v2072_v6  ;;  %vm2292_vm15 = vcmp.gt.f32.partialorder %v2288_v50, 0.0  ;;  %v2514_v6 = vmul.f32 0.1, %v8113_v9 }
 0x7a9   :  { %v2291_v62 = vadd.f32 %v2287_v16, %v2198_v59  ;;  %v2301_v40 = vsel %vm2293_vm14, %v2289_v49, %v2297_v56  ;;  %v2519_v36 = vsel %vm2511_vm5, %v2500_v47, %v2515_v1 }
 0x7aa   :  { %v2290_v46 = vadd.f32 %v2286_v30, %v2197_v58  ;;  %v2300_v63 = vsel %vm2292_vm15, %v2288_v50, %v2296_v10  ;;  %v2518_v11 = vsel %vm2510_vm6, %v8113_v9, %v2514_v6  ;;  %v2845_v6 = vld [vmem:[#allocation14 + $0x58] sm:$0xff] }
 0x7ab   :  { %v2299_v2 = vmul.f32 0.1, %v2291_v62  ;;  %8089 = vmatprep.mubr.msk.f32.mxu0 %vm221_vm0, %v2300_v63  ;;  %vm2295_vm4 = vcmp.gt.f32.partialorder %v2291_v62, 0.0 }
 0x7ac   :  { %v2298_v57 = vmul.f32 0.1, %v2290_v46  ;;  %8090 = vmatmul.mubr.msk.f32.vlgmr.msra.gmra.mrb[40].mxu0 %vm221_vm0, %v2301_v40  ;;  %vm2294_vm3 = vcmp.gt.f32.partialorder %v2290_v46, 0.0 }
 0x7ad   :  { %8118 = vmatpush3.msra.mxu0 %v2521_v33  ;;  %v2303_v35 = vsel %vm2295_vm4, %v2291_v62, %v2299_v2  ;;  %v2842_v2 = vld [vmem:[#allocation14 + $0x40] sm:$0xff] }
 0x7ae   :  { %v2302_v60 = vsel %vm2294_vm3, %v2290_v46, %v2298_v57  ;;  %v2843_v57 = vld [vmem:[#allocation14 + $0x48] sm:$0xff] }
 0x7af   :  { %8092 = vmatprep.mubr.msk.f32.mxu0 %vm221_vm0, %v2302_v60 }
 0x7b0   :  { %8093 = vmatmul.mubr.msk.f32.gmra.mrb[42].mxu0 %vm221_vm0, %v2303_v35  ;;  %v10682_v35 = vld [vmem:[%s11400_s13 + $0x28] sm:$0xff] }
 0x7b1   :  { %8119 = vmatprep.mubr.msk.f32.mxu0 %vm1022_vm11, %v2517_v5  ;;  %v2844_v5 = vld [vmem:[#allocation14 + $0x50] sm:$0xff] }
 0x7b4   :  { %8120 = vmatmul.mubr.msk.f32.vlgmr.msra.gmra.mrb[44].mxu0 %vm1022_vm11, %v2518_v11  ;;  %v10696_v11 = vld [vmem:[%s11400_s13 + $0x30] sm:$0xff] }
 0x7b5   :  { %8122 = vmatprep.mubr.msk.f32.mxu0 %vm1022_vm11, %v2519_v36  ;;  %v10689_v36 = vld [vmem:[%s11400_s13 + $0x8] sm:$0xff] }
 0x7b8   :  { %8123 = vmatmul.mubr.msk.f32.gmra.mrb[46].mxu0 %vm1022_vm11, %v2520_v14  ;;  %v2847_v14 = vld [vmem:[#allocation14 + $0x68] sm:$0xff] }
 0x7b9   :  { %8147 = vmatprep.mubr.msk.f32.mxu0 %vm448_vm1, %v10668_v15 }
 0x87f   :  { %v8091_v12 = vpop.f32.mrb[40].mxu0 }
 0x880   :  { %v2397_v39 = vpop.f32.mrb[41].mxu0  ;;  %v2403_v37 = vadd.f32 %v8091_v12, %v6982_v31  ;;  %v10703_v12 = vld [vmem:[%s11400_s13 + $0x10] sm:$0xff] }
 0x881   :  { %v2398_v44 = vadd.f32 %v6982_v31, %v2397_v39  ;;  %v9057_v39 = vpack.c.bf16 %v2845_v6, %v2844_v5  ;;  %v2750_v6 = vld [vmem:[#allocation14 + $0x10] sm:$0xff] }
 0x883   :  { %v8094_v4 = vpop.f32.mrb[42].mxu0 }
 0x884   :  { %v2407_v16 = vpop.f32.mrb[43].mxu0  ;;  %v2413_v8 = vadd.f32 %v8094_v4, %v6982_v31  ;;  %v10710_v4 = vld [vmem:[%s11400_s13 + $0x38] sm:$0xff] }
 0x885   :  { %v2408_v61 = vadd.f32 %v6982_v31, %v2407_v16  ;;  %v10717_v16 = vld [vmem:[%s11400_s13 + $0x18] sm:$0xff] }
 0x887   :  { %v8121_v32 = vpop.f32.mrb[44].mxu0 }
 0x888   :  { %v6996_v30 = vmul.f32 -1.442695, %v8121_v32  ;;  %v2600_v17 = vpop.f32.mrb[45].mxu0  ;;  %v9061_v32 = vpack.c.bf16 %v2847_v14, %v2846_v13  ;;  %v2751_v13 = vld [vmem:[#allocation14 + $0x18] sm:$0xff] }
 0x889   :  { %v6995_v3 = vmul.f32 -1.442695, %v2600_v17  ;;  %v2848_v17 = vld [vmem:[#allocation14 + $0x70] sm:$0xff] }
 0x88a   :  { %9573 = vpow2.f32 %v6996_v30  ;;  %v10724_v30 = vld [vmem:[%s11400_s13 + $0x40] sm:$0xff] }
 0x88b   :  { %9575 = vpow2.f32 %v6995_v3  ;;  %v8124_v21 = vpop.f32.mrb[46].mxu0  ;;  %v2849_v3 = vld [vmem:[#allocation14 + $0x78] sm:$0xff] }
 0x88c   :  { %v6998_v23 = vmul.f32 -1.442695, %v8124_v21  ;;  %v2610_v24 = vpop.f32.mrb[47].mxu0  ;;  %v10731_v21 = vld [vmem:[%s11400_s13 + $0x48] sm:$0xff] }
 0x88d   :  { %v6997_v26 = vmul.f32 -1.442695, %v2610_v24  ;;  %v10738_v24 = vld [vmem:[%s11400_s13 + $0x50] sm:$0xff] }
 0x88e   :  { %9577 = vpow2.f32 %v6998_v23  ;;  %v9065_v23 = vpack.c.bf16 %v2849_v3, %v2848_v17  ;;  %v9073_v17 = vpack.c.bf16 %v2751_v13, %v2750_v6 }
 0x88f   :  { %9579 = vpow2.f32 %v6997_v26  ;;  %v10745_v26 = vld [vmem:[%s11400_s13 + $0x58] sm:$0xff] }
 0x894   :  { %v9574_v9 = vpop.eup %9573 }
 0x895   :  { %v9576_v29 = vpop.eup %9575  ;;  %v2632_v45 = vadd.f32 1.0, %v9574_v9  ;;  %v2748_v9 = vld [vmem:[#allocation14] sm:$0xff] }
 0x896   :  { %v2631_v43 = vadd.f32 1.0, %v9576_v29  ;;  %v2749_v29 = vld [vmem:[#allocation14 + $0x8] sm:$0xff] }
 0x897   :  { %9581 = vrcp.f32 %v2632_v45  ;;  %v10751_v45 = vpack.c.bf16 %v2749_v29, %v2748_v9  ;;  %v2753_v9 = vld [vmem:[#allocation14 + $0x28] sm:$0xff] }
 0x898   :  { %v9578_v18 = vpop.eup %9577  ;;  %9583 = vrcp.f32 %v2631_v43  ;;  %v7024_v43 = vld [vmem:[%s11397_s2 + $0x40] sm:$0xff] }
 0x899   :  { %v9580_v19 = vpop.eup %9579  ;;  %v2634_v25 = vadd.f32 1.0, %v9578_v18  ;;  %v7025_v18 = vld [vmem:[%s11397_s2 + $0x48] sm:$0xff] }
 0x89a   :  { %v2633_v47 = vadd.f32 1.0, %v9580_v19  ;;  %v9109_v19 = vpack.c.bf16 %v7025_v18, %v7024_v43 }
 0x89b   :  { %9585 = vrcp.f32 %v2634_v25  ;;  %v7026_v25 = vld [vmem:[%s11397_s2 + $0x50] sm:$0xff] }
 0x89c   :  { %9587 = vrcp.f32 %v2633_v47  ;;  %v7027_v47 = vld [vmem:[%s11397_s2 + $0x58] sm:$0xff] }
 0x89d   :  { %v9113_v31 = vpack.c.bf16 %v7027_v47, %v7026_v25  ;;  %v2754_v47 = vld [vmem:[#allocation14 + $0x30] sm:$0xff] }
 0x8a1   :  { %v9582_v33 = vpop.eup %9581 }
 0x8a2   :  { %v9584_v34 = vpop.eup %9583  ;;  %v2644_v38 = vmul.f32 %v9582_v33, %v10534_v20  ;;  %v7028_v33 = vld [vmem:[%s11397_s2 + $0x60] sm:$0xff] }
 0x8a3   :  { %v2643_v42 = vmul.f32 %v9584_v34, %v10536_v22  ;;  %v7029_v34 = vld [vmem:[%s11397_s2 + $0x68] sm:$0xff] }
 0x8a4   :  { %v2648_v48 = vadd.f32 %v2644_v38, %v2403_v37  ;;  %v9117_v37 = vpack.c.bf16 %v7029_v34, %v7028_v33  ;;  %v7030_v38 = vld [vmem:[%s11397_s2 + $0x70] sm:$0xff] }
 0x8a5   :  { %v9586_v7 = vpop.eup %9585  ;;  %v2647_v49 = vadd.f32 %v2643_v42, %v2398_v44  ;;  %v7031_v44 = vld [vmem:[%s11397_s2 + $0x78] sm:$0xff] }
 0x8a6   :  { %v9588_v50 = vpop.eup %9587  ;;  %v2656_v56 = vmul.f32 0.1, %v2648_v48  ;;  %v2646_v59 = vmul.f32 %v9586_v7, %v10540_v27  ;;  %vm2652_vm8 = vcmp.gt.f32.partialorder %v2648_v48, 0.0  ;;  %v9121_v42 = vpack.c.bf16 %v7031_v44, %v7030_v38  ;;  %v3364_v7 = vld [vmem:[#allocation2 + $0x98] sm:$0xff]  ;;  %v3131_v38 = vld [vmem:[#allocation14 + $0x88] sm:$0xff] }
 0x8a7   :  { %v2655_v10 = vmul.f32 0.1, %v2647_v49  ;;  %v2645_v58 = vmul.f32 %v9588_v50, %v10542_v28  ;;  %vm2651_vm9 = vcmp.gt.f32.partialorder %v2647_v49, 0.0  ;;  %v9053_v28 = vpack.c.bf16 %v2843_v57, %v2842_v2  ;;  %v3374_v57 = vld [vmem:[#allocation2 + $0xe8] sm:$0xff] }
 0x8a8   :  { %v2650_v62 = vadd.f32 %v2646_v59, %v2413_v8  ;;  %v2660_v46 = vsel %vm2652_vm8, %v2648_v48, %v2656_v56  ;;  %v3362_v48 = vld [vmem:[#allocation2 + $0x88] sm:$0xff]  ;;  %v3363_v8 = vld [vmem:[#allocation2 + $0x90] sm:$0xff]  ;;  %v3368_v59 = vld [vmem:[#allocation2 + $0xb8] sm:$0xff] }
 0x8a9   :  { %v2649_v20 = vadd.f32 %v2645_v58, %v2408_v61  ;;  %v2659_v63 = vsel %vm2651_vm9, %v2647_v49, %v2655_v10  ;;  %v3361_v49 = vld [vmem:[#allocation2 + $0x80] sm:$0xff]  ;;  %v9125_v50 = vpack.c.bf16 %v3364_v7, %v3362_v48  ;;  %v3366_v56 = vld [vmem:[#allocation2 + $0xa8] sm:$0xff]  ;;  %v3132_v7 = vld [vmem:[#allocation14 + $0x90] sm:$0xff] }
 0x8aa   :  { %v2658_v0 = vmul.f32 0.1, %v2650_v62  ;;  %v9037_v22 = vpack.c.bf16 %v2660_v46, %v2659_v63  ;;  %vm2654_vm10 = vcmp.gt.f32.partialorder %v2650_v62, 0.0  ;;  %v9127_v61 = vpack.c.bf16 %v3363_v8, %v3361_v49  ;;  %v3365_v58 = vld [vmem:[#allocation2 + $0xa0] sm:$0xff]  ;;  %v3370_v46 = vld [vmem:[#allocation2 + $0xc8] sm:$0xff]  ;;  %v3133_v49 = vld [vmem:[#allocation14 + $0x98] sm:$0xff] }
 0x8ab   :  { %v2657_v40 = vmul.f32 0.1, %v2649_v20  ;;  %vm2653_vm12 = vcmp.gt.f32.partialorder %v2649_v20, 0.0  ;;  %v9129_v10 = vpack.c.bf16 %v3368_v59, %v3366_v56  ;;  %v3134_v8 = vld [vmem:[#allocation14 + $0xa0] sm:$0xff]  ;;  %v3135_v56 = vld [vmem:[#allocation14 + $0xa8] sm:$0xff] }
 0x8ac   :  { %9038 = vmatprep.subr.bf16.mxu1 %v9037_v22  ;;  %9046 = vmatprep.subr.bf16.mxu0 %v9037_v22  ;;  %v2662_v27 = vsel %vm2654_vm10, %v2650_v62, %v2658_v0  ;;  %v3367_v62 = vld [vmem:[#allocation2 + $0xb0] sm:$0xff]  ;;  %v9101_v59 = vpack.c.bf16 %v3135_v56, %v3134_v8  ;;  %v7061_v56 = vld [vmem:[%s11365_s7 + $0x58] sm:$0xff] }
 0x8ad   :  { %9040 = vmatpush3.bf16.msra.mxu1 %v9037_v22  ;;  %9048 = vmatpush3.bf16.msra.mxu0 %v9037_v22  ;;  %v2661_v60 = vsel %vm2653_vm12, %v2649_v20, %v2657_v40  ;;  %v3372_v20 = vld [vmem:[#allocation2 + $0xd8] sm:$0xff]  ;;  %v9131_v63 = vpack.c.bf16 %v3367_v62, %v3365_v58  ;;  %v3371_v40 = vld [vmem:[#allocation2 + $0xd0] sm:$0xff] }
 0x8ae   :  { %v9041_v1 = vpack.c.bf16 %v2662_v27, %v2661_v60  ;;  %v9133_v0 = vpack.c.bf16 %v3372_v20, %v3370_v46  ;;  %v3376_v27 = vld [vmem:[#allocation2 + $0xf8] sm:$0xff]  ;;  %v3373_v60 = vld [vmem:[#allocation2 + $0xe0] sm:$0xff]  ;;  %v7060_v8 = vld [vmem:[%s11365_s7 + $0x50] sm:$0xff] }
 0x8b0   :  { %9042 = vmatprep.subr.bf16.mxu1 %v9041_v1  ;;  %9050 = vmatprep.subr.bf16.mxu0 %v9041_v1 }
 0x8b1   :  { %9044 = vmatpush3.bf16.msra.mxu1 %v9041_v1  ;;  %9052 = vmatpush3.bf16.msra.mxu0 %v9041_v1 }
 0x8b2   :  { %9086 = vmatprep.subr.bf16.mxu0 %v9037_v22  ;;  %9054 = vmatprep.subr.bf16.mxu1 %v9053_v28 }
 0x8b4   :  { %8148 = vmatmul.mubr.msk.f32.vlgmr.msra.gmra.mrb[48].mxu0 %vm448_vm1, %v10682_v35  ;;  %8134 = vmatmul.mubr.msk.f32.vlgmr.msra.gmra.mrb[40].mxu1 %vm448_vm1, %v10689_v36 }
 0x8b5   :  { %9088 = vmatpush3.bf16.msra.mxu0 %v9037_v22  ;;  %8150 = vmatprep.mubr.msk.f32.mxu0 %vm448_vm1, %v10696_v11  ;;  %v3369_v22 = vld [vmem:[#allocation2 + $0xc0] sm:$0xff] }
 0x8b6   :  { %9090 = vmatprep.subr.bf16.mxu0 %v9041_v1  ;;  %8136 = vmatprep.mubr.msk.f32.mxu1 %vm448_vm1, %v10703_v12  ;;  %v9135_v2 = vpack.c.bf16 %v3371_v40, %v3369_v22 }
 0x8b7   :  { %9056 = vmatpush3.bf16.msra.mxu1 %v9053_v28  ;;  %v3375_v28 = vld [vmem:[#allocation2 + $0xf0] sm:$0xff] }
 0x8b8   :  { %8151 = vmatmul.mubr.msk.f32.gmra.mrb[50].mxu0 %vm448_vm1, %v10710_v4  ;;  %8137 = vmatmul.mubr.msk.f32.gmra.mrb[42].mxu1 %vm448_vm1, %v10717_v16  ;;  %v9139_v5 = vpack.c.bf16 %v3375_v28, %v3373_v60  ;;  %v7023_v28 = vld [vmem:[%s11376_s18] ss:$0 sm:$0xff] }
 0x8b9   :  { %9092 = vmatpush3.bf16.msra.mxu0 %v9041_v1  ;;  %8205 = vmatprep.mubr.msk.f32.mxu0 %vm448_vm1, %v10724_v30  ;;  %v9137_v1 = vpack.c.bf16 %v3376_v27, %v3374_v57 }
 0x8ba   :  { %9058 = vmatprep.subr.bf16.mxu1 %v9057_v39  ;;  %9110 = vmatprep.subr.bf16.mxu0 %v9109_v19 }
 0x8bb   :  { %9060 = vmatpush3.bf16.msra.mxu1 %v9057_v39 }
 0x8bc   :  { %8206 = vmatmul.mubr.msk.f32.vlgmr.msra.gmra.mrb[52].mxu0 %vm448_vm1, %v10731_v21  ;;  %9062 = vmatprep.subr.bf16.mxu1 %v9061_v32 }
 0x8bd   :  { %8208 = vmatprep.mubr.msk.f32.mxu0 %vm448_vm1, %v10738_v24  ;;  %9112 = vmatpush3.bf16.msra.mxu0 %v9109_v19 }
 0x8be   :  { %9114 = vmatprep.subr.bf16.mxu0 %v9113_v31 }
 0x8bf   :  { %9064 = vmatpush3.bf16.msra.mxu1 %v9061_v32 }
 0x8c0   :  { %8209 = vmatmul.mubr.msk.f32.gmra.mrb[54].mxu0 %vm448_vm1, %v10745_v26  ;;  %9066 = vmatprep.subr.bf16.mxu1 %v9065_v23 }
 0x8c1   :  { %8249 = vmatprep.mubr.msk.f32.mxu0 %vm221_vm0, %v10571_v41  ;;  %9116 = vmatpush3.bf16.msra.mxu0 %v9113_v31  ;;  %v2755_v31 = vld [vmem:[#allocation14 + $0x38] sm:$0xff] }
 0x8c2   :  { %9118 = vmatprep.subr.bf16.mxu0 %v9117_v37  ;;  %v9081_v34 = vpack.c.bf16 %v2755_v31, %v2754_v47  ;;  %v9640_v47 = vld [vmem:[%s11399_s26 + $0x10] sm:$0xff] }
 0x8c3   :  { %9068 = vmatpush3.bf16.msra.mxu1 %v9065_v23  ;;  %v2752_v23 = vld [vmem:[#allocation14 + $0x20] sm:$0xff] }
 0x8c4   :  { %9070 = vmatprep.subr.bf16.mxu1 %v10751_v45  ;;  %v9077_v18 = vpack.c.bf16 %v2753_v9, %v2752_v23 }
 0x8c5   :  { %9120 = vmatpush3.bf16.msra.mxu0 %v9117_v37 }
 0x8c6   :  { %9122 = vmatprep.subr.bf16.mxu0 %v9121_v42 }
 0x8c9   :  { %9124 = vmatpush3.bf16.msra.mxu0 %v9121_v42 }
 0x8ca   :  { %9126 = vmatprep.subr.bf16.mxu0 %v9125_v50  ;;  %v9097_v50 = vpack.c.bf16 %v3133_v49, %v3132_v7  ;;  %v7058_v49 = vld [vmem:[%s11365_s7 + $0x40] sm:$0xff] }
 0x8cc   :  { %8250 = vmatmul.mubr.msk.f32.vlgmr.msra.gmra.mrb[56].mxu0 %vm221_vm0, %v10614_v51 }
 0x8cd   :  { %8252 = vmatprep.mubr.msk.f32.mxu0 %vm221_vm0, %v10621_v52  ;;  %9128 = vmatpush1.bf16.msra.mxu0 %v9127_v61  ;;  %v3136_v61 = vld [vmem:[#allocation14 + $0xb0] sm:$0xff] }
 0x8ce   :  { %9130 = vmatprep.subr.bf16.mxu0 %v9129_v10  ;;  %v3137_v10 = vld [vmem:[#allocation14 + $0xb8] sm:$0xff] }
 0x8cf   :  { %v9105_v58 = vpack.c.bf16 %v3137_v10, %v3136_v61  ;;  %v9185_v61 = vpack.c.bf16 %v7061_v56, %v7060_v8  ;;  %v7063_v10 = vld [vmem:[%s11365_s7 + $0x68] sm:$0xff] }
 0x8d0   :  { %8253 = vmatmul.mubr.msk.f32.gmra.mrb[58].mxu0 %vm221_vm0, %v10628_v53 }
 0x8d1   :  { %3453 = vmatprep.mubr.f32.mxu0 %v9906_v54  ;;  %9132 = vmatpush1.bf16.msra.mxu0 %v9131_v63 }
 0x8d2   :  { %9134 = vmatprep.subr.bf16.mxu0 %v9133_v0 }
 0x8d5   :  { %9136 = vmatpush1.bf16.msra.mxu0 %v9135_v2 }
 0x8d6   :  { %9138 = vmatprep.subr.bf16.mxu0 %v9137_v1 }
 0x8d9   :  { %9140 = vmatpush1.bf16.msra.mxu0 %v9139_v5 }
 0x987   :  { %v8149_v14 = vpop.f32.mrb[48].mxu0  ;;  %v8135_v39 = vpop.f32.mrb[40].mxu1 }
 0x988   :  { %v2822_v32 = vpop.f32.mrb[49].mxu0  ;;  %v2729_v3 = vpop.f32.mrb[41].mxu1 }
 0x989   :  { %8169 = vmatprep.mubr.msk.f32.mxu1 %vm221_vm0, %v2822_v32 }
 0x98a   :  { %8170 = vmatmul.mubr.msk.f32.vlgmr.msra.gmra.mrb[44].mxu1 %vm221_vm0, %v8149_v14 }
 0x98b   :  { %9072 = vmatpush3.bf16.msra.mxu1 %v10751_v45  ;;  %v8152_v29 = vpop.f32.mrb[50].mxu0  ;;  %v8138_v43 = vpop.f32.mrb[42].mxu1  ;;  %v3130_v45 = vld [vmem:[#allocation14 + $0x80] sm:$0xff] }
 0x98c   :  { %9074 = vmatprep.subr.bf16.mxu1 %v9073_v17  ;;  %v2832_v19 = vpop.f32.mrb[51].mxu0  ;;  %v2739_v25 = vpop.f32.mrb[43].mxu1  ;;  %v9093_v42 = vpack.c.bf16 %v3131_v38, %v3130_v45 }
 0x98d   :  { %8172 = vmatprep.mubr.msk.f32.mxu1 %vm221_vm0, %v2832_v19  ;;  %v9639_v19 = vld [vmem:[%s11399_s26 + $0x18] sm:$0xff] }
 0x98e   :  { %8173 = vmatmul.mubr.msk.f32.gmra.mrb[46].mxu1 %vm221_vm0, %v8152_v29 }
 0x98f   :  { %9076 = vmatpush3.bf16.msra.mxu1 %v9073_v17  ;;  %8191 = vmatprep.mubr.msk.f32.mxu1 %vm221_vm0, %v2729_v3  ;;  %v8207_v33 = vpop.f32.mrb[52].mxu0  ;;  %v9638_v17 = vld [vmem:[%s11399_s26] sm:$0xff] }
 0x990   :  { %9078 = vmatprep.subr.bf16.mxu1 %v9077_v18  ;;  %v3110_v37 = vpop.f32.mrb[53].mxu0 }
 0x993   :  { %9080 = vmatpush3.bf16.msra.mxu1 %v9077_v18  ;;  %v8210_v44 = vpop.f32.mrb[54].mxu0 }
 0x994   :  { %9082 = vmatprep.subr.bf16.mxu1 %v9081_v34  ;;  %v3120_v48 = vpop.f32.mrb[55].mxu0 }
 0x997   :  { %9084 = vmatpush3.bf16.msra.mxu1 %v9081_v34 }
 0x998   :  { %9094 = vmatprep.subr.bf16.mxu1 %v9093_v42 }
 0x99a   :  { %8192 = vmatmul.mubr.msk.f32.vlgmr.msra.gmra.mrb[44].mxu1 %vm221_vm0, %v8135_v39  ;;  %v9637_v39 = vld [vmem:[%s11399_s26 + $0x8] sm:$0xff] }
 0x99b   :  { %9096 = vmatpush3.bf16.msra.mxu1 %v9093_v42  ;;  %8194 = vmatprep.mubr.msk.f32.mxu1 %vm221_vm0, %v2739_v25 }
 0x99c   :  { %9098 = vmatprep.subr.bf16.mxu1 %v9097_v50 }
 0x99e   :  { %8195 = vmatmul.mubr.msk.f32.gmra.mrb[46].mxu1 %vm221_vm0, %v8138_v43 }
 0x99f   :  { %9100 = vmatpush3.bf16.msra.mxu1 %v9097_v50  ;;  %8227 = vmatprep.mubr.msk.f32.mxu1 %vm221_vm0, %v3110_v37  ;;  %v8251_v62 = vpop.f32.mrb[56].mxu0 }
 0x9a0   :  { %9102 = vmatprep.subr.bf16.mxu1 %v9101_v59  ;;  %v3329_v46 = vpop.f32.mrb[57].mxu0  ;;  %v3353_v20 = vmul.f32 0.1, %v8251_v62  ;;  %vm3349_vm14 = vcmp.gt.f32.partialorder %v8251_v62, 0.0 }
 0x9a1   :  { %vm3348_vm13 = vcmp.gt.f32.partialorder %v3329_v46, 0.0  ;;  %v3352_v63 = vmul.f32 0.1, %v3329_v46 }
 0x9a2   :  { %v3357_v2 = vsel %vm3349_vm14, %v8251_v62, %v3353_v20  ;;  %v7064_v62 = vld [vmem:[%s11365_s7 + $0x70] sm:$0xff] }
 0x9a3   :  { %9104 = vmatpush3.bf16.msra.mxu1 %v9101_v59  ;;  %v3356_v0 = vsel %vm3348_vm13, %v3329_v46, %v3352_v63  ;;  %v8254_v22 = vpop.f32.mrb[58].mxu0  ;;  %v7062_v59 = vld [vmem:[%s11365_s7 + $0x60] sm:$0xff]  ;;  %v7065_v46 = vld [vmem:[%s11365_s7 + $0x78] sm:$0xff] }
 0x9a4   :  { %9106 = vmatprep.subr.bf16.mxu1 %v9105_v58  ;;  %7036 = vmatmul.mubr.msk.f32.vlgmr.msra.gmra.mrb[60].mxu0 %vm221_vm0, %v3356_v0  ;;  %v3339_v40 = vpop.f32.mrb[59].mxu0  ;;  %v3355_v27 = vmul.f32 0.1, %v8254_v22  ;;  %vm3351_vm2 = vcmp.gt.f32.partialorder %v8254_v22, 0.0  ;;  %v9193_v20 = vpack.c.bf16 %v7065_v46, %v7064_v62  ;;  %v3798_v63 = vld [vmem:[#allocation5 + $0x40] sm:$0xff]  ;;  %v3799_v0 = vld [vmem:[#allocation5 + $0x48] sm:$0xff] }
 0x9a5   :  { %3459 = vmatprep.mubr.f32.mxu0 %v9906_v54  ;;  %v3354_v57 = vmul.f32 0.1, %v3339_v40  ;;  %vm3350_vm15 = vcmp.gt.f32.partialorder %v3339_v40, 0.0  ;;  %v4018_v62 = vld [vmem:[#allocation7 + $0x8] sm:$0xff] }
 0x9a6   :  { %v3359_v1 = vsel %vm3351_vm2, %v8254_v22, %v3355_v27  ;;  %v3800_v22 = vld [vmem:[#allocation5 + $0x50] sm:$0xff] }
 0x9a7   :  { %9108 = vmatpush3.bf16.msra.mxu1 %v9105_v58  ;;  %v3358_v60 = vsel %vm3350_vm15, %v3339_v40, %v3354_v57  ;;  %v9189_v58 = vpack.c.bf16 %v7063_v10, %v7062_v59  ;;  %v9165_v40 = vpack.c.bf16 %v3799_v0, %v3798_v63 }
 0x9a8   :  { %7037 = vmatmul.mubr.msk.f32.gmra.mrb[62].mxu0 %vm221_vm0, %v3357_v2  ;;  %v3801_v2 = vld [vmem:[#allocation5 + $0x58] sm:$0xff] }
 0x9a9   :  { %3465 = vmatprep.mubr.f32.mxu0 %v9906_v54  ;;  %v9169_v57 = vpack.c.bf16 %v3801_v2, %v3800_v22 }
 0x9aa   :  { %8228 = vmatmul.mubr.msk.f32.vlgmr.msra.gmra.mrb[44].mxu1 %vm221_vm0, %v8207_v33 }
 0x9ab   :  { %8230 = vmatprep.mubr.msk.f32.mxu1 %vm221_vm0, %v3120_v48 }
 0x9ac   :  { %7038 = vmatmul.mubr.msk.f32.gmra.mrb[64].mxu0 %vm221_vm0, %v3358_v60 }
 0x9ad   :  { %3471 = vmatprep.mubr.f32.mxu0 %v9906_v54 }
 0x9ae   :  { %8231 = vmatmul.mubr.msk.f32.gmra.mrb[46].mxu1 %vm221_vm0, %v8210_v44 }
 0x9af   :  { %8263 = vmatprep.mubr.msk.f32.mxu1 %vm448_vm1, %v10635_v55 }
 0x9b0   :  { %7039 = vmatmul.mubr.msk.f32.gmra.mrb[66].mxu0 %vm221_vm0, %v3359_v1 }
 0x9b1   :  { %8277 = vmatprep.mubr.msk.f32.mxu0 %vm448_vm1, %v10668_v15 }
 0xa77   :  { %v10858_v34 = vpop.f32.mrb[60].mxu0 }
 0xa78   :  { %v3457_v37 = vpop.f32.mrb[61].mxu0 }
 0xa7b   :  { %v10860_v45 = vpop.f32.mrb[62].mxu0 }
 0xa7c   :  { %v3463_v38 = vpop.f32.mrb[63].mxu0 }
 0xa7d   :  { %v8229_v5 = vpop.f32.mrb[44].mxu1 }
 0xa7e   :  { %v3247_v6 = vadd.f32 %v8229_v5, %v7023_v28  ;;  %v3216_v13 = vpop.f32.mrb[45].mxu1 }
 0xa7f   :  { %v3246_v14 = vadd.f32 %v7023_v28, %v3216_v13  ;;  %v10862_v44 = vpop.f32.mrb[64].mxu0 }
 0xa80   :  { %v10815_v32 = vadd.f32 %v9637_v39, %v3247_v6  ;;  %v3469_v42 = vpop.f32.mrb[65].mxu0 }
 0xa81   :  { %v10820_v3 = vadd.f32 %v9638_v17, %v3246_v14  ;;  %v8232_v23 = vpop.f32.mrb[46].mxu1 }
 0xa82   :  { %v3249_v9 = vadd.f32 %v8232_v23, %v7023_v28  ;;  %v3226_v29 = vpop.f32.mrb[47].mxu1 }
 0xa83   :  { %v9141_v43 = vpack.c.bf16 %v10815_v32, %v10820_v3  ;;  %v3248_v18 = vadd.f32 %v7023_v28, %v3226_v29  ;;  %v10864_v48 = vpop.f32.mrb[66].mxu0 }
 0xa84   :  { %v10827_v25 = vadd.f32 %v9639_v19, %v3249_v9  ;;  %v3475_v7 = vpop.f32.mrb[67].mxu0 }
 0xa85   :  { %v10832_v31 = vadd.f32 %v9640_v47, %v3248_v18  ;;  %9142 = vmatprep.subr.bf16.mxu1 %v9141_v43  ;;  %9150 = vmatprep.subr.bf16.mxu0 %v9141_v43  ;;  %v3802_v47 = vld [vmem:[#allocation5 + $0x60] sm:$0xff] }
 0xa86   :  { %9144 = vmatpush3.bf16.msra.mxu1 %v9141_v43  ;;  %9152 = vmatpush3.bf16.msra.mxu0 %v9141_v43 }
 0xa87   :  { %v9145_v33 = vpack.c.bf16 %v10827_v25, %v10832_v31 }
 0xa89   :  { %9146 = vmatprep.subr.bf16.mxu1 %v9145_v33  ;;  %9154 = vmatprep.subr.bf16.mxu0 %v9145_v33 }
 0xa8a   :  { %9148 = vmatpush3.bf16.msra.mxu1 %v9145_v33  ;;  %9156 = vmatpush3.bf16.msra.mxu0 %v9145_v33 }
 0xa8b   :  { %9158 = vmatprep.subr.bf16.mxu1 %v9141_v43  ;;  %9166 = vmatprep.subr.bf16.mxu0 %v9165_v40 }
 0xa8d   :  { %8264 = vmatmul.mubr.msk.f32.vlgmr.msra.gmra.mrb[48].mxu1 %vm448_vm1, %v10689_v36  ;;  %8278 = vmatmul.mubr.msk.f32.vlgmr.msra.gmra.mrb[68].mxu0 %vm448_vm1, %v10682_v35 }
 0xa8e   :  { %9160 = vmatpush3.bf16.msra.mxu1 %v9141_v43  ;;  %8266 = vmatprep.mubr.msk.f32.mxu1 %vm448_vm1, %v10703_v12 }
 0xa8f   :  { %9162 = vmatprep.subr.bf16.mxu1 %v9145_v33  ;;  %8280 = vmatprep.mubr.msk.f32.mxu0 %vm448_vm1, %v10696_v11 }
 0xa90   :  { %9168 = vmatpush3.bf16.msra.mxu0 %v9165_v40 }
 0xa91   :  { %8267 = vmatmul.mubr.msk.f32.gmra.mrb[50].mxu1 %vm448_vm1, %v10717_v16  ;;  %8281 = vmatmul.mubr.msk.f32.gmra.mrb[70].mxu0 %vm448_vm1, %v10710_v4 }
 0xa92   :  { %9164 = vmatpush3.bf16.msra.mxu1 %v9145_v33  ;;  %8291 = vmatprep.mubr.msk.f32.mxu1 %vm448_vm1, %v10724_v30  ;;  %v3803_v33 = vld [vmem:[#allocation5 + $0x68] sm:$0xff] }
 0xa93   :  { %9170 = vmatprep.subr.bf16.mxu0 %v9169_v57 }
 0xa94   :  { %9172 = vmatpush3.bf16.msra.mxu0 %v9169_v57 }
 0xa95   :  { %8292 = vmatmul.mubr.msk.f32.vlgmr.msra.gmra.mrb[52].mxu1 %vm448_vm1, %v10731_v21 }
 0xa96   :  { %8294 = vmatprep.mubr.msk.f32.mxu1 %vm448_vm1, %v10738_v24 }
 0xa99   :  { %8295 = vmatmul.mubr.msk.f32.gmra.mrb[54].mxu1 %vm448_vm1, %v10745_v26 }
 0xa9a   :  { %8335 = vmatprep.mubr.msk.f32.mxu1 %vm221_vm0, %v10571_v41  ;;  %v7059_v41 = vld [vmem:[%s11365_s7 + $0x48] sm:$0xff] }
 0xa9b   :  { %v9181_v50 = vpack.c.bf16 %v7059_v41, %v7058_v49  ;;  %v9173_v49 = vpack.c.bf16 %v3803_v33, %v3802_v47  ;;  %v3804_v41 = vld [vmem:[#allocation5 + $0x70] sm:$0xff] }
 0xa9d   :  { %9182 = vmatprep.subr.bf16.mxu1 %v9181_v50  ;;  %9174 = vmatprep.subr.bf16.mxu0 %v9173_v49 }
 0xa9e   :  { %9184 = vmatpush3.bf16.msra.mxu1 %v9181_v50  ;;  %9176 = vmatpush3.bf16.msra.mxu0 %v9173_v49  ;;  %v3805_v50 = vld [vmem:[#allocation5 + $0x78] sm:$0xff] }
 0xa9f   :  { %9186 = vmatprep.subr.bf16.mxu1 %v9185_v61  ;;  %v9177_v8 = vpack.c.bf16 %v3805_v50, %v3804_v41 }
 0xaa1   :  { %9178 = vmatprep.subr.bf16.mxu0 %v9177_v8 }
 0xaa2   :  { %9188 = vmatpush3.bf16.msra.mxu1 %v9185_v61  ;;  %9180 = vmatpush3.bf16.msra.mxu0 %v9177_v8 }
 0xaa3   :  { %9190 = vmatprep.subr.bf16.mxu1 %v9189_v58  ;;  %8341 = vmatprep.subr.mxu0 %v4018_v62 }
 0xaa6   :  { %9192 = vmatpush3.bf16.msra.mxu1 %v9189_v58 }
 0xaa7   :  { %9194 = vmatprep.subr.bf16.mxu1 %v9193_v20 }
 0xaaa   :  { %9196 = vmatpush3.bf16.msra.mxu1 %v9193_v20 }
 0xaad   :  { %8336 = vmatmul.mubr.msk.f32.vlgmr.msra.gmra.mrb[56].mxu1 %vm221_vm0, %v10614_v51 }
 0xaae   :  { %8338 = vmatprep.mubr.msk.f32.mxu1 %vm221_vm0, %v10621_v52 }
 0xab1   :  { %8339 = vmatmul.mubr.msk.f32.gmra.mrb[58].mxu1 %vm221_vm0, %v10628_v53 }
 0xab2   :  { %8357 = vmatprep.mubr.msk.f32.mxu1 %vm448_vm1, %v10635_v55 }
 0xb60   :  { %v8265_v27 = vpop.f32.mrb[48].mxu1  ;;  %v8279_v60 = vpop.f32.mrb[68].mxu0 }
 0xb61   :  { %v3564_v51 = vmul.f32 %v8265_v27, %v10860_v45  ;;  %3658 = vrot.lane.b32.xlu1 %v8279_v60, %s9907_s19  ;;  %v3544_v52 = vpop.f32.mrb[49].mxu1  ;;  %v3633_v53 = vpop.f32.mrb[69].mxu0 }
 0xb62   :  { %v3563_v1 = vmul.f32 %v3544_v52, %v10858_v34  ;;  %3656 = vrot.lane.b32.xlu0 %v3633_v53, %s9907_s19 }
 0xb64   :  { %v8268_v55 = vpop.f32.mrb[50].mxu1  ;;  %v8282_v28 = vpop.f32.mrb[70].mxu0 }
 0xb65   :  { %v3566_v5 = vmul.f32 %v8268_v55, %v10864_v48  ;;  %3662 = vrot.lane.b32.xlu1 %v8282_v28, %s9907_s19  ;;  %v3554_v6 = vpop.f32.mrb[51].mxu1  ;;  %v3643_v13 = vpop.f32.mrb[71].mxu0 }
 0xb66   :  { %v3565_v14 = vmul.f32 %v3554_v6, %v10862_v44  ;;  %3660 = vrot.lane.b32.xlu0 %v3643_v13, %s9907_s19 }
 0xb68   :  { %v8293_v39 = vpop.f32.mrb[52].mxu1 }
 0xb69   :  { %v3778_v17 = vmul.f32 %v8293_v39, %v3463_v38  ;;  %v3758_v23 = vpop.f32.mrb[53].mxu1 }
 0xb6a   :  { %v3777_v9 = vmul.f32 %v3758_v23, %v3457_v37 }
 0xb6c   :  { %v8296_v29 = vpop.f32.mrb[54].mxu1 }
 0xb6d   :  { %v3780_v43 = vmul.f32 %v8296_v29, %v3475_v7  ;;  %v3768_v18 = vpop.f32.mrb[55].mxu1 }
 0xb6e   :  { %v3779_v19 = vmul.f32 %v3768_v18, %v3469_v42 }
 0xb80   :  { %v8337_v56 = vpop.f32.mrb[56].mxu1 }
 0xb81   :  { %v3986_v59 = vpop.f32.mrb[57].mxu1  ;;  %vm4006_vm9 = vcmp.gt.f32.partialorder %v8337_v56, 0.0 }
 0xb82   :  { %v4009_v6 = vmul.f32 0.1, %v3986_v59  ;;  %vm4005_vm5 = vcmp.gt.f32.partialorder %v3986_v59, 0.0 }
 0xb84   :  { %v8340_v10 = vpop.f32.mrb[58].mxu1 }
 0xb85   :  { %v3996_v42 = vpop.f32.mrb[59].mxu1  ;;  %vm4008_vm10 = vcmp.gt.f32.partialorder %v8340_v10, 0.0 }
 0xb86   :  { %vm4007_vm8 = vcmp.gt.f32.partialorder %v3996_v42, 0.0 }
 0xbd3   :  { %v3659_v61 = vpop.permute.xlu1 %3658 }
 0xbd4   :  { %v3669_v38 = vmul.f32 %v3659_v61, %v10860_v45  ;;  %v3657_v37 = vpop.permute.xlu0 %3656 }
 0xbd5   :  { %v3668_v7 = vmul.f32 %v3657_v37, %v10858_v34 }
 0xbd6   :  { %3678 = vrot.lane.b32.xlu1 %v3669_v38, %s9907_s19 }
 0xbd7   :  { %v3663_v58 = vpop.permute.xlu1 %3662  ;;  %3676 = vrot.lane.b32.xlu0 %v3668_v7, %s9907_s19 }
 0xbd8   :  { %v3671_v46 = vmul.f32 %v3663_v58, %v10864_v48  ;;  %v3661_v20 = vpop.permute.xlu0 %3660 }
 0xbd9   :  { %v3670_v63 = vmul.f32 %v3661_v20, %v10862_v44 }
 0xbda   :  { %3682 = vrot.lane.b32.xlu1 %v3671_v46, %s9907_s19 }
 0xbdb   :  { %3680 = vrot.lane.b32.xlu0 %v3670_v63, %s9907_s19  ;;  %v7053_v63 = vld [vmem:[%s11364_s6 + $0x1] ss:$0 sm:$0xff] }
 0xc48   :  { %v3679_v45 = vpop.permute.xlu1 %3678 }
 0xc49   :  { %v3689_v34 = vadd.f32 %v3679_v45, %v3564_v51  ;;  %v3677_v0 = vpop.permute.xlu0 %3676 }
 0xc4a   :  { %v3688_v22 = vadd.f32 %v3677_v0, %v3563_v1 }
 0xc4b   :  { %v3782_v40 = vadd.f32 %v3778_v17, %v3689_v34  ;;  %v4013_v17 = vsel %vm4005_vm5, %v3986_v59, %v4009_v6 }
 0xc4c   :  { %v3781_v2 = vadd.f32 %v3777_v9, %v3688_v22  ;;  %v3683_v57 = vpop.permute.xlu1 %3682 }
 0xc4d   :  { %v3790_v27 = vmul.f32 0.1, %v3782_v40  ;;  %v3691_v60 = vadd.f32 %v3683_v57, %v3566_v5  ;;  %v3681_v52 = vpop.permute.xlu0 %3680  ;;  %vm3786_vm3 = vcmp.gt.f32.partialorder %v3782_v40, 0.0  ;;  %v4011_v5 = vmul.f32 0.1, %v3996_v42 }
 0xc4e   :  { %v3789_v48 = vmul.f32 0.1, %v3781_v2  ;;  %v3690_v53 = vadd.f32 %v3681_v52, %v3565_v14  ;;  %vm3785_vm4 = vcmp.gt.f32.partialorder %v3781_v2, 0.0  ;;  %v4010_v14 = vmul.f32 0.1, %v8337_v56 }
 0xc4f   :  { %v3784_v55 = vadd.f32 %v3780_v43, %v3691_v60  ;;  %v3794_v13 = vsel %vm3786_vm3, %v3782_v40, %v3790_v27  ;;  %v4015_v9 = vsel %vm4007_vm8, %v3996_v42, %v4011_v5  ;;  %v4012_v43 = vmul.f32 0.1, %v8340_v10 }
 0xc50   :  { %v3783_v44 = vadd.f32 %v3779_v19, %v3690_v53  ;;  %v3793_v28 = vsel %vm3785_vm4, %v3781_v2, %v3789_v48  ;;  %v4014_v29 = vsel %vm4006_vm9, %v8337_v56, %v4010_v14 }
 0xc51   :  { %v3792_v39 = vmul.f32 0.1, %v3784_v55  ;;  %8313 = vmatprep.mubr.msk.f32.mxu0 %vm221_vm0, %v3793_v28  ;;  %vm3788_vm7 = vcmp.gt.f32.partialorder %v3784_v55, 0.0  ;;  %v4016_v18 = vsel %vm4008_vm10, %v8340_v10, %v4012_v43 }
 0xc52   :  { %v3791_v51 = vmul.f32 0.1, %v3783_v44  ;;  %8314 = vmatmul.mubr.msk.f32.vlgmr.msra.gmra.mrb[72].mxu0 %vm221_vm0, %v3794_v13  ;;  %vm3787_vm6 = vcmp.gt.f32.partialorder %v3783_v44, 0.0 }
 0xc53   :  { %8342 = vmatpush3.msra.mxu0 %v4018_v62  ;;  %v3796_v23 = vsel %vm3788_vm7, %v3784_v55, %v3792_v39 }
 0xc54   :  { %v3795_v1 = vsel %vm3787_vm6, %v3783_v44, %v3791_v51 }
 0xc55   :  { %8316 = vmatprep.mubr.msk.f32.mxu0 %vm221_vm0, %v3795_v1 }
 0xc56   :  { %8317 = vmatmul.mubr.msk.f32.gmra.mrb[74].mxu0 %vm221_vm0, %v3796_v23  ;;  %v7094_v23 = vld [vmem:[%s11367_s9 + $0x100] sm:$0xff] }
 0xc57   :  { %8343 = vmatprep.mubr.msk.f32.mxu0 %vm1022_vm11, %v4013_v17 }
 0xc5a   :  { %8344 = vmatmul.mubr.msk.f32.vlgmr.msra.gmra.mrb[76].mxu0 %vm1022_vm11, %v4014_v29 }
 0xc5b   :  { %8346 = vmatprep.mubr.msk.f32.mxu0 %vm1022_vm11, %v4015_v9  ;;  %v7095_v9 = vld [vmem:[%s11367_s9 + $0x108] sm:$0xff] }
 0xc5e   :  { %8347 = vmatmul.mubr.msk.f32.gmra.mrb[78].mxu0 %vm1022_vm11, %v4016_v18 }
 0xc5f   :  { %8371 = vmatprep.mubr.msk.f32.mxu0 %vm448_vm1, %v10668_v15 }
 0xd25   :  { %v8315_v19 = vpop.f32.mrb[72].mxu0 }
 0xd26   :  { %v3892_v47 = vpop.f32.mrb[73].mxu0  ;;  %v3898_v0 = vadd.f32 %v8315_v19, %v7053_v63  ;;  %v9213_v19 = vpack.c.bf16 %v7095_v9, %v7094_v23  ;;  %v7085_v23 = vld [vmem:[%s11367_s9 + $0xd8] sm:$0xff] }
 0xd27   :  { %v3893_v40 = vadd.f32 %v7053_v63, %v3892_v47  ;;  %v7096_v47 = vld [vmem:[%s11367_s9 + $0x110] sm:$0xff] }
 0xd29   :  { %v8318_v33 = vpop.f32.mrb[74].mxu0 }
 0xd2a   :  { %v3902_v49 = vpop.f32.mrb[75].mxu0  ;;  %v3908_v48 = vadd.f32 %v8318_v33, %v7053_v63  ;;  %v7097_v33 = vld [vmem:[%s11367_s9 + $0x118] sm:$0xff] }
 0xd2b   :  { %v3903_v44 = vadd.f32 %v7053_v63, %v3902_v49  ;;  %v7098_v49 = vld [vmem:[%s11367_s9 + $0x120] sm:$0xff]  ;;  %v4871_v63 = vld [vmem:[#allocation10 + $0x98] sm:$0xff] }
 0xd2d   :  { %v8345_v41 = vpop.f32.mrb[76].mxu0 }
 0xd2e   :  { %v7075_v50 = vmul.f32 -1.442695, %v8345_v41  ;;  %v4097_v8 = vpop.f32.mrb[77].mxu0  ;;  %v7099_v41 = vld [vmem:[%s11367_s9 + $0x128] sm:$0xff] }
 0xd2f   :  { %v7074_v56 = vmul.f32 -1.442695, %v4097_v8 }
 0xd30   :  { %9589 = vpow2.f32 %v7075_v50  ;;  %v4763_v50 = vld [vmem:[#allocation8 + $0x48] sm:$0xff] }
 0xd31   :  { %9591 = vpow2.f32 %v7074_v56  ;;  %v8348_v59 = vpop.f32.mrb[78].mxu0  ;;  %v4764_v56 = vld [vmem:[#allocation8 + $0x50] sm:$0xff] }
 0xd32   :  { %v7077_v61 = vmul.f32 -1.442695, %v8348_v59  ;;  %v4107_v38 = vpop.f32.mrb[79].mxu0  ;;  %v4765_v59 = vld [vmem:[#allocation8 + $0x58] sm:$0xff] }
 0xd33   :  { %v7076_v37 = vmul.f32 -1.442695, %v4107_v38  ;;  %v4766_v38 = vld [vmem:[#allocation8 + $0x60] sm:$0xff] }
 0xd34   :  { %9593 = vpow2.f32 %v7077_v61  ;;  %v9273_v61 = vpack.c.bf16 %v4765_v59, %v4764_v56 }
 0xd35   :  { %9595 = vpow2.f32 %v7076_v37  ;;  %v4767_v37 = vld [vmem:[#allocation8 + $0x68] sm:$0xff] }
 0xd3a   :  { %v9590_v7 = vpop.eup %9589 }
 0xd3b   :  { %v9592_v10 = vpop.eup %9591  ;;  %v4129_v42 = vadd.f32 1.0, %v9590_v7  ;;  %v9277_v7 = vpack.c.bf16 %v4767_v37, %v4766_v38  ;;  %v7117_v38 = vld [vmem:[%s11367_s9 + $0x158] sm:$0xff] }
 0xd3c   :  { %v4128_v15 = vadd.f32 1.0, %v9592_v10  ;;  %v4768_v10 = vld [vmem:[#allocation8 + $0x70] sm:$0xff] }
 0xd3d   :  { %9597 = vrcp.f32 %v4129_v42  ;;  %v4769_v42 = vld [vmem:[#allocation8 + $0x78] sm:$0xff] }
 0xd3e   :  { %v9594_v58 = vpop.eup %9593  ;;  %9599 = vrcp.f32 %v4128_v15  ;;  %v9281_v15 = vpack.c.bf16 %v4769_v42, %v4768_v10  ;;  %v7119_v10 = vld [vmem:[%s11367_s9 + $0x168] sm:$0xff] }
 0xd3f   :  { %v9596_v62 = vpop.eup %9595  ;;  %v4131_v46 = vadd.f32 1.0, %v9594_v58  ;;  %v10994_v58 = vld [vmem:[%s11398_s25 + $0x8] sm:$0xff] }
 0xd40   :  { %v4130_v20 = vadd.f32 1.0, %v9596_v62  ;;  %v11001_v62 = vld [vmem:[%s11398_s25 + $0x10] sm:$0xff] }
 0xd41   :  { %9601 = vrcp.f32 %v4131_v46  ;;  %v11008_v46 = vld [vmem:[%s11398_s25 + $0x18] sm:$0xff] }
 0xd42   :  { %9603 = vrcp.f32 %v4130_v20  ;;  %v4869_v20 = vld [vmem:[#allocation10 + $0x88] sm:$0xff] }
 0xd47   :  { %v9598_v45 = vpop.eup %9597 }
 0xd48   :  { %v9600_v34 = vpop.eup %9599  ;;  %v4141_v22 = vmul.f32 %v9598_v45, %v10815_v32  ;;  %v4868_v45 = vld [vmem:[#allocation10 + $0x80] sm:$0xff] }
 0xd49   :  { %v4140_v2 = vmul.f32 %v9600_v34, %v10820_v3  ;;  %v9285_v34 = vpack.c.bf16 %v4871_v63, %v4869_v20  ;;  %v7121_v20 = vld [vmem:[%s11367_s9 + $0x178] sm:$0xff] }
 0xd4a   :  { %v4145_v57 = vadd.f32 %v4141_v22, %v3898_v0  ;;  %v4870_v0 = vld [vmem:[#allocation10 + $0x90] sm:$0xff]  ;;  %v4873_v22 = vld [vmem:[#allocation10 + $0xa8] sm:$0xff] }
 0xd4b   :  { %v9602_v27 = vpop.eup %9601  ;;  %v4144_v60 = vadd.f32 %v4140_v2, %v3893_v40  ;;  %v4875_v40 = vld [vmem:[#allocation10 + $0xb8] sm:$0xff]  ;;  %v9287_v2 = vpack.c.bf16 %v4870_v0, %v4868_v45  ;;  %v11071_v45 = vld [vmem:[%s11400_s13] sm:$0xff] }
 0xd4c   :  { %v9604_v52 = vpop.eup %9603  ;;  %v4153_v53 = vmul.f32 0.1, %v4145_v57  ;;  %v4143_v55 = vmul.f32 %v9602_v27, %v10827_v25  ;;  %vm4149_vm12 = vcmp.gt.f32.partialorder %v4145_v57, 0.0  ;;  %v4872_v27 = vld [vmem:[#allocation10 + $0xa0] sm:$0xff] }
 0xd4d   :  { %v4152_v28 = vmul.f32 0.1, %v4144_v60  ;;  %v4142_v6 = vmul.f32 %v9604_v52, %v10832_v31  ;;  %vm4148_vm13 = vcmp.gt.f32.partialorder %v4144_v60, 0.0  ;;  %v4877_v52 = vld [vmem:[#allocation10 + $0xc8] sm:$0xff] }
 0xd4e   :  { %v4147_v13 = vadd.f32 %v4143_v55, %v3908_v48  ;;  %v4157_v39 = vsel %vm4149_vm12, %v4145_v57, %v4153_v53  ;;  %v9289_v57 = vpack.c.bf16 %v4875_v40, %v4873_v22  ;;  %v4879_v48 = vld [vmem:[#allocation10 + $0xd8] sm:$0xff] }
 0xd4f   :  { %v4146_v51 = vadd.f32 %v4142_v6, %v3903_v44  ;;  %v4156_v1 = vsel %vm4148_vm13, %v4144_v60, %v4152_v28  ;;  %v4874_v60 = vld [vmem:[#allocation10 + $0xb0] sm:$0xff]  ;;  %v9293_v55 = vpack.c.bf16 %v4879_v48, %v4877_v52  ;;  %v4876_v44 = vld [vmem:[#allocation10 + $0xc0] sm:$0xff] }
 0xd50   :  { %v4155_v5 = vmul.f32 0.1, %v4147_v13  ;;  %v9197_v17 = vpack.c.bf16 %v4157_v39, %v4156_v1  ;;  %vm4151_vm14 = vcmp.gt.f32.partialorder %v4147_v13, 0.0  ;;  %v9291_v53 = vpack.c.bf16 %v4874_v60, %v4872_v27  ;;  %v4878_v28 = vld [vmem:[#allocation10 + $0xd0] sm:$0xff]  ;;  %v4883_v39 = vld [vmem:[#allocation10 + $0xf8] sm:$0xff] }
 0xd51   :  { %v4154_v14 = vmul.f32 0.1, %v4146_v51  ;;  %vm4150_vm15 = vcmp.gt.f32.partialorder %v4146_v51, 0.0  ;;  %v9295_v6 = vpack.c.bf16 %v4878_v28, %v4876_v44  ;;  %v11085_v44 = vld [vmem:[%s11400_s13 + $0x20] sm:$0xff] }
 0xd52   :  { %9198 = vmatprep.subr.bf16.mxu1 %v9197_v17  ;;  %9206 = vmatprep.subr.bf16.mxu0 %v9197_v17  ;;  %v4159_v29 = vsel %vm4151_vm14, %v4147_v13, %v4155_v5  ;;  %v4881_v13 = vld [vmem:[#allocation10 + $0xe8] sm:$0xff]  ;;  %v4882_v5 = vld [vmem:[#allocation10 + $0xf0] sm:$0xff] }
 0xd53   :  { %9200 = vmatpush3.bf16.msra.mxu1 %v9197_v17  ;;  %9208 = vmatpush3.bf16.msra.mxu0 %v9197_v17  ;;  %v4158_v43 = vsel %vm4150_vm15, %v4146_v51, %v4154_v14  ;;  %v4880_v51 = vld [vmem:[#allocation10 + $0xe0] sm:$0xff]  ;;  %v9297_v1 = vpack.c.bf16 %v4883_v39, %v4881_v13  ;;  %v7127_v28 = vld [vmem:[%s11368_s10 + $0x1] ss:$0 sm:$0xff] }
 0xd54   :  { %v9201_v18 = vpack.c.bf16 %v4159_v29, %v4158_v43  ;;  %v7084_v14 = vld [vmem:[%s11367_s9 + $0xd0] sm:$0xff] }
 0xd56   :  { %9202 = vmatprep.subr.bf16.mxu1 %v9201_v18  ;;  %9210 = vmatprep.subr.bf16.mxu0 %v9201_v18 }
 0xd57   :  { %9204 = vmatpush3.bf16.msra.mxu1 %v9201_v18  ;;  %9212 = vmatpush3.bf16.msra.mxu0 %v9201_v18 }
 0xd58   :  { %9246 = vmatprep.subr.bf16.mxu0 %v9197_v17  ;;  %9214 = vmatprep.subr.bf16.mxu1 %v9213_v19 }
 0xd5a   :  { %8372 = vmatmul.mubr.msk.f32.vlgmr.msra.gmra.mrb[80].mxu0 %vm448_vm1, %v10682_v35  ;;  %8358 = vmatmul.mubr.msk.f32.vlgmr.msra.gmra.mrb[60].mxu1 %vm448_vm1, %v10689_v36  ;;  %v9217_v35 = vpack.c.bf16 %v7097_v33, %v7096_v47  ;;  %v9221_v36 = vpack.c.bf16 %v7099_v41, %v7098_v49  ;;  %v7086_v47 = vld [vmem:[%s11367_s9 + $0xe0] sm:$0xff]  ;;  %v7087_v33 = vld [vmem:[%s11367_s9 + $0xe8] sm:$0xff] }
 0xd5b   :  { %9248 = vmatpush3.bf16.msra.mxu0 %v9197_v17  ;;  %8374 = vmatprep.mubr.msk.f32.mxu0 %vm448_vm1, %v10696_v11  ;;  %v7100_v11 = vld [vmem:[%s11367_s9 + $0x130] sm:$0xff]  ;;  %v9299_v17 = vpack.c.bf16 %v4882_v5, %v4880_v51 }
 0xd5c   :  { %9250 = vmatprep.subr.bf16.mxu0 %v9201_v18  ;;  %8360 = vmatprep.mubr.msk.f32.mxu1 %vm448_vm1, %v10703_v12  ;;  %v7101_v12 = vld [vmem:[%s11367_s9 + $0x138] sm:$0xff] }
 0xd5d   :  { %9216 = vmatpush3.bf16.msra.mxu1 %v9213_v19 }
 0xd5e   :  { %8375 = vmatmul.mubr.msk.f32.gmra.mrb[82].mxu0 %vm448_vm1, %v10710_v4  ;;  %8361 = vmatmul.mubr.msk.f32.gmra.mrb[62].mxu1 %vm448_vm1, %v10717_v16  ;;  %v9225_v4 = vpack.c.bf16 %v7101_v12, %v7100_v11  ;;  %v10978_v16 = vld [vmem:[%s11398_s25] sm:$0xff]  ;;  %v7088_v12 = vld [vmem:[%s11367_s9 + $0xf0] sm:$0xff] }
 0xd5f   :  { %9252 = vmatpush3.bf16.msra.mxu0 %v9201_v18  ;;  %8429 = vmatprep.mubr.msk.f32.mxu0 %vm448_vm1, %v10724_v30  ;;  %v7082_v30 = vld [vmem:[%s11367_s9 + $0xc0] sm:$0xff]  ;;  %v9233_v18 = vpack.c.bf16 %v7085_v23, %v7084_v14 }
 0xd60   :  { %9218 = vmatprep.subr.bf16.mxu1 %v9217_v35 }
 0xd61   :  { %9220 = vmatpush3.bf16.msra.mxu1 %v9217_v35  ;;  %v9237_v35 = vpack.c.bf16 %v7087_v33, %v7086_v47 }
 0xd62   :  { %8430 = vmatmul.mubr.msk.f32.vlgmr.msra.gmra.mrb[84].mxu0 %vm448_vm1, %v10731_v21  ;;  %9222 = vmatprep.subr.bf16.mxu1 %v9221_v36  ;;  %v7083_v21 = vld [vmem:[%s11367_s9 + $0xc8] sm:$0xff] }
 0xd63   :  { %8432 = vmatprep.mubr.msk.f32.mxu0 %vm448_vm1, %v10738_v24  ;;  %v10988_v24 = vpack.c.bf16 %v7083_v21, %v7082_v30 }
 0xd65   :  { %9224 = vmatpush3.bf16.msra.mxu1 %v9221_v36 }
 0xd66   :  { %8433 = vmatmul.mubr.msk.f32.gmra.mrb[86].mxu0 %vm448_vm1, %v10745_v26  ;;  %9226 = vmatprep.subr.bf16.mxu1 %v9225_v4  ;;  %v4762_v26 = vld [vmem:[#allocation8 + $0x40] sm:$0xff] }
 0xd67   :  { %8473 = vmatprep.mubr.msk.f32.mxu0 %vm221_vm0, %v10978_v16  ;;  %v9269_v8 = vpack.c.bf16 %v4763_v50, %v4762_v26  ;;  %v7114_v26 = vld [vmem:[%s11367_s9 + $0x140] sm:$0xff]  ;;  %v7115_v50 = vld [vmem:[%s11367_s9 + $0x148] sm:$0xff] }
 0xd68   :  { %v9253_v56 = vpack.c.bf16 %v7115_v50, %v7114_v26  ;;  %v11170_v26 = vld [vmem:[%s11400_s13 + $0x58] sm:$0xff] }
 0xd69   :  { %9228 = vmatpush3.bf16.msra.mxu1 %v9225_v4  ;;  %9270 = vmatprep.subr.bf16.mxu0 %v9269_v8  ;;  %v7089_v4 = vld [vmem:[%s11367_s9 + $0xf8] sm:$0xff] }
 0xd6a   :  { %9230 = vmatprep.subr.bf16.mxu1 %v10988_v24  ;;  %9272 = vmatpush3.bf16.msra.mxu0 %v9269_v8  ;;  %v9241_v21 = vpack.c.bf16 %v7089_v4, %v7088_v12  ;;  %v11135_v12 = vld [vmem:[%s11400_s13 + $0x18] sm:$0xff] }
 0xd6b   :  { %9274 = vmatprep.subr.bf16.mxu0 %v9273_v61  ;;  %v11142_v4 = vld [vmem:[%s11400_s13 + $0x38] sm:$0xff] }
 0xd6e   :  { %9276 = vmatpush3.bf16.msra.mxu0 %v9273_v61  ;;  %v7116_v61 = vld [vmem:[%s11367_s9 + $0x150] sm:$0xff] }
 0xd6f   :  { %9278 = vmatprep.subr.bf16.mxu0 %v9277_v7  ;;  %v9257_v37 = vpack.c.bf16 %v7117_v38, %v7116_v61 }
 0xd72   :  { %9280 = vmatpush3.bf16.msra.mxu0 %v9277_v7  ;;  %v7118_v7 = vld [vmem:[%s11367_s9 + $0x160] sm:$0xff] }
 0xd73   :  { %9282 = vmatprep.subr.bf16.mxu0 %v9281_v15  ;;  %v9261_v42 = vpack.c.bf16 %v7119_v10, %v7118_v7  ;;  %v7154_v10 = vld [vmem:[%s11373_s15 + $0x40] sm:$0xff] }
 0xd76   :  { %9284 = vmatpush3.bf16.msra.mxu0 %v9281_v15  ;;  %v7120_v15 = vld [vmem:[%s11367_s9 + $0x170] sm:$0xff]  ;;  %s9908_s9 = smov [#allocation17]  }
 0xd77   :  { %9286 = vmatprep.subr.bf16.mxu0 %v9285_v34  ;;  %v9265_v63 = vpack.c.bf16 %v7121_v20, %v7120_v15  ;;  %v7156_v15 = vld [vmem:[%s11373_s15 + $0x50] sm:$0xff]  ;;  %v7157_v20 = vld [vmem:[%s11373_s15 + $0x58] sm:$0xff] }
 0xd79   :  { %8474 = vmatmul.mubr.msk.f32.vlgmr.msra.gmra.mrb[88].mxu0 %vm221_vm0, %v10994_v58 }
 0xd7a   :  { %8476 = vmatprep.mubr.msk.f32.mxu0 %vm221_vm0, %v11001_v62  ;;  %9288 = vmatpush1.bf16.msra.mxu0 %v9287_v2 }
 0xd7b   :  { %9290 = vmatprep.subr.bf16.mxu0 %v9289_v57 }
 0xd7d   :  { %8477 = vmatmul.mubr.msk.f32.gmra.mrb[90].mxu0 %vm221_vm0, %v11008_v46 }
 0xd7e   :  { %4960 = vmatprep.mubr.f32.mxu0 %v9906_v54  ;;  %9292 = vmatpush1.bf16.msra.mxu0 %v9291_v53 }
 0xd7f   :  { %9294 = vmatprep.subr.bf16.mxu0 %v9293_v55 }
 0xd82   :  { %9296 = vmatpush1.bf16.msra.mxu0 %v9295_v6 }
 0xd83   :  { %9298 = vmatprep.subr.bf16.mxu0 %v9297_v1 }
 0xd86   :  { %9300 = vmatpush1.bf16.msra.mxu0 %v9299_v17 }
 0xe2d   :  { %v8373_v9 = vpop.f32.mrb[80].mxu0  ;;  %v8359_v29 = vpop.f32.mrb[60].mxu1 }
 0xe2e   :  { %v4320_v43 = vpop.f32.mrb[81].mxu0  ;;  %v4226_v19 = vpop.f32.mrb[61].mxu1 }
 0xe2f   :  { %8393 = vmatprep.mubr.msk.f32.mxu1 %vm221_vm0, %v4320_v43 }
 0xe30   :  { %8394 = vmatmul.mubr.msk.f32.vlgmr.msra.gmra.mrb[64].mxu1 %vm221_vm0, %v8373_v9 }
 0xe31   :  { %9232 = vmatpush3.bf16.msra.mxu1 %v10988_v24  ;;  %v8376_v49 = vpop.f32.mrb[82].mxu0  ;;  %v8362_v41 = vpop.f32.mrb[62].mxu1 }
 0xe32   :  { %9234 = vmatprep.subr.bf16.mxu1 %v9233_v18  ;;  %v4330_v36 = vpop.f32.mrb[83].mxu0  ;;  %v4236_v11 = vpop.f32.mrb[63].mxu1 }
 0xe33   :  { %8396 = vmatprep.mubr.msk.f32.mxu1 %vm221_vm0, %v4330_v36  ;;  %v11121_v36 = vld [vmem:[%s11400_s13 + $0x10] sm:$0xff] }
 0xe34   :  { %8397 = vmatmul.mubr.msk.f32.gmra.mrb[66].mxu1 %vm221_vm0, %v8376_v49 }
 0xe35   :  { %9236 = vmatpush3.bf16.msra.mxu1 %v9233_v18  ;;  %8415 = vmatprep.mubr.msk.f32.mxu1 %vm221_vm0, %v4226_v19  ;;  %v8431_v30 = vpop.f32.mrb[84].mxu0 }
 0xe36   :  { %9238 = vmatprep.subr.bf16.mxu1 %v9237_v35  ;;  %v4608_v24 = vpop.f32.mrb[85].mxu0 }
 0xe39   :  { %9240 = vmatpush3.bf16.msra.mxu1 %v9237_v35  ;;  %v8434_v8 = vpop.f32.mrb[86].mxu0  ;;  %v11114_v35 = vld [vmem:[%s11400_s13 + $0x28] sm:$0xff] }
 0xe3a   :  { %9242 = vmatprep.subr.bf16.mxu1 %v9241_v21  ;;  %v4618_v59 = vpop.f32.mrb[87].mxu0 }
 0xe3d   :  { %9244 = vmatpush3.bf16.msra.mxu1 %v9241_v21  ;;  %v11156_v21 = vld [vmem:[%s11400_s13 + $0x48] sm:$0xff] }
 0xe3e   :  { %9254 = vmatprep.subr.bf16.mxu1 %v9253_v56 }
 0xe40   :  { %8416 = vmatmul.mubr.msk.f32.vlgmr.msra.gmra.mrb[64].mxu1 %vm221_vm0, %v8359_v29 }
 0xe41   :  { %9256 = vmatpush3.bf16.msra.mxu1 %v9253_v56  ;;  %8418 = vmatprep.mubr.msk.f32.mxu1 %vm221_vm0, %v4236_v11  ;;  %v11128_v11 = vld [vmem:[%s11400_s13 + $0x30] sm:$0xff] }
 0xe42   :  { %9258 = vmatprep.subr.bf16.mxu1 %v9257_v37 }
 0xe44   :  { %8419 = vmatmul.mubr.msk.f32.gmra.mrb[66].mxu1 %vm221_vm0, %v8362_v41  ;;  %v11107_v41 = vld [vmem:[%s11400_s13 + $0x8] sm:$0xff] }
 0xe45   :  { %9260 = vmatpush3.bf16.msra.mxu1 %v9257_v37  ;;  %8451 = vmatprep.mubr.msk.f32.mxu1 %vm221_vm0, %v4608_v24  ;;  %v11163_v24 = vld [vmem:[%s11400_s13 + $0x50] sm:$0xff] }
 0xe46   :  { %9262 = vmatprep.subr.bf16.mxu1 %v9261_v42 }
 0xe49   :  { %9264 = vmatpush3.bf16.msra.mxu1 %v9261_v42 }
 0xe4a   :  { %9266 = vmatprep.subr.bf16.mxu1 %v9265_v63 }
 0xe4c   :  { %v8475_v34 = vpop.f32.mrb[88].mxu0 }
 0xe4d   :  { %9268 = vmatpush3.bf16.msra.mxu1 %v9265_v63  ;;  %v4836_v0 = vpop.f32.mrb[89].mxu0  ;;  %v4860_v40 = vmul.f32 0.1, %v8475_v34  ;;  %vm4856_vm3 = vcmp.gt.f32.partialorder %v8475_v34, 0.0  ;;  %v7158_v63 = vld [vmem:[%s11373_s15 + $0x60] sm:$0xff] }
 0xe4e   :  { %vm4855_vm2 = vcmp.gt.f32.partialorder %v4836_v0, 0.0  ;;  %v4859_v22 = vmul.f32 0.1, %v4836_v0 }
 0xe4f   :  { %v4864_v27 = vsel %vm4856_vm3, %v8475_v34, %v4860_v40  ;;  %v9345_v34 = vpack.c.bf16 %v7157_v20, %v7156_v15  ;;  %v7160_v40 = vld [vmem:[%s11373_s15 + $0x70] sm:$0xff]  ;;  %v5310_v15 = vld [vmem:[#allocation11 + $0x68] sm:$0xff] }
 0xe50   :  { %8452 = vmatmul.mubr.msk.f32.vlgmr.msra.gmra.mrb[64].mxu1 %vm221_vm0, %v8431_v30  ;;  %v4863_v2 = vsel %vm4855_vm2, %v4836_v0, %v4859_v22  ;;  %v8478_v57 = vpop.f32.mrb[90].mxu0  ;;  %v11149_v30 = vld [vmem:[%s11400_s13 + $0x40] sm:$0xff]  ;;  %v7159_v0 = vld [vmem:[%s11373_s15 + $0x68] sm:$0xff]  ;;  %s6860_s13 = sshll.u32 %s9908_s9, 4  ;;  %s6861_s13 = int_to_ptr.vmem [resolvable:$true] %s6860_s13 }
 0xe51   :  { %8454 = vmatprep.mubr.msk.f32.mxu1 %vm221_vm0, %v4618_v59  ;;  %7132 = vmatmul.mubr.msk.f32.vlgmr.msra.gmra.mrb[92].mxu0 %vm221_vm0, %v4863_v2  ;;  %v4846_v60 = vpop.f32.mrb[91].mxu0  ;;  %v4862_v53 = vmul.f32 0.1, %v8478_v57  ;;  %vm4858_vm5 = vcmp.gt.f32.partialorder %v8478_v57, 0.0  ;;  %v9349_v22 = vpack.c.bf16 %v7159_v0, %v7158_v63  ;;  %v7161_v2 = vld [vmem:[%s11373_s15 + $0x78] sm:$0xff]  ;;  %v5311_v63 = vld [vmem:[#allocation11 + $0x70] sm:$0xff]  ;;  %p9864_p3 = scmp.lt.s32.totalorder %s6861_s13, %s6861_s13 }
 0xe52   :  { %4966 = vmatprep.mubr.f32.mxu0 %v9906_v54  ;;  %v4861_v52 = vmul.f32 0.1, %v4846_v60  ;;  %vm4857_vm4 = vcmp.gt.f32.partialorder %v4846_v60, 0.0  ;;  %s9859_s4 = scalar_lea.vmem %s6861_s13, 512 }
 0xe53   :  { %v4866_v55 = vsel %vm4858_vm5, %v8478_v57, %v4862_v53  ;;  %v9353_v57 = vpack.c.bf16 %v7161_v2, %v7160_v40  ;;  %v5308_v53 = vld [vmem:[#allocation11 + $0x58] sm:$0xff]  ;;  %p9860_p2 = scmp.ne.s32.totalorder %s6861_s13, %s9859_s4  ;;  %p9865_p4 = scmp.lt.s32.totalorder %s9859_s4, %s9859_s4 }
 0xe54   :  { %8455 = vmatmul.mubr.msk.f32.gmra.mrb[66].mxu1 %vm221_vm0, %v8434_v8  ;;  %v4865_v48 = vsel %vm4857_vm4, %v4846_v60, %v4861_v52  ;;  %v5306_v60 = vld [vmem:[#allocation11 + $0x48] sm:$0xff]  ;;  %v5307_v52 = vld [vmem:[#allocation11 + $0x50] sm:$0xff] }
 0xe55   :  { %8487 = vmatprep.mubr.msk.f32.mxu1 %vm448_vm1, %v11071_v45  ;;  %7133 = vmatmul.mubr.msk.f32.gmra.mrb[94].mxu0 %vm221_vm0, %v4864_v27  ;;  %v5305_v27 = vld [vmem:[#allocation11 + $0x40] sm:$0xff]  ;;  %p9866_p5 = por %p9865_p4, %p9864_p3 }
 0xe56   :  { %4972 = vmatprep.mubr.f32.mxu0 %v9906_v54 }
 0xe57   :  { %p9867_p6 = pnand %p9866_p5, %p9860_p2 }
 0xe59   :  { %7134 = vmatmul.mubr.msk.f32.gmra.mrb[96].mxu0 %vm221_vm0, %v4865_v48  ;;  %v9325_v48 = vpack.c.bf16 %v5306_v60, %v5305_v27 }
 0xe5a   :  { %4978 = vmatprep.mubr.f32.mxu0 %v9906_v54 }
 0xe5d   :  { %7135 = vmatmul.mubr.msk.f32.gmra.mrb[98].mxu0 %vm221_vm0, %v4866_v55  ;;  %v9329_v55 = vpack.c.bf16 %v5308_v53, %v5307_v52 }
 0xe5e   :  { %8501 = vmatprep.mubr.msk.f32.mxu0 %vm448_vm1, %v11085_v44 }
 0xf23   :  { %v8453_v6 = vpop.f32.mrb[64].mxu1 }
 0xf24   :  { %v4746_v13 = vadd.f32 %v8453_v6, %v7127_v28  ;;  %v4714_v39 = vpop.f32.mrb[65].mxu1  ;;  %v11176_v50 = vpop.f32.mrb[92].mxu0 }
 0xf25   :  { %v4745_v51 = vadd.f32 %v7127_v28, %v4714_v39  ;;  %v4964_v8 = vpop.f32.mrb[93].mxu0 }
 0xf26   :  { %vm4750_vm6 = vcmp.gt.f32.partialorder %v4746_v13, 0.0  ;;  %v4754_v54 = vmul.f32 0.1, %v4746_v13 }
 0xf27   :  { %vm4749_vm7 = vcmp.gt.f32.partialorder %v4745_v51, 0.0  ;;  %v4753_v1 = vmul.f32 0.1, %v4745_v51  ;;  %v8456_v5 = vpop.f32.mrb[66].mxu1 }
 0xf28   :  { %v11092_v17 = vsel %vm4750_vm6, %v4746_v13, %v4754_v54  ;;  %v4748_v14 = vadd.f32 %v8456_v5, %v7127_v28  ;;  %v4724_v23 = vpop.f32.mrb[67].mxu1  ;;  %v11178_v56 = vpop.f32.mrb[94].mxu0 }
 0xf29   :  { %v11094_v9 = vsel %vm4749_vm7, %v4745_v51, %v4753_v1  ;;  %v4747_v29 = vadd.f32 %v7127_v28, %v4724_v23  ;;  %v4970_v59 = vpop.f32.mrb[95].mxu0 }
 0xf2a   :  { %v9301_v43 = vpack.c.bf16 %v11092_v17, %v11094_v9  ;;  %vm4752_vm8 = vcmp.gt.f32.partialorder %v4748_v14, 0.0  ;;  %v4756_v18 = vmul.f32 0.1, %v4748_v14 }
 0xf2b   :  { %vm4751_vm9 = vcmp.gt.f32.partialorder %v4747_v29, 0.0  ;;  %v4755_v19 = vmul.f32 0.1, %v4747_v29 }
 0xf2c   :  { %v11098_v47 = vsel %vm4752_vm8, %v4748_v14, %v4756_v18  ;;  %9302 = vmatprep.subr.bf16.mxu1 %v9301_v43  ;;  %9310 = vmatprep.subr.bf16.mxu0 %v9301_v43  ;;  %v11180_v61 = vpop.f32.mrb[96].mxu0 }
 0xf2d   :  { %v11100_v33 = vsel %vm4751_vm9, %v4747_v29, %v4755_v19  ;;  %9304 = vmatpush3.bf16.msra.mxu1 %v9301_v43  ;;  %9312 = vmatpush3.bf16.msra.mxu0 %v9301_v43  ;;  %v4976_v38 = vpop.f32.mrb[97].mxu0 }
 0xf2e   :  { %v9305_v49 = vpack.c.bf16 %v11098_v47, %v11100_v33 }
 0xf30   :  { %9306 = vmatprep.subr.bf16.mxu1 %v9305_v49  ;;  %9314 = vmatprep.subr.bf16.mxu0 %v9305_v49  ;;  %v11182_v37 = vpop.f32.mrb[98].mxu0 }
 0xf31   :  { %9308 = vmatpush3.bf16.msra.mxu1 %v9305_v49  ;;  %9316 = vmatpush3.bf16.msra.mxu0 %v9305_v49  ;;  %v4982_v7 = vpop.f32.mrb[99].mxu0 }
 0xf32   :  { %9318 = vmatprep.subr.bf16.mxu1 %v9301_v43  ;;  %9326 = vmatprep.subr.bf16.mxu0 %v9325_v48 }
 0xf34   :  { %8488 = vmatmul.mubr.msk.f32.vlgmr.msra.gmra.mrb[68].mxu1 %vm448_vm1, %v11107_v41  ;;  %8502 = vmatmul.mubr.msk.f32.vlgmr.msra.gmra.mrb[100].mxu0 %vm448_vm1, %v11114_v35 }
 0xf35   :  { %9320 = vmatpush3.bf16.msra.mxu1 %v9301_v43  ;;  %8490 = vmatprep.mubr.msk.f32.mxu1 %vm448_vm1, %v11121_v36 }
 0xf36   :  { %9322 = vmatprep.subr.bf16.mxu1 %v9305_v49  ;;  %8504 = vmatprep.mubr.msk.f32.mxu0 %vm448_vm1, %v11128_v11 }
 0xf37   :  { %9328 = vmatpush3.bf16.msra.mxu0 %v9325_v48 }
 0xf38   :  { %8491 = vmatmul.mubr.msk.f32.gmra.mrb[70].mxu1 %vm448_vm1, %v11135_v12  ;;  %8505 = vmatmul.mubr.msk.f32.gmra.mrb[102].mxu0 %vm448_vm1, %v11142_v4 }
 0xf39   :  { %9324 = vmatpush3.bf16.msra.mxu1 %v9305_v49  ;;  %8515 = vmatprep.mubr.msk.f32.mxu1 %vm448_vm1, %v11149_v30 }
 0xf3a   :  { %9330 = vmatprep.subr.bf16.mxu0 %v9329_v55 }
 0xf3b   :  { %9332 = vmatpush3.bf16.msra.mxu0 %v9329_v55 }
 0xf3c   :  { %8516 = vmatmul.mubr.msk.f32.vlgmr.msra.gmra.mrb[72].mxu1 %vm448_vm1, %v11156_v21 }
 0xf3d   :  { %8518 = vmatprep.mubr.msk.f32.mxu1 %vm448_vm1, %v11163_v24 }
 0xf40   :  { %8519 = vmatmul.mubr.msk.f32.gmra.mrb[74].mxu1 %vm448_vm1, %v11170_v26 }
 0xf41   :  { %8559 = vmatprep.mubr.msk.f32.mxu1 %vm221_vm0, %v10978_v16  ;;  %v7155_v16 = vld [vmem:[%s11373_s15 + $0x48] sm:$0xff] }
 0xf42   :  { %v9341_v42 = vpack.c.bf16 %v7155_v16, %v7154_v10 }
 0xf44   :  { %9342 = vmatprep.subr.bf16.mxu1 %v9341_v42 }
 0xf45   :  { %9344 = vmatpush3.bf16.msra.mxu1 %v9341_v42  ;;  %v5309_v42 = vld [vmem:[#allocation11 + $0x60] sm:$0xff] }
 0xf46   :  { %9346 = vmatprep.subr.bf16.mxu1 %v9345_v34  ;;  %v9333_v20 = vpack.c.bf16 %v5310_v15, %v5309_v42 }
 0xf48   :  { %9334 = vmatprep.subr.bf16.mxu0 %v9333_v20 }
 0xf49   :  { %9348 = vmatpush3.bf16.msra.mxu1 %v9345_v34  ;;  %9336 = vmatpush3.bf16.msra.mxu0 %v9333_v20  ;;  %v5312_v34 = vld [vmem:[#allocation11 + $0x78] sm:$0xff] }
 0xf4a   :  { %9350 = vmatprep.subr.bf16.mxu1 %v9349_v22  ;;  %v9337_v0 = vpack.c.bf16 %v5312_v34, %v5311_v63 }
 0xf4c   :  { %9338 = vmatprep.subr.bf16.mxu0 %v9337_v0 }
 0xf4d   :  { %9352 = vmatpush3.bf16.msra.mxu1 %v9349_v22  ;;  %9340 = vmatpush3.bf16.msra.mxu0 %v9337_v0 }
 0xf4e   :  { %9354 = vmatprep.subr.bf16.mxu1 %v9353_v57 }
 0xf51   :  { %9356 = vmatpush3.bf16.msra.mxu1 %v9353_v57 }
 0xf54   :  { %8560 = vmatmul.mubr.msk.f32.vlgmr.msra.gmra.mrb[76].mxu1 %vm221_vm0, %v10994_v58 }
 0xf55   :  { %8562 = vmatprep.mubr.msk.f32.mxu1 %vm221_vm0, %v11001_v62 }
 0xf58   :  { %8563 = vmatmul.mubr.msk.f32.gmra.mrb[78].mxu1 %vm221_vm0, %v11008_v46 }
 0xf59   :  { %8581 = vmatprep.mubr.msk.f32.mxu1 %vm448_vm1, %v11071_v45 }
0x1007   :  { %v8489_v28 = vpop.f32.mrb[68].mxu1  ;;  %v8503_v6 = vpop.f32.mrb[100].mxu0 }
0x1008   :  { %v5071_v58 = vmul.f32 %v8489_v28, %v11178_v56  ;;  %5165 = vrot.lane.b32.xlu1 %v8503_v6, %s9907_s19  ;;  %v5051_v62 = vpop.f32.mrb[69].mxu1  ;;  %v5140_v46 = vpop.f32.mrb[101].mxu0 }
0x1009   :  { %v5070_v13 = vmul.f32 %v5051_v62, %v11176_v50  ;;  %5163 = vrot.lane.b32.xlu0 %v5140_v46, %s9907_s19 }
0x100b   :  { %v8492_v39 = vpop.f32.mrb[70].mxu1  ;;  %v8506_v51 = vpop.f32.mrb[102].mxu0 }
0x100c   :  { %v5073_v54 = vmul.f32 %v8492_v39, %v11182_v37  ;;  %5169 = vrot.lane.b32.xlu1 %v8506_v51, %s9907_s19  ;;  %v5061_v1 = vpop.f32.mrb[71].mxu1  ;;  %v5150_v5 = vpop.f32.mrb[103].mxu0 }
0x100d   :  { %v5072_v14 = vmul.f32 %v5061_v1, %v11180_v61  ;;  %5167 = vrot.lane.b32.xlu0 %v5150_v5, %s9907_s19 }
0x100f   :  { %v8517_v23 = vpop.f32.mrb[72].mxu1 }
0x1010   :  { %v5285_v29 = vmul.f32 %v8517_v23, %v4970_v59  ;;  %v5265_v43 = vpop.f32.mrb[73].mxu1 }
0x1011   :  { %v5284_v18 = vmul.f32 %v5265_v43, %v4964_v8 }
0x1013   :  { %v8520_v19 = vpop.f32.mrb[74].mxu1 }
0x1014   :  { %v5287_v49 = vmul.f32 %v8520_v19, %v4982_v7  ;;  %v5275_v10 = vpop.f32.mrb[75].mxu1 }
0x1015   :  { %v5286_v16 = vmul.f32 %v5275_v10, %v4976_v38  ;;  %v5525_v38 = vld [vmem:[#allocation13 + $0x8] sm:$0xff] }
0x1016   :  { %8565 = vmatprep.subr.mxu0 %v5525_v38 }
0x1027   :  { %v8561_v22 = vpop.f32.mrb[76].mxu1 }
0x1028   :  { %v5493_v40 = vpop.f32.mrb[77].mxu1  ;;  %vm5513_vm3 = vcmp.gt.f32.partialorder %v8561_v22, 0.0 }
0x1029   :  { %v5516_v19 = vmul.f32 0.1, %v5493_v40  ;;  %vm5512_vm13 = vcmp.gt.f32.partialorder %v5493_v40, 0.0 }
0x102b   :  { %v8564_v57 = vpop.f32.mrb[78].mxu1 }
0x102c   :  { %v5503_v27 = vpop.f32.mrb[79].mxu1  ;;  %v5519_v15 = vmul.f32 0.1, %v8564_v57  ;;  %vm5515_vm4 = vcmp.gt.f32.partialorder %v8564_v57, 0.0 }
0x102d   :  { %vm5514_vm2 = vcmp.gt.f32.partialorder %v5503_v27, 0.0 }
0x102e   :  { %v5523_v20 = vsel %vm5515_vm4, %v8564_v57, %v5519_v15  ;;  %v5847_v15 = vld [vmem:[#allocation14 + $0x100] sm:$0xff] }
0x107a   :  { %v5166_v2 = vpop.permute.xlu1 %5165 }
0x107b   :  { %v5176_v59 = vmul.f32 %v5166_v2, %v11178_v56  ;;  %v5164_v8 = vpop.permute.xlu0 %5163 }
0x107c   :  { %v5175_v7 = vmul.f32 %v5164_v8, %v11176_v50 }
0x107d   :  { %5185 = vrot.lane.b32.xlu1 %v5176_v59, %s9907_s19 }
0x107e   :  { %v5170_v60 = vpop.permute.xlu1 %5169  ;;  %5183 = vrot.lane.b32.xlu0 %v5175_v7, %s9907_s19 }
0x107f   :  { %v5178_v52 = vmul.f32 %v5170_v60, %v11182_v37  ;;  %v5168_v48 = vpop.permute.xlu0 %5167 }
0x1080   :  { %v5177_v53 = vmul.f32 %v5168_v48, %v11180_v61 }
0x1081   :  { %5189 = vrot.lane.b32.xlu1 %v5178_v52, %s9907_s19 }
0x1082   :  { %5187 = vrot.lane.b32.xlu0 %v5177_v53, %s9907_s19 }
0x10ef   :  { %v5186_v56 = vpop.permute.xlu1 %5185 }
0x10f0   :  { %v5196_v50 = vadd.f32 %v5186_v56, %v5071_v58  ;;  %v5184_v55 = vpop.permute.xlu0 %5183 }
0x10f1   :  { %v5195_v28 = vadd.f32 %v5184_v55, %v5070_v13 }
0x10f2   :  { %v5289_v6 = vadd.f32 %v5285_v29, %v5196_v50  ;;  %v5520_v29 = vsel %vm5512_vm13, %v5493_v40, %v5516_v19 }
0x10f3   :  { %v5288_v62 = vadd.f32 %v5284_v18, %v5195_v28  ;;  %v5190_v46 = vpop.permute.xlu1 %5189 }
0x10f4   :  { %v5297_v39 = vmul.f32 0.1, %v5289_v6  ;;  %v5198_v51 = vadd.f32 %v5190_v46, %v5073_v54  ;;  %v5188_v1 = vpop.permute.xlu0 %5187  ;;  %vm5293_vm10 = vcmp.gt.f32.partialorder %v5289_v6, 0.0  ;;  %v5518_v54 = vmul.f32 0.1, %v5503_v27 }
0x10f5   :  { %v5296_v5 = vmul.f32 0.1, %v5288_v62  ;;  %v5197_v37 = vadd.f32 %v5188_v1, %v5072_v14  ;;  %vm5292_vm12 = vcmp.gt.f32.partialorder %v5288_v62, 0.0  ;;  %v5517_v14 = vmul.f32 0.1, %v8561_v22 }
0x10f6   :  { %v5291_v23 = vadd.f32 %v5287_v49, %v5198_v51  ;;  %v5301_v10 = vsel %vm5293_vm10, %v5289_v6, %v5297_v39  ;;  %v5522_v49 = vsel %vm5514_vm2, %v5503_v27, %v5518_v54  ;;  %v7149_v6 = vld [vmem:[%s11372_s14 + $0x1] ss:$0 sm:$0xff] }
0x10f7   :  { %v5290_v61 = vadd.f32 %v5286_v16, %v5197_v37  ;;  %v5300_v43 = vsel %vm5292_vm12, %v5288_v62, %v5296_v5  ;;  %v5521_v16 = vsel %vm5513_vm3, %v8561_v22, %v5517_v14 }
0x10f8   :  { %v5299_v42 = vmul.f32 0.1, %v5291_v23  ;;  %8537 = vmatprep.mubr.msk.f32.mxu0 %vm221_vm0, %v5300_v43  ;;  %vm5295_vm15 = vcmp.gt.f32.partialorder %v5291_v23, 0.0 }
0x10f9   :  { %v5298_v58 = vmul.f32 0.1, %v5290_v61  ;;  %8538 = vmatmul.mubr.msk.f32.vlgmr.msra.gmra.mrb[104].mxu0 %vm221_vm0, %v5301_v10  ;;  %vm5294_vm14 = vcmp.gt.f32.partialorder %v5290_v61, 0.0 }
0x10fa   :  { %8566 = vmatpush3.msra.mxu0 %v5525_v38  ;;  %v5303_v18 = vsel %vm5295_vm15, %v5291_v23, %v5299_v42 }
0x10fb   :  { %v5302_v13 = vsel %vm5294_vm14, %v5290_v61, %v5298_v58 }
0x10fc   :  { %8540 = vmatprep.mubr.msk.f32.mxu0 %vm221_vm0, %v5302_v13 }
0x10fd   :  { %8541 = vmatmul.mubr.msk.f32.gmra.mrb[106].mxu0 %vm221_vm0, %v5303_v18 }
0x10fe   :  { %8567 = vmatprep.mubr.msk.f32.mxu0 %vm1022_vm11, %v5520_v29 }
0x1101   :  { %8568 = vmatmul.mubr.msk.f32.vlgmr.msra.gmra.mrb[108].mxu0 %vm1022_vm11, %v5521_v16 }
0x1102   :  { %8570 = vmatprep.mubr.msk.f32.mxu0 %vm1022_vm11, %v5522_v49 }
0x1105   :  { %8571 = vmatmul.mubr.msk.f32.gmra.mrb[110].mxu0 %vm1022_vm11, %v5523_v20  ;;  %v5848_v20 = vld [vmem:[#allocation14 + $0x108] sm:$0xff] }
0x1106   :  { %8595 = vmatprep.mubr.msk.f32.mxu0 %vm448_vm1, %v11085_v44 }
0x11cc   :  { %v8539_v63 = vpop.f32.mrb[104].mxu0 }
0x11cd   :  { %v5399_v34 = vpop.f32.mrb[105].mxu0  ;;  %v5405_v39 = vadd.f32 %v8539_v63, %v7149_v6 }
0x11ce   :  { %v5400_v1 = vadd.f32 %v7149_v6, %v5399_v34 }
0x11d0   :  { %v8542_v0 = vpop.f32.mrb[106].mxu0 }
0x11d1   :  { %v5409_v40 = vpop.f32.mrb[107].mxu0  ;;  %v5415_v19 = vadd.f32 %v8542_v0, %v7149_v6  ;;  %v5849_v0 = vld [vmem:[#allocation14 + $0x110] sm:$0xff] }
0x11d2   :  { %v5410_v58 = vadd.f32 %v7149_v6, %v5409_v40  ;;  %v5850_v40 = vld [vmem:[#allocation14 + $0x118] sm:$0xff] }
0x11d4   :  { %v8569_v2 = vpop.f32.mrb[108].mxu0 }
0x11d5   :  { %v7171_v59 = vmul.f32 -1.442695, %v8569_v2  ;;  %v5604_v8 = vpop.f32.mrb[109].mxu0  ;;  %v5851_v2 = vld [vmem:[#allocation14 + $0x120] sm:$0xff] }
0x11d6   :  { %v7170_v22 = vmul.f32 -1.442695, %v5604_v8  ;;  %v9377_v8 = vpack.c.bf16 %v5850_v40, %v5849_v0 }
0x11d7   :  { %9605 = vpow2.f32 %v7171_v59  ;;  %v5852_v59 = vld [vmem:[#allocation14 + $0x128] sm:$0xff] }
0x11d8   :  { %9607 = vpow2.f32 %v7170_v22  ;;  %v8572_v7 = vpop.f32.mrb[110].mxu0  ;;  %v9381_v22 = vpack.c.bf16 %v5852_v59, %v5851_v2 }
0x11d9   :  { %v7173_v38 = vmul.f32 -1.442695, %v8572_v7  ;;  %v5614_v27 = vpop.f32.mrb[111].mxu0  ;;  %v5853_v7 = vld [vmem:[#allocation14 + $0x130] sm:$0xff] }
0x11da   :  { %v7172_v60 = vmul.f32 -1.442695, %v5614_v27 }
0x11db   :  { %9609 = vpow2.f32 %v7173_v38  ;;  %v5854_v38 = vld [vmem:[#allocation14 + $0x138] sm:$0xff] }
0x11dc   :  { %9611 = vpow2.f32 %v7172_v60  ;;  %v9385_v27 = vpack.c.bf16 %v5854_v38, %v5853_v7  ;;  %v5753_v60 = vld [vmem:[#allocation14 + $0xc0] sm:$0xff] }
0x11e1   :  { %v9606_v57 = vpop.eup %9605 }
0x11e2   :  { %v9608_v52 = vpop.eup %9607  ;;  %v5636_v48 = vadd.f32 1.0, %v9606_v57  ;;  %v5754_v57 = vld [vmem:[#allocation14 + $0xc8] sm:$0xff] }
0x11e3   :  { %v5635_v53 = vadd.f32 1.0, %v9608_v52  ;;  %v9389_v52 = vpack.c.bf16 %v5754_v57, %v5753_v60  ;;  %v6442_v57 = vld [vmem:[#allocation16 + $0x58] sm:$0xff] }
0x11e4   :  { %9613 = vrcp.f32 %v5636_v48  ;;  %v5755_v48 = vld [vmem:[#allocation14 + $0xd0] sm:$0xff] }
0x11e5   :  { %v9610_v56 = vpop.eup %9609  ;;  %9615 = vrcp.f32 %v5635_v53  ;;  %v5756_v53 = vld [vmem:[#allocation14 + $0xd8] sm:$0xff] }
0x11e6   :  { %v9612_v50 = vpop.eup %9611  ;;  %v5638_v55 = vadd.f32 1.0, %v9610_v56 }
0x11e7   :  { %v5637_v28 = vadd.f32 1.0, %v9612_v50 }
0x11e8   :  { %9617 = vrcp.f32 %v5638_v55 }
0x11e9   :  { %9619 = vrcp.f32 %v5637_v28  ;;  %v9393_v28 = vpack.c.bf16 %v5756_v53, %v5755_v48  ;;  %v6346_v48 = vld [vmem:[#allocation16 + $0x8] sm:$0xff] }
0x11ee   :  { %v9614_v62 = vpop.eup %9613 }
0x11ef   :  { %v9616_v46 = vpop.eup %9615  ;;  %v5648_v51 = vmul.f32 %v9614_v62, %v11092_v17  ;;  %v5757_v62 = vld [vmem:[#allocation14 + $0xe0] sm:$0xff] }
0x11f0   :  { %v5647_v5 = vmul.f32 %v9616_v46, %v11094_v9  ;;  %v5758_v46 = vld [vmem:[#allocation14 + $0xe8] sm:$0xff] }
0x11f1   :  { %v5652_v37 = vadd.f32 %v5648_v51, %v5405_v39  ;;  %v9397_v51 = vpack.c.bf16 %v5758_v46, %v5757_v62  ;;  %v6347_v62 = vld [vmem:[#allocation16 + $0x10] sm:$0xff]  ;;  %v6348_v46 = vld [vmem:[#allocation16 + $0x18] sm:$0xff] }
0x11f2   :  { %v9618_v23 = vpop.eup %9617  ;;  %v5651_v61 = vadd.f32 %v5647_v5, %v5400_v1 }
0x11f3   :  { %v9620_v43 = vpop.eup %9619  ;;  %v5660_v10 = vmul.f32 0.1, %v5652_v37  ;;  %v5650_v42 = vmul.f32 %v9618_v23, %v11098_v47  ;;  %vm5656_vm11 = vcmp.gt.f32.partialorder %v5652_v37, 0.0  ;;  %v5760_v23 = vld [vmem:[#allocation14 + $0xf8] sm:$0xff] }
0x11f4   :  { %v5659_v13 = vmul.f32 0.1, %v5651_v61  ;;  %v5649_v54 = vmul.f32 %v9620_v43, %v11100_v33  ;;  %vm5655_vm5 = vcmp.gt.f32.partialorder %v5651_v61, 0.0  ;;  %v9373_v33 = vpack.c.bf16 %v5848_v20, %v5847_v15  ;;  %v6142_v15 = vld [vmem:[#allocation14 + $0x178] sm:$0xff] }
0x11f5   :  { %v5654_v29 = vadd.f32 %v5650_v42, %v5415_v19  ;;  %v5664_v14 = vsel %vm5656_vm11, %v5652_v37, %v5660_v10  ;;  %v5759_v37 = vld [vmem:[#allocation14 + $0xf0] sm:$0xff]  ;;  %v6135_v10 = vld [vmem:[#allocation14 + $0x140] sm:$0xff]  ;;  %v6136_v42 = vld [vmem:[#allocation14 + $0x148] sm:$0xff] }
0x11f6   :  { %v5653_v17 = vadd.f32 %v5649_v54, %v5410_v58  ;;  %v5663_v18 = vsel %vm5655_vm5, %v5651_v61, %v5659_v13  ;;  %v9401_v43 = vpack.c.bf16 %v5760_v23, %v5759_v37  ;;  %v9413_v13 = vpack.c.bf16 %v6136_v42, %v6135_v10  ;;  %v6727_v42 = vld [vmem:[#allocation16 + $0x80] sm:$0xff] }
0x11f7   :  { %v5662_v49 = vmul.f32 0.1, %v5654_v29  ;;  %v9357_v9 = vpack.c.bf16 %v5664_v14, %v5663_v18  ;;  %vm5658_vm6 = vcmp.gt.f32.partialorder %v5654_v29, 0.0  ;;  %v6138_v14 = vld [vmem:[#allocation14 + $0x158] sm:$0xff]  ;;  %v6139_v18 = vld [vmem:[#allocation14 + $0x160] sm:$0xff] }
0x11f8   :  { %v5661_v16 = vmul.f32 0.1, %v5653_v17  ;;  %vm5657_vm7 = vcmp.gt.f32.partialorder %v5653_v17, 0.0 }
0x11f9   :  { %9358 = vmatprep.subr.bf16.mxu1 %v9357_v9  ;;  %9366 = vmatprep.subr.bf16.mxu0 %v9357_v9  ;;  %v5666_v47 = vsel %vm5658_vm6, %v5654_v29, %v5662_v49  ;;  %v6137_v29 = vld [vmem:[#allocation14 + $0x150] sm:$0xff]  ;;  %v6140_v49 = vld [vmem:[#allocation14 + $0x168] sm:$0xff] }
0x11fa   :  { %9360 = vmatpush3.bf16.msra.mxu1 %v9357_v9  ;;  %9368 = vmatpush3.bf16.msra.mxu0 %v9357_v9  ;;  %v5665_v63 = vsel %vm5657_vm7, %v5653_v17, %v5661_v16  ;;  %v9417_v17 = vpack.c.bf16 %v6138_v14, %v6137_v29  ;;  %v6141_v16 = vld [vmem:[#allocation14 + $0x170] sm:$0xff]  ;;  %v6730_v29 = vld [vmem:[#allocation16 + $0x98] sm:$0xff] }
0x11fb   :  { %v9361_v34 = vpack.c.bf16 %v5666_v47, %v5665_v63  ;;  %v9425_v20 = vpack.c.bf16 %v6142_v15, %v6141_v16  ;;  %v7199_v47 = vld [vmem:[%s11376_s18 + $0x1] ss:$0 sm:$0xff]  ;;  %v6734_v16 = vld [vmem:[#allocation16 + $0xb8] sm:$0xff] }
0x11fd   :  { %9362 = vmatprep.subr.bf16.mxu1 %v9361_v34  ;;  %9370 = vmatprep.subr.bf16.mxu0 %v9361_v34 }
0x11fe   :  { %9364 = vmatpush3.bf16.msra.mxu1 %v9361_v34  ;;  %9372 = vmatpush3.bf16.msra.mxu0 %v9361_v34 }
0x11ff   :  { %9406 = vmatprep.subr.bf16.mxu0 %v9357_v9  ;;  %9374 = vmatprep.subr.bf16.mxu1 %v9373_v33 }
0x1201   :  { %8596 = vmatmul.mubr.msk.f32.vlgmr.msra.gmra.mrb[112].mxu0 %vm448_vm1, %v11114_v35  ;;  %8582 = vmatmul.mubr.msk.f32.vlgmr.msra.gmra.mrb[80].mxu1 %vm448_vm1, %v11107_v41 }
0x1202   :  { %9408 = vmatpush3.bf16.msra.mxu0 %v9357_v9  ;;  %8598 = vmatprep.mubr.msk.f32.mxu0 %vm448_vm1, %v11128_v11  ;;  %v9421_v9 = vpack.c.bf16 %v6140_v49, %v6139_v18  ;;  %v6732_v18 = vld [vmem:[#allocation16 + $0xa8] sm:$0xff] }
0x1203   :  { %9410 = vmatprep.subr.bf16.mxu0 %v9361_v34  ;;  %8584 = vmatprep.mubr.msk.f32.mxu1 %vm448_vm1, %v11121_v36 }
0x1204   :  { %9376 = vmatpush3.bf16.msra.mxu1 %v9373_v33 }
0x1205   :  { %8599 = vmatmul.mubr.msk.f32.gmra.mrb[114].mxu0 %vm448_vm1, %v11142_v4  ;;  %8585 = vmatmul.mubr.msk.f32.gmra.mrb[82].mxu1 %vm448_vm1, %v11135_v12 }
0x1206   :  { %9412 = vmatpush3.bf16.msra.mxu0 %v9361_v34  ;;  %8653 = vmatprep.mubr.msk.f32.mxu0 %vm448_vm1, %v11149_v30 }
0x1207   :  { %9378 = vmatprep.subr.bf16.mxu1 %v9377_v8 }
0x1208   :  { %9380 = vmatpush3.bf16.msra.mxu1 %v9377_v8 }
0x1209   :  { %8654 = vmatmul.mubr.msk.f32.vlgmr.msra.gmra.mrb[116].mxu0 %vm448_vm1, %v11156_v21  ;;  %9382 = vmatprep.subr.bf16.mxu1 %v9381_v22 }
0x120a   :  { %8656 = vmatprep.mubr.msk.f32.mxu0 %vm448_vm1, %v11163_v24 }
0x120c   :  { %9384 = vmatpush3.bf16.msra.mxu1 %v9381_v22 }
0x120d   :  { %8657 = vmatmul.mubr.msk.f32.gmra.mrb[118].mxu0 %vm448_vm1, %v11170_v26  ;;  %9386 = vmatprep.subr.bf16.mxu1 %v9385_v27 }
0x120e   :  { %8689 = vmatprep.mubr.msk.f32.mxu0 %vm448_vm1, %v11071_v45 }
0x1210   :  { %9388 = vmatpush3.bf16.msra.mxu1 %v9385_v27 }
0x1211   :  { %9390 = vmatprep.subr.bf16.mxu1 %v9389_v52 }
0x12d4   :  { %v8597_v56 = vpop.f32.mrb[112].mxu0  ;;  %v8583_v50 = vpop.f32.mrb[80].mxu1 }
0x12d5   :  { %v5827_v55 = vpop.f32.mrb[113].mxu0  ;;  %v5733_v6 = vpop.f32.mrb[81].mxu1 }
0x12d6   :  { %8617 = vmatprep.mubr.msk.f32.mxu1 %vm221_vm0, %v5827_v55 }
0x12d7   :  { %8618 = vmatmul.mubr.msk.f32.vlgmr.msra.gmra.mrb[84].mxu1 %vm221_vm0, %v8597_v56 }
0x12d8   :  { %9392 = vmatpush3.bf16.msra.mxu1 %v9389_v52  ;;  %v8600_v45 = vpop.f32.mrb[114].mxu0  ;;  %v8586_v39 = vpop.f32.mrb[82].mxu1  ;;  %v6345_v52 = vld [vmem:[#allocation16] sm:$0xff] }
0x12d9   :  { %9394 = vmatprep.subr.bf16.mxu1 %v9393_v28  ;;  %v5837_v1 = vpop.f32.mrb[115].mxu0  ;;  %v5743_v5 = vpop.f32.mrb[83].mxu1 }
0x12da   :  { %8620 = vmatprep.mubr.msk.f32.mxu1 %vm221_vm0, %v5837_v1  ;;  %v6349_v1 = vld [vmem:[#allocation16 + $0x20] sm:$0xff] }
0x12db   :  { %8621 = vmatmul.mubr.msk.f32.gmra.mrb[86].mxu1 %vm221_vm0, %v8600_v45 }
0x12dc   :  { %9396 = vmatpush3.bf16.msra.mxu1 %v9393_v28  ;;  %8639 = vmatprep.mubr.msk.f32.mxu1 %vm221_vm0, %v5733_v6  ;;  %v8655_v61 = vpop.f32.mrb[116].mxu0 }
0x12dd   :  { %9398 = vmatprep.subr.bf16.mxu1 %v9397_v51  ;;  %v6115_v19 = vpop.f32.mrb[117].mxu0 }
0x12e0   :  { %9400 = vmatpush3.bf16.msra.mxu1 %v9397_v51  ;;  %v8658_v58 = vpop.f32.mrb[118].mxu0  ;;  %v9465_v51 = vpack.c.bf16 %v6348_v46, %v6347_v62 }
0x12e1   :  { %9402 = vmatprep.subr.bf16.mxu1 %v9401_v43  ;;  %v6125_v54 = vpop.f32.mrb[119].mxu0 }
0x12e4   :  { %9404 = vmatpush3.bf16.msra.mxu1 %v9401_v43  ;;  %v6351_v43 = vld [vmem:[#allocation16 + $0x30] sm:$0xff] }
0x12e5   :  { %9414 = vmatprep.subr.bf16.mxu1 %v9413_v13 }
0x12e7   :  { %8640 = vmatmul.mubr.msk.f32.vlgmr.msra.gmra.mrb[84].mxu1 %vm221_vm0, %v8583_v50 }
0x12e8   :  { %9416 = vmatpush3.bf16.msra.mxu1 %v9413_v13  ;;  %8642 = vmatprep.mubr.msk.f32.mxu1 %vm221_vm0, %v5743_v5  ;;  %v6350_v5 = vld [vmem:[#allocation16 + $0x28] sm:$0xff] }
0x12e9   :  { %9418 = vmatprep.subr.bf16.mxu1 %v9417_v17 }
0x12eb   :  { %8643 = vmatmul.mubr.msk.f32.gmra.mrb[86].mxu1 %vm221_vm0, %v8586_v39 }
0x12ec   :  { %9420 = vmatpush3.bf16.msra.mxu1 %v9417_v17  ;;  %8675 = vmatprep.mubr.msk.f32.mxu1 %vm221_vm0, %v6115_v19  ;;  %v6352_v19 = vld [vmem:[#allocation16 + $0x38] sm:$0xff]  ;;  %v6731_v17 = vld [vmem:[#allocation16 + $0xa0] sm:$0xff] }
0x12ed   :  { %9422 = vmatprep.subr.bf16.mxu1 %v9421_v9  ;;  %v9473_v10 = vpack.c.bf16 %v6352_v19, %v6351_v43  ;;  %v9493_v49 = vpack.c.bf16 %v6732_v18, %v6731_v17 }
0x12f0   :  { %9424 = vmatpush3.bf16.msra.mxu1 %v9421_v9  ;;  %v6733_v9 = vld [vmem:[#allocation16 + $0xb0] sm:$0xff] }
0x12f1   :  { %9426 = vmatprep.subr.bf16.mxu1 %v9425_v20  ;;  %v9497_v15 = vpack.c.bf16 %v6734_v16, %v6733_v9 }
0x12f4   :  { %9428 = vmatpush3.bf16.msra.mxu1 %v9425_v20  ;;  %v7224_v20 = vld [vmem:[%s11401_s16] ss:$0 sm:$0xff] }
0x12f7   :  { %8676 = vmatmul.mubr.msk.f32.vlgmr.msra.gmra.mrb[84].mxu1 %vm221_vm0, %v8655_v61  ;;  %v9469_v61 = vpack.c.bf16 %v6350_v5, %v6349_v1 }
0x12f8   :  { %8678 = vmatprep.mubr.msk.f32.mxu1 %vm221_vm0, %v6125_v54  ;;  %v6729_v54 = vld [vmem:[#allocation16 + $0x90] sm:$0xff] }
0x12f9   :  { %v9489_v14 = vpack.c.bf16 %v6730_v29, %v6729_v54 }
0x12fb   :  { %8679 = vmatmul.mubr.msk.f32.gmra.mrb[86].mxu1 %vm221_vm0, %v8658_v58  ;;  %v6728_v58 = vld [vmem:[#allocation16 + $0x88] sm:$0xff] }
0x12fc   :  { %8761 = vmatprep.mubr.msk.f32.mxu1 %vm448_vm1, %v11149_v30  ;;  %v9485_v13 = vpack.c.bf16 %v6728_v58, %v6727_v42 }
0x13ca   :  { %v8677_v63 = vpop.f32.mrb[84].mxu1 }
0x13cb   :  { %v6253_v34 = vadd.f32 %v8677_v63, %v7199_v47  ;;  %v6221_v33 = vpop.f32.mrb[85].mxu1 }
0x13cc   :  { %v6252_v0 = vadd.f32 %v7199_v47, %v6221_v33 }
0x13cd   :  { %v6257_v40 = vadd.f32 %v6253_v34, %v10815_v32  ;;  %v6439_v32 = vld [vmem:[#allocation16 + $0x40] sm:$0xff] }
0x13ce   :  { %v6256_v2 = vadd.f32 %v6252_v0, %v10820_v3  ;;  %v8680_v59 = vpop.f32.mrb[86].mxu1  ;;  %v6440_v3 = vld [vmem:[#allocation16 + $0x48] sm:$0xff] }
0x13cf   :  { %v6255_v8 = vadd.f32 %v8680_v59, %v7199_v47  ;;  %v6231_v22 = vpop.f32.mrb[87].mxu1  ;;  %v9657_v0 = vld [vmem:[%s11399_s26 + $0x8] sm:$0xff] }
0x13d0   :  { %v9429_v7 = vpack.c.bf16 %v6257_v40, %v6256_v2  ;;  %v6254_v38 = vadd.f32 %v7199_v47, %v6231_v22  ;;  %v9658_v2 = vld [vmem:[%s11399_s26] sm:$0xff] }
0x13d1   :  { %v6259_v27 = vadd.f32 %v6255_v8, %v10827_v25  ;;  %v9445_v25 = vpack.c.bf16 %v6440_v3, %v6439_v32 }
0x13d2   :  { %v6258_v30 = vadd.f32 %v6254_v38, %v10832_v31  ;;  %9430 = vmatprep.subr.bf16.mxu0 %v9429_v7  ;;  %9478 = vmatprep.subr.bf16.mxu1 %v9429_v7  ;;  %v6441_v31 = vld [vmem:[#allocation16 + $0x50] sm:$0xff] }
0x13d3   :  { %9432 = vmatpush3.bf16.msra.mxu0 %v9429_v7  ;;  %9480 = vmatpush3.bf16.msra.mxu1 %v9429_v7 }
0x13d4   :  { %v9433_v60 = vpack.c.bf16 %v6259_v27, %v6258_v30  ;;  %v9659_v27 = vld [vmem:[%s11399_s26 + $0x18] sm:$0xff] }
0x13d6   :  { %9434 = vmatprep.subr.bf16.mxu0 %v9433_v60  ;;  %9482 = vmatprep.subr.bf16.mxu1 %v9433_v60 }
0x13d7   :  { %9436 = vmatpush3.bf16.msra.mxu0 %v9433_v60  ;;  %9484 = vmatpush3.bf16.msra.mxu1 %v9433_v60 }
0x13d8   :  { %9438 = vmatprep.subr.bf16.mxu0 %v9429_v7 }
0x13da   :  { %8690 = vmatmul.mubr.msk.f32.vlgmr.msra.gmra.mrb[120].mxu0 %vm448_vm1, %v11107_v41  ;;  %8762 = vmatmul.mubr.msk.f32.vlgmr.msra.gmra.mrb[88].mxu1 %vm448_vm1, %v11156_v21  ;;  %v9449_v41 = vpack.c.bf16 %v6442_v57, %v6441_v31  ;;  %v6444_v21 = vld [vmem:[#allocation16 + $0x68] sm:$0xff] }
0x13db   :  { %9440 = vmatpush3.bf16.msra.mxu0 %v9429_v7  ;;  %8692 = vmatprep.mubr.msk.f32.mxu0 %vm448_vm1, %v11121_v36  ;;  %v6443_v36 = vld [vmem:[#allocation16 + $0x60] sm:$0xff] }
0x13dc   :  { %9442 = vmatprep.subr.bf16.mxu0 %v9433_v60  ;;  %8764 = vmatprep.mubr.msk.f32.mxu1 %vm448_vm1, %v11163_v24  ;;  %v6446_v24 = vld [vmem:[#allocation16 + $0x78] sm:$0xff] }
0x13de   :  { %8693 = vmatmul.mubr.msk.f32.gmra.mrb[122].mxu0 %vm448_vm1, %v11135_v12  ;;  %8765 = vmatmul.mubr.msk.f32.gmra.mrb[90].mxu1 %vm448_vm1, %v11170_v26  ;;  %v9453_v12 = vpack.c.bf16 %v6444_v21, %v6443_v36 }
0x13df   :  { %9444 = vmatpush3.bf16.msra.mxu0 %v9433_v60  ;;  %8703 = vmatprep.mubr.msk.f32.mxu0 %vm448_vm1, %v11085_v44  ;;  %v6445_v44 = vld [vmem:[#allocation16 + $0x70] sm:$0xff] }
0x13e0   :  { %9446 = vmatprep.subr.bf16.mxu0 %v9445_v25  ;;  %v9457_v26 = vpack.c.bf16 %v6446_v24, %v6445_v44  ;;  %v9660_v60 = vld [vmem:[%s11399_s26 + $0x10] sm:$0xff] }
0x13e2   :  { %8704 = vmatmul.mubr.msk.f32.vlgmr.msra.gmra.mrb[124].mxu0 %vm448_vm1, %v11114_v35  ;;  %v9461_v35 = vpack.c.bf16 %v6346_v48, %v6345_v52 }
0x13e3   :  { %8706 = vmatprep.mubr.msk.f32.mxu0 %vm448_vm1, %v11128_v11  ;;  %9448 = vmatpush3.bf16.msra.mxu0 %v9445_v25 }
0x13e4   :  { %9450 = vmatprep.subr.bf16.mxu0 %v9449_v41 }
0x13e6   :  { %8707 = vmatmul.mubr.msk.f32.gmra.mrb[126].mxu0 %vm448_vm1, %v11142_v4 }
0x13e7   :  { %9452 = vmatpush3.bf16.msra.mxu0 %v9449_v41 }
0x13e8   :  { %9454 = vmatprep.subr.bf16.mxu0 %v9453_v12 }
0x13eb   :  { %9456 = vmatpush3.bf16.msra.mxu0 %v9453_v12 }
0x13ec   :  { %9458 = vmatprep.subr.bf16.mxu0 %v9457_v26 }
0x13ef   :  { %9460 = vmatpush3.bf16.msra.mxu0 %v9457_v26 }
0x13f0   :  { %9462 = vmatprep.subr.bf16.mxu0 %v9461_v35 }
0x14ad   :  { %v8691_v53 = vpop.f32.mrb[120].mxu0  ;;  %v8763_v11 = vpop.f32.mrb[88].mxu1 }
0x14ae   :  { %v6326_v56 = vpop.f32.mrb[121].mxu0  ;;  %v6707_v50 = vpop.f32.mrb[89].mxu1 }
0x14b1   :  { %v8694_v55 = vpop.f32.mrb[122].mxu0  ;;  %v8766_v28 = vpop.f32.mrb[90].mxu1 }
0x14b2   :  { %v6336_v6 = vpop.f32.mrb[123].mxu0  ;;  %v6717_v4 = vpop.f32.mrb[91].mxu1 }
0x14b5   :  { %v8705_v45 = vpop.f32.mrb[124].mxu0 }
0x14b6   :  { %v6419_v39 = vpop.f32.mrb[125].mxu0 }
0x14b7   :  { %8725 = vmatprep.mubr.msk.f32.mxu0 %vm221_vm0, %v6419_v39 }
0x14b8   :  { %8726 = vmatmul.mubr.msk.f32.vlgmr.msra.gmra.mrb[128].mxu0 %vm221_vm0, %v8705_v45 }
0x14b9   :  { %9464 = vmatpush3.bf16.msra.mxu0 %v9461_v35  ;;  %v8708_v37 = vpop.f32.mrb[126].mxu0 }
0x14ba   :  { %v6429_v23 = vpop.f32.mrb[127].mxu0  ;;  %9466 = vmatprep.subr.bf16.mxu0 %v9465_v51 }
0x14bb   :  { %8728 = vmatprep.mubr.msk.f32.mxu0 %vm221_vm0, %v6429_v23 }
0x14bc   :  { %8729 = vmatmul.mubr.msk.f32.gmra.mrb[130].mxu0 %vm221_vm0, %v8708_v37 }
0x14bd   :  { %9468 = vmatpush3.bf16.msra.mxu0 %v9465_v51  ;;  %8747 = vmatprep.mubr.msk.f32.mxu0 %vm221_vm0, %v6326_v56 }
0x14be   :  { %9470 = vmatprep.subr.bf16.mxu0 %v9469_v61 }
0x14c1   :  { %9472 = vmatpush3.bf16.msra.mxu0 %v9469_v61 }
0x14c2   :  { %9474 = vmatprep.subr.bf16.mxu0 %v9473_v10 }
0x14c5   :  { %9476 = vmatpush3.bf16.msra.mxu0 %v9473_v10 }
0x14c6   :  { %9486 = vmatprep.subr.bf16.mxu0 %v9485_v13 }
0x14c8   :  { %8748 = vmatmul.mubr.msk.f32.vlgmr.msra.gmra.mrb[128].mxu0 %vm221_vm0, %v8691_v53 }
0x14c9   :  { %8750 = vmatprep.mubr.msk.f32.mxu0 %vm221_vm0, %v6336_v6  ;;  %9488 = vmatpush3.bf16.msra.mxu0 %v9485_v13 }
0x14ca   :  { %9490 = vmatprep.subr.bf16.mxu0 %v9489_v14 }
0x14cc   :  { %8751 = vmatmul.mubr.msk.f32.gmra.mrb[130].mxu0 %vm221_vm0, %v8694_v55 }
0x14cd   :  { %9492 = vmatpush3.bf16.msra.mxu0 %v9489_v14  ;;  %8783 = vmatprep.mubr.msk.f32.mxu0 %vm221_vm0, %v6707_v50 }
0x14ce   :  { %9494 = vmatprep.subr.bf16.mxu0 %v9493_v49 }
0x14d1   :  { %9496 = vmatpush3.bf16.msra.mxu0 %v9493_v49 }
0x14d2   :  { %9498 = vmatprep.subr.bf16.mxu0 %v9497_v15 }
0x14d5   :  { %9500 = vmatpush3.bf16.msra.mxu0 %v9497_v15 }
0x14d8   :  { %8784 = vmatmul.mubr.msk.f32.vlgmr.msra.gmra.mrb[128].mxu0 %vm221_vm0, %v8763_v11 }
0x14d9   :  { %8786 = vmatprep.mubr.msk.f32.mxu0 %vm221_vm0, %v6717_v4 }
0x14dc   :  { %8787 = vmatmul.mubr.msk.f32.gmra.mrb[130].mxu0 %vm221_vm0, %v8766_v28 }
0x15ab   :  { %v8785_v47 = vpop.f32.mrb[128].mxu0 }
0x15ac   :  { %v6844_v63 = vadd.f32 %v8785_v47, %v7224_v20  ;;  %v6813_v34 = vpop.f32.mrb[129].mxu0 }
0x15ad   :  { %v6843_v33 = vadd.f32 %v7224_v20, %v6813_v34 }
0x15ae   :  { %v6848_v40 = vadd.f32 %v9657_v0, %v6844_v63 }
0x15af   :  { %v6847_v59 = vadd.f32 %v9658_v2, %v6843_v33  ;;  %v8788_v8 = vpop.f32.mrb[130].mxu0 }
0x15b0   :  { %6852 = vst.msk [vmem:[#allocation17 + $0x8] sm:$0xff] %vm221_vm0, %v6848_v40  ;;  %v6846_v22 = vadd.f32 %v8788_v8, %v7224_v20  ;;  %v6823_v7 = vpop.f32.mrb[131].mxu0 }
0x15b1   :  { %6851 = vst.msk [vmem:[#allocation17] sm:$0xff] %vm221_vm0, %v6847_v59  ;;  %v6845_v38 = vadd.f32 %v7224_v20, %v6823_v7 }
0x15b2   :  { %v6850_v30 = vadd.f32 %v9659_v27, %v6846_v22 }
0x15b3   :  { %v6849_v32 = vadd.f32 %v9660_v60, %v6845_v38 }
0x15b4   :  { %6854 = vst.msk [vmem:[#allocation17 + $0x18] sm:$0xff] %vm221_vm0, %v6850_v30 }
0x15b5   :  { %6853 = vst.msk [vmem:[#allocation17 + $0x10] sm:$0xff] %vm221_vm0, %v6849_v32 }
0x15b6   :  { %9870 = shalt.err (!%p9867_p6)
}
0x15b7   :  { %s11402_s17 = sld [smem:[#allocation31_spill]] }
0x15bd   :  { %s9871_s5 = scalar_lea.hbm %s11402_s17, 512 }
0x15be   :  { %p9872_p7 = scmp.ne.s32.totalorder %s11402_s17, %s9871_s5  ;;  %p9875_p8 = scmp.lt.u32.totalorder %s9871_s5, %s11402_s17 }
0x15c0   :  { %p9877_p9 = pnand %p9875_p8, %p9872_p7 }
0x15c2   :  { %9880 = shalt.err (!%p9877_p9)
}
0x15c3   :  { %6866 = dma.vmem_to_hbm [thread:$0]  %s6861_s13, 512, %s11402_s17, [#allocation4], %s9894_s22, %s9894_s22, %s9895_s23  }
0x15c4   :  { %9891 = dma.done.wait [#allocation4], 512  }
0x15c5   :  { %9892 = vsyncadd [#allocation4], 4294966784 }
0x15c6   :  { %6870 = vsyncpa [#allocation3], 1 }
0x15c7   :  { %6871 = vsyncpa [#allocation6], 1 }
0x15c8   :  { %6872 = vsyncpa [#allocation9], 1 }
0x15c9   :  { %6873 = vsyncpa [#allocation12], 1 }
0x15ca   :  { %6874 = vsyncpa [#allocation15], 1 }
0x15cb   :  { %6875 = vsyncpa [#allocation4], 1 }

</bundles_post_ra>
